<compile_context>
chip_gen: v6e
topology: v6e:2x2x1
jax: 0.10.0
libtpu: 0.0.40
codegen_flags: <defaults>
</compile_context>

<pallas_src>
import functools

import jax
import jax.numpy as jnp
from jax.experimental import pallas as pl
from jax.experimental.pallas import tpu as pltpu


# ---------------------------------------------------------------------------
# Fused fire-block kernel (one depth-slab of one batch element per grid step)
# ---------------------------------------------------------------------------
def _fire_kernel(x_ref, wsq_ref, wtap_ref, b_ref, out_ref, sq_ref, *,
                 L, Lout, offsets, chunk):
    # x_ref   : (1, 1, Cin+1, L)     channels-first slab (+halo), flat spatial
    # wsq_ref : (Csq, Cin+1)         squeeze weight with bias folded in
    # wtap_ref: (27, 2Ce, Csq)       per-tap weights, expand1 folded at tap 13
    # b_ref   : (2Ce, 1)             [b_e1 ; b_e2]
    # out_ref : (1, 1, 2Ce, Lout)    output slab (padded spatial grid, flat)
    # sq_ref  : (Csq, Lp)            VMEM scratch for the squeezed slab
    csq = sq_ref.shape[0]
    c2 = out_ref.shape[2]

    # --- squeeze: 1x1x1 conv + ReLU (bias comes from the ones-channel) ------
    xt = x_ref[0, 0]                                        # (Cin+1, L)
    sq = jnp.dot(wsq_ref[...], xt, preferred_element_type=jnp.float32)
    sq = jnp.maximum(sq, 0.0)                               # (Csq, L)
    sq_ref[...] = jnp.zeros_like(sq_ref)                    # zero slack tail
    sq_ref[:, :L] = sq

    # --- expand1 + expand2 + concat: 27-tap accumulation --------------------
    # out[:, q] = ReLU( b + sum_t W_t^T @ sq[:, q + offset_t] )
    for q0 in range(0, Lout, chunk):
        qn = min(chunk, Lout - q0)
        acc = jnp.zeros((c2, qn), jnp.float32)
        for t, ofs in enumerate(offsets):
            acc = acc + jnp.dot(wtap_ref[t],
                                sq_ref[:, ofs + q0: ofs + q0 + qn],
                                preferred_element_type=jnp.float32)
        out_ref[0, 0, :, q0:q0 + qn] = jnp.maximum(acc + b_ref[...], 0.0)


# ---------------------------------------------------------------------------
# Wrapper: layout plumbing + pallas_call
# ---------------------------------------------------------------------------
def fire_block(x_ncdhw, params, *, target_rows=2048):
    w_sq, b_sq, w_e1, b_e1, w_e2, b_e2 = params
    N, Cin, D, H, W = x_ncdhw.shape
    Csq = w_sq.shape[1]
    Ce = w_e1.shape[1]
    C2 = 2 * Ce
    Cin1 = Cin + 1
    f32 = jnp.float32

    # Depth-slab size: aim for ~target_rows output voxels per grid step.
    td = int(max(1, min(D, target_rows // max(1, H * W))))
    nblk = -(-D // td)
    Dp = nblk * td

    P2 = (H + 2) * (W + 2)            # padded plane size
    L = (td + 2) * P2                 # slab-with-halo, flattened
    Lout = td * P2                    # output rows per slab (padded H/W grid)
    Lp = ((L + 2 * (W + 2) + 2 + 127) // 128) * 128   # scratch lanes (+slack)

    # --- input: channels-first, +ones channel (bias & pad mask), halo slabs --
    x = x_ncdhw.astype(f32)
    x_aug = jnp.concatenate([x, jnp.ones((N, 1, D, H, W), f32)], axis=1)
    x_p = jnp.pad(x_aug, ((0, 0), (0, 0),
                          (1, 1 + (Dp - D)), (1, 1), (1, 1)))
    idx = jnp.arange(nblk)[:, None] * td + jnp.arange(td + 2)[None, :]
    x_ov = x_p[:, :, idx]                              # (N,Cin1,nblk,td+2,H+2,W+2)
    x_ov = jnp.transpose(x_ov, (0, 2, 1, 3, 4, 5)).reshape(N, nblk, Cin1, L)

    # --- weights: fold squeeze bias; fold expand1 into the center tap -------
    w_sqT = jnp.concatenate([w_sq, b_sq], axis=0).T.astype(f32)   # (Csq, Cin+1)
    w_e2_t = w_e2.reshape(27, Csq, Ce).astype(f32)                # (kd,kh,kw) order
    e1_taps = jnp.zeros((27, Csq, Ce), f32).at[13].set(w_e1.astype(f32))
    w_taps = jnp.concatenate([e1_taps, w_e2_t], axis=-1)          # (27, Csq, 2Ce)
    w_tapsT = jnp.transpose(w_taps, (0, 2, 1))                    # (27, 2Ce, Csq)
    b_comb = jnp.concatenate([b_e1, b_e2], axis=-1).astype(f32).reshape(C2, 1)

    offsets = tuple(kd * P2 + kh * (W + 2) + kw
                    for kd in range(3) for kh in range(3) for kw in range(3))

    kernel = functools.partial(_fire_kernel, L=L, Lout=Lout,
                               offsets=offsets, chunk=1024)

    flops = 2 * N * Dp * H * W * (Cin1 * Csq + 27 * Csq * C2)
    bytes_accessed = 4 * (x_ov.size + N * nblk * C2 * Lout
                          + w_sqT.size + w_tapsT.size + b_comb.size)

    out = pl.pallas_call(
        kernel,
        out_shape=jax.ShapeDtypeStruct((N, nblk, C2, Lout), f32),
        grid=(N, nblk),
        in_specs=[
            pl.BlockSpec((1, 1, Cin1, L), lambda n, j: (n, j, 0, 0)),
            pl.BlockSpec((Csq, Cin1), lambda n, j: (0, 0)),
            pl.BlockSpec((27, C2, Csq), lambda n, j: (0, 0, 0)),
            pl.BlockSpec((C2, 1), lambda n, j: (0, 0)),
        ],
        out_specs=pl.BlockSpec((1, 1, C2, Lout), lambda n, j: (n, j, 0, 0)),
        scratch_shapes=[pltpu.VMEM((Csq, Lp), f32)],
        compiler_params=pltpu.CompilerParams(
            dimension_semantics=("parallel", "parallel")),
        cost_estimate=pl.CostEstimate(flops=flops, transcendentals=0,
                                      bytes_accessed=bytes_accessed),
    )(x_ov, w_sqT, w_tapsT, b_comb)

    # --- unpack: (N, nblk, 2Ce, td*(H+2)*(W+2)) -> (N, 2Ce, D, H, W) ---------
    o = out.reshape(N, nblk, C2, td, H + 2, W + 2)[:, :, :, :, :H, :W]
    o = jnp.transpose(o, (0, 2, 1, 3, 4, 5)).reshape(N, C2, Dp, H, W)
    return o[:, :, :D]
    # TODO(synk): optional bf16 activation/weight path (halves HBM traffic on
    # v6e/v7x) kept out to match the f32 PyTorch reference bit-for-bit-ish.


# ---------------------------------------------------------------------------
# Pure-JAX reference (lax conv) for correctness checking.
# ---------------------------------------------------------------------------
def fire_block_ref(x_ncdhw, params):
    w_sq, b_sq, w_e1, b_e1, w_e2, b_e2 = params
    Cin, Csq = w_sq.shape
    Ce = w_e1.shape[1]
    dn = ('NDHWC', 'DHWIO', 'NDHWC')
    x = jnp.transpose(x_ncdhw, (0, 2, 3, 4, 1)).astype(jnp.float32)

    sq = jax.lax.conv_general_dilated(
        x, w_sq.reshape(1, 1, 1, Cin, Csq), (1, 1, 1), 'VALID',
        dimension_numbers=dn) + b_sq
    sq = jax.nn.relu(sq)
    e1 = jax.lax.conv_general_dilated(
        sq, w_e1.reshape(1, 1, 1, Csq, Ce), (1, 1, 1), 'VALID',
        dimension_numbers=dn) + b_e1
    e1 = jax.nn.relu(e1)
    e2 = jax.lax.conv_general_dilated(
        sq, w_e2, (1, 1, 1), ((1, 1), (1, 1), (1, 1)),
        dimension_numbers=dn) + b_e2
    e2 = jax.nn.relu(e2)
    out = jnp.concatenate([e1, e2], axis=-1)
    return jnp.transpose(out, (0, 4, 1, 2, 3))


def make_params(in_channels, squeeze_channels, key):
    Ce = squeeze_channels * 4
    ks = jax.random.split(key, 6)
    w_sq = jax.random.normal(ks[0], (in_channels, squeeze_channels),
                             jnp.float32) * 0.3
    b_sq = jax.random.normal(ks[1], (1, squeeze_channels), jnp.float32) * 0.1
    w_e1 = jax.random.normal(ks[2], (squeeze_channels, Ce),
                             jnp.float32) * 0.3
    b_e1 = jax.random.normal(ks[3], (1, Ce), jnp.float32) * 0.1
    w_e2 = jax.random.normal(ks[4], (3, 3, 3, squeeze_channels, Ce),
                             jnp.float32) * 0.1
    b_e2 = jax.random.normal(ks[5], (1, Ce), jnp.float32) * 0.1
    return (w_sq, b_sq, w_e1, b_e1, w_e2, b_e2)


if __name__ == "__main__":
    N, Cin, D, H, W = 2, 4, 8, 8, 8
    squeeze_channels = 4                       # -> output channels = 8 * 4 = 32

    key = jax.random.PRNGKey(0)
    kx, kp = jax.random.split(key)
    x = jax.random.normal(kx, (N, Cin, D, H, W), jnp.float32)
    params = make_params(Cin, squeeze_channels, kp)

    fire = jax.jit(fire_block)
    out = jax.block_until_ready(fire(x, params))

    ref = jax.block_until_ready(fire_block_ref(x, params))
    assert out.shape == (N, 8 * squeeze_channels, D, H, W), out.shape
    assert jnp.allclose(out, ref, atol=1e-4, rtol=1e-4), \
        float(jnp.max(jnp.abs(out - ref)))

    print("KERNEL_OK")
</pallas_src>

<mosaic_0001>
module attributes {stable_mosaic.version = 11 : i64} {
  func.func @_fire_kernel(%arg0: i32, %arg1: i32, %arg2: memref<1x1x5x1000xf32, #tpu.memory_space<vmem>>, %arg3: memref<4x5xf32, #tpu.memory_space<vmem>>, %arg4: memref<27x32x4xf32, #tpu.memory_space<vmem>>, %arg5: memref<32x1xf32, #tpu.memory_space<vmem>>, %arg6: memref<1x1x32x800xf32, #tpu.memory_space<vmem>>, %arg7: memref<4x1024xf32, #tpu.memory_space<vmem>>) attributes {dimension_semantics = [#tpu.dimension_semantics<parallel>, #tpu.dimension_semantics<parallel>], iteration_bounds = array<i64: 2, 1>, scalar_prefetch = 0 : i64, scratch_operands = 1 : i64, tpu.core_type = #tpu.core_type<tc>, window_params = [{transform_indices = @transform_0, window_bounds = array<i64: 1, 1, 5, 1000>}, {pipeline_mode = #tpu.pipeline_mode<synchronous>, transform_indices = @transform_1, window_bounds = array<i64: 4, 5>}, {pipeline_mode = #tpu.pipeline_mode<synchronous>, transform_indices = @transform_2, window_bounds = array<i64: 27, 32, 4>}, {pipeline_mode = #tpu.pipeline_mode<synchronous>, transform_indices = @transform_3, window_bounds = array<i64: 32, 1>}, {transform_indices = @transform_4, window_bounds = array<i64: 1, 1, 32, 800>}]} {
    %c0 = arith.constant 0 : index
    %c0_0 = arith.constant 0 : index
    %c0_1 = arith.constant 0 : index
    %c0_2 = arith.constant 0 : index
    %0 = vector.load %arg2[%c0, %c0_0, %c0_1, %c0_2] : memref<1x1x5x1000xf32, #tpu.memory_space<vmem>>, vector<1x1x5x1000xf32>
    %1 = vector.shape_cast %0 : vector<1x1x5x1000xf32> to vector<5x1000xf32>
    %c0_3 = arith.constant 0 : index
    %c0_4 = arith.constant 0 : index
    %2 = vector.load %arg3[%c0_3, %c0_4] : memref<4x5xf32, #tpu.memory_space<vmem>>, vector<4x5xf32>
    %cst = arith.constant dense<0.000000e+00> : vector<4x1000xf32>
    %3 = tpu.matmul %2, %1, %cst {dimension_numbers = #tpu.dot_dimension_numbers<[1], [0], [0], [1], [0, 0, 1, 1], [], []>} : vector<4x5xf32>, vector<5x1000xf32>, vector<4x1000xf32> -> vector<4x1000xf32>
    %cst_5 = arith.constant 0.000000e+00 : f32
    %4 = vector.broadcast %cst_5 : f32 to vector<4x1000xf32>
    %5 = arith.maximumf %3, %4 : vector<4x1000xf32>
    %cst_6 = arith.constant 0.000000e+00 : f32
    %6 = vector.broadcast %cst_6 : f32 to vector<4x1024xf32>
    %c0_7 = arith.constant 0 : index
    %c0_8 = arith.constant 0 : index
    %7 = vector.load %arg7[%c0_7, %c0_8] : memref<4x1024xf32, #tpu.memory_space<vmem>>, vector<4x1024xf32>
    tpu.vector_store %arg7[%c0_7, %c0_8], %6 {strides = array<i32>} : memref<4x1024xf32, #tpu.memory_space<vmem>>, vector<4x1024xf32>,
    %c0_9 = arith.constant 0 : index
    %c0_10 = arith.constant 0 : index
    %8 = vector.load %arg7[%c0_9, %c0_10] : memref<4x1024xf32, #tpu.memory_space<vmem>>, vector<4x1000xf32>
    tpu.vector_store %arg7[%c0_9, %c0_10], %5 {strides = array<i32>} : memref<4x1024xf32, #tpu.memory_space<vmem>>, vector<4x1000xf32>,
    %cst_11 = arith.constant 0.000000e+00 : f32
    %9 = vector.broadcast %cst_11 : f32 to vector<32x800xf32>
    %c0_12 = arith.constant 0 : index
    %c0_13 = arith.constant 0 : index
    %c0_14 = arith.constant 0 : index
    %10 = vector.load %arg4[%c0_12, %c0_13, %c0_14] : memref<27x32x4xf32, #tpu.memory_space<vmem>>, vector<1x32x4xf32>
    %11 = vector.shape_cast %10 : vector<1x32x4xf32> to vector<32x4xf32>
    %c0_15 = arith.constant 0 : index
    %c0_16 = arith.constant 0 : index
    %12 = vector.load %arg7[%c0_15, %c0_16] : memref<4x1024xf32, #tpu.memory_space<vmem>>, vector<4x800xf32>
    %cst_17 = arith.constant dense<0.000000e+00> : vector<32x800xf32>
    %13 = tpu.matmul %11, %12, %cst_17 {dimension_numbers = #tpu.dot_dimension_numbers<[1], [0], [0], [1], [0, 0, 1, 1], [], []>} : vector<32x4xf32>, vector<4x800xf32>, vector<32x800xf32> -> vector<32x800xf32>
    %14 = arith.addf %9, %13 : vector<32x800xf32>
    %c1 = arith.constant 1 : index
    %c0_18 = arith.constant 0 : index
    %c0_19 = arith.constant 0 : index
    %15 = vector.load %arg4[%c1, %c0_18, %c0_19] : memref<27x32x4xf32, #tpu.memory_space<vmem>>, vector<1x32x4xf32>
    %16 = vector.shape_cast %15 : vector<1x32x4xf32> to vector<32x4xf32>
    %c0_20 = arith.constant 0 : index
    %c1_21 = arith.constant 1 : index
    %17 = vector.load %arg7[%c0_20, %c1_21] : memref<4x1024xf32, #tpu.memory_space<vmem>>, vector<4x800xf32>
    %cst_22 = arith.constant dense<0.000000e+00> : vector<32x800xf32>
    %18 = tpu.matmul %16, %17, %cst_22 {dimension_numbers = #tpu.dot_dimension_numbers<[1], [0], [0], [1], [0, 0, 1, 1], [], []>} : vector<32x4xf32>, vector<4x800xf32>, vector<32x800xf32> -> vector<32x800xf32>
    %19 = arith.addf %14, %18 : vector<32x800xf32>
    %c2 = arith.constant 2 : index
    %c0_23 = arith.constant 0 : index
    %c0_24 = arith.constant 0 : index
    %20 = vector.load %arg4[%c2, %c0_23, %c0_24] : memref<27x32x4xf32, #tpu.memory_space<vmem>>, vector<1x32x4xf32>
    %21 = vector.shape_cast %20 : vector<1x32x4xf32> to vector<32x4xf32>
    %c0_25 = arith.constant 0 : index
    %c2_26 = arith.constant 2 : index
    %22 = vector.load %arg7[%c0_25, %c2_26] : memref<4x1024xf32, #tpu.memory_space<vmem>>, vector<4x800xf32>
    %cst_27 = arith.constant dense<0.000000e+00> : vector<32x800xf32>
    %23 = tpu.matmul %21, %22, %cst_27 {dimension_numbers = #tpu.dot_dimension_numbers<[1], [0], [0], [1], [0, 0, 1, 1], [], []>} : vector<32x4xf32>, vector<4x800xf32>, vector<32x800xf32> -> vector<32x800xf32>
    %24 = arith.addf %19, %23 : vector<32x800xf32>
    %c3 = arith.constant 3 : index
    %c0_28 = arith.constant 0 : index
    %c0_29 = arith.constant 0 : index
    %25 = vector.load %arg4[%c3, %c0_28, %c0_29] : memref<27x32x4xf32, #tpu.memory_space<vmem>>, vector<1x32x4xf32>
    %26 = vector.shape_cast %25 : vector<1x32x4xf32> to vector<32x4xf32>
    %c0_30 = arith.constant 0 : index
    %c10 = arith.constant 10 : index
    %27 = vector.load %arg7[%c0_30, %c10] : memref<4x1024xf32, #tpu.memory_space<vmem>>, vector<4x800xf32>
    %cst_31 = arith.constant dense<0.000000e+00> : vector<32x800xf32>
    %28 = tpu.matmul %26, %27, %cst_31 {dimension_numbers = #tpu.dot_dimension_numbers<[1], [0], [0], [1], [0, 0, 1, 1], [], []>} : vector<32x4xf32>, vector<4x800xf32>, vector<32x800xf32> -> vector<32x800xf32>
    %29 = arith.addf %24, %28 : vector<32x800xf32>
    %c4 = arith.constant 4 : index
    %c0_32 = arith.constant 0 : index
    %c0_33 = arith.constant 0 : index
    %30 = vector.load %arg4[%c4, %c0_32, %c0_33] : memref<27x32x4xf32, #tpu.memory_space<vmem>>, vector<1x32x4xf32>
    %31 = vector.shape_cast %30 : vector<1x32x4xf32> to vector<32x4xf32>
    %c0_34 = arith.constant 0 : index
    %c11 = arith.constant 11 : index
    %32 = vector.load %arg7[%c0_34, %c11] : memref<4x1024xf32, #tpu.memory_space<vmem>>, vector<4x800xf32>
    %cst_35 = arith.constant dense<0.000000e+00> : vector<32x800xf32>
    %33 = tpu.matmul %31, %32, %cst_35 {dimension_numbers = #tpu.dot_dimension_numbers<[1], [0], [0], [1], [0, 0, 1, 1], [], []>} : vector<32x4xf32>, vector<4x800xf32>, vector<32x800xf32> -> vector<32x800xf32>
    %34 = arith.addf %29, %33 : vector<32x800xf32>
    %c5 = arith.constant 5 : index
    %c0_36 = arith.constant 0 : index
    %c0_37 = arith.constant 0 : index
    %35 = vector.load %arg4[%c5, %c0_36, %c0_37] : memref<27x32x4xf32, #tpu.memory_space<vmem>>, vector<1x32x4xf32>
    %36 = vector.shape_cast %35 : vector<1x32x4xf32> to vector<32x4xf32>
    %c0_38 = arith.constant 0 : index
    %c12 = arith.constant 12 : index
    %37 = vector.load %arg7[%c0_38, %c12] : memref<4x1024xf32, #tpu.memory_space<vmem>>, vector<4x800xf32>
    %cst_39 = arith.constant dense<0.000000e+00> : vector<32x800xf32>
    %38 = tpu.matmul %36, %37, %cst_39 {dimension_numbers = #tpu.dot_dimension_numbers<[1], [0], [0], [1], [0, 0, 1, 1], [], []>} : vector<32x4xf32>, vector<4x800xf32>, vector<32x800xf32> -> vector<32x800xf32>
    %39 = arith.addf %34, %38 : vector<32x800xf32>
    %c6 = arith.constant 6 : index
    %c0_40 = arith.constant 0 : index
    %c0_41 = arith.constant 0 : index
    %40 = vector.load %arg4[%c6, %c0_40, %c0_41] : memref<27x32x4xf32, #tpu.memory_space<vmem>>, vector<1x32x4xf32>
    %41 = vector.shape_cast %40 : vector<1x32x4xf32> to vector<32x4xf32>
    %c0_42 = arith.constant 0 : index
    %c20 = arith.constant 20 : index
    %42 = vector.load %arg7[%c0_42, %c20] : memref<4x1024xf32, #tpu.memory_space<vmem>>, vector<4x800xf32>
    %cst_43 = arith.constant dense<0.000000e+00> : vector<32x800xf32>
    %43 = tpu.matmul %41, %42, %cst_43 {dimension_numbers = #tpu.dot_dimension_numbers<[1], [0], [0], [1], [0, 0, 1, 1], [], []>} : vector<32x4xf32>, vector<4x800xf32>, vector<32x800xf32> -> vector<32x800xf32>
    %44 = arith.addf %39, %43 : vector<32x800xf32>
    %c7 = arith.constant 7 : index
    %c0_44 = arith.constant 0 : index
    %c0_45 = arith.constant 0 : index
    %45 = vector.load %arg4[%c7, %c0_44, %c0_45] : memref<27x32x4xf32, #tpu.memory_space<vmem>>, vector<1x32x4xf32>
    %46 = vector.shape_cast %45 : vector<1x32x4xf32> to vector<32x4xf32>
    %c0_46 = arith.constant 0 : index
    %c21 = arith.constant 21 : index
    %47 = vector.load %arg7[%c0_46, %c21] : memref<4x1024xf32, #tpu.memory_space<vmem>>, vector<4x800xf32>
    %cst_47 = arith.constant dense<0.000000e+00> : vector<32x800xf32>
    %48 = tpu.matmul %46, %47, %cst_47 {dimension_numbers = #tpu.dot_dimension_numbers<[1], [0], [0], [1], [0, 0, 1, 1], [], []>} : vector<32x4xf32>, vector<4x800xf32>, vector<32x800xf32> -> vector<32x800xf32>
    %49 = arith.addf %44, %48 : vector<32x800xf32>
    %c8 = arith.constant 8 : index
    %c0_48 = arith.constant 0 : index
    %c0_49 = arith.constant 0 : index
    %50 = vector.load %arg4[%c8, %c0_48, %c0_49] : memref<27x32x4xf32, #tpu.memory_space<vmem>>, vector<1x32x4xf32>
    %51 = vector.shape_cast %50 : vector<1x32x4xf32> to vector<32x4xf32>
    %c0_50 = arith.constant 0 : index
    %c22 = arith.constant 22 : index
    %52 = vector.load %arg7[%c0_50, %c22] : memref<4x1024xf32, #tpu.memory_space<vmem>>, vector<4x800xf32>
    %cst_51 = arith.constant dense<0.000000e+00> : vector<32x800xf32>
    %53 = tpu.matmul %51, %52, %cst_51 {dimension_numbers = #tpu.dot_dimension_numbers<[1], [0], [0], [1], [0, 0, 1, 1], [], []>} : vector<32x4xf32>, vector<4x800xf32>, vector<32x800xf32> -> vector<32x800xf32>
    %54 = arith.addf %49, %53 : vector<32x800xf32>
    %c9 = arith.constant 9 : index
    %c0_52 = arith.constant 0 : index
    %c0_53 = arith.constant 0 : index
    %55 = vector.load %arg4[%c9, %c0_52, %c0_53] : memref<27x32x4xf32, #tpu.memory_space<vmem>>, vector<1x32x4xf32>
    %56 = vector.shape_cast %55 : vector<1x32x4xf32> to vector<32x4xf32>
    %c0_54 = arith.constant 0 : index
    %c100 = arith.constant 100 : index
    %57 = vector.load %arg7[%c0_54, %c100] : memref<4x1024xf32, #tpu.memory_space<vmem>>, vector<4x800xf32>
    %cst_55 = arith.constant dense<0.000000e+00> : vector<32x800xf32>
    %58 = tpu.matmul %56, %57, %cst_55 {dimension_numbers = #tpu.dot_dimension_numbers<[1], [0], [0], [1], [0, 0, 1, 1], [], []>} : vector<32x4xf32>, vector<4x800xf32>, vector<32x800xf32> -> vector<32x800xf32>
    %59 = arith.addf %54, %58 : vector<32x800xf32>
    %c10_56 = arith.constant 10 : index
    %c0_57 = arith.constant 0 : index
    %c0_58 = arith.constant 0 : index
    %60 = vector.load %arg4[%c10_56, %c0_57, %c0_58] : memref<27x32x4xf32, #tpu.memory_space<vmem>>, vector<1x32x4xf32>
    %61 = vector.shape_cast %60 : vector<1x32x4xf32> to vector<32x4xf32>
    %c0_59 = arith.constant 0 : index
    %c101 = arith.constant 101 : index
    %62 = vector.load %arg7[%c0_59, %c101] : memref<4x1024xf32, #tpu.memory_space<vmem>>, vector<4x800xf32>
    %cst_60 = arith.constant dense<0.000000e+00> : vector<32x800xf32>
    %63 = tpu.matmul %61, %62, %cst_60 {dimension_numbers = #tpu.dot_dimension_numbers<[1], [0], [0], [1], [0, 0, 1, 1], [], []>} : vector<32x4xf32>, vector<4x800xf32>, vector<32x800xf32> -> vector<32x800xf32>
    %64 = arith.addf %59, %63 : vector<32x800xf32>
    %c11_61 = arith.constant 11 : index
    %c0_62 = arith.constant 0 : index
    %c0_63 = arith.constant 0 : index
    %65 = vector.load %arg4[%c11_61, %c0_62, %c0_63] : memref<27x32x4xf32, #tpu.memory_space<vmem>>, vector<1x32x4xf32>
    %66 = vector.shape_cast %65 : vector<1x32x4xf32> to vector<32x4xf32>
    %c0_64 = arith.constant 0 : index
    %c102 = arith.constant 102 : index
    %67 = vector.load %arg7[%c0_64, %c102] : memref<4x1024xf32, #tpu.memory_space<vmem>>, vector<4x800xf32>
    %cst_65 = arith.constant dense<0.000000e+00> : vector<32x800xf32>
    %68 = tpu.matmul %66, %67, %cst_65 {dimension_numbers = #tpu.dot_dimension_numbers<[1], [0], [0], [1], [0, 0, 1, 1], [], []>} : vector<32x4xf32>, vector<4x800xf32>, vector<32x800xf32> -> vector<32x800xf32>
    %69 = arith.addf %64, %68 : vector<32x800xf32>
    %c12_66 = arith.constant 12 : index
    %c0_67 = arith.constant 0 : index
    %c0_68 = arith.constant 0 : index
    %70 = vector.load %arg4[%c12_66, %c0_67, %c0_68] : memref<27x32x4xf32, #tpu.memory_space<vmem>>, vector<1x32x4xf32>
    %71 = vector.shape_cast %70 : vector<1x32x4xf32> to vector<32x4xf32>
    %c0_69 = arith.constant 0 : index
    %c110 = arith.constant 110 : index
    %72 = vector.load %arg7[%c0_69, %c110] : memref<4x1024xf32, #tpu.memory_space<vmem>>, vector<4x800xf32>
    %cst_70 = arith.constant dense<0.000000e+00> : vector<32x800xf32>
    %73 = tpu.matmul %71, %72, %cst_70 {dimension_numbers = #tpu.dot_dimension_numbers<[1], [0], [0], [1], [0, 0, 1, 1], [], []>} : vector<32x4xf32>, vector<4x800xf32>, vector<32x800xf32> -> vector<32x800xf32>
    %74 = arith.addf %69, %73 : vector<32x800xf32>
    %c13 = arith.constant 13 : index
    %c0_71 = arith.constant 0 : index
    %c0_72 = arith.constant 0 : index
    %75 = vector.load %arg4[%c13, %c0_71, %c0_72] : memref<27x32x4xf32, #tpu.memory_space<vmem>>, vector<1x32x4xf32>
    %76 = vector.shape_cast %75 : vector<1x32x4xf32> to vector<32x4xf32>
    %c0_73 = arith.constant 0 : index
    %c111 = arith.constant 111 : index
    %77 = vector.load %arg7[%c0_73, %c111] : memref<4x1024xf32, #tpu.memory_space<vmem>>, vector<4x800xf32>
    %cst_74 = arith.constant dense<0.000000e+00> : vector<32x800xf32>
    %78 = tpu.matmul %76, %77, %cst_74 {dimension_numbers = #tpu.dot_dimension_numbers<[1], [0], [0], [1], [0, 0, 1, 1], [], []>} : vector<32x4xf32>, vector<4x800xf32>, vector<32x800xf32> -> vector<32x800xf32>
    %79 = arith.addf %74, %78 : vector<32x800xf32>
    %c14 = arith.constant 14 : index
    %c0_75 = arith.constant 0 : index
    %c0_76 = arith.constant 0 : index
    %80 = vector.load %arg4[%c14, %c0_75, %c0_76] : memref<27x32x4xf32, #tpu.memory_space<vmem>>, vector<1x32x4xf32>
    %81 = vector.shape_cast %80 : vector<1x32x4xf32> to vector<32x4xf32>
    %c0_77 = arith.constant 0 : index
    %c112 = arith.constant 112 : index
    %82 = vector.load %arg7[%c0_77, %c112] : memref<4x1024xf32, #tpu.memory_space<vmem>>, vector<4x800xf32>
    %cst_78 = arith.constant dense<0.000000e+00> : vector<32x800xf32>
    %83 = tpu.matmul %81, %82, %cst_78 {dimension_numbers = #tpu.dot_dimension_numbers<[1], [0], [0], [1], [0, 0, 1, 1], [], []>} : vector<32x4xf32>, vector<4x800xf32>, vector<32x800xf32> -> vector<32x800xf32>
    %84 = arith.addf %79, %83 : vector<32x800xf32>
    %c15 = arith.constant 15 : index
    %c0_79 = arith.constant 0 : index
    %c0_80 = arith.constant 0 : index
    %85 = vector.load %arg4[%c15, %c0_79, %c0_80] : memref<27x32x4xf32, #tpu.memory_space<vmem>>, vector<1x32x4xf32>
    %86 = vector.shape_cast %85 : vector<1x32x4xf32> to vector<32x4xf32>
    %c0_81 = arith.constant 0 : index
    %c120 = arith.constant 120 : index
    %87 = vector.load %arg7[%c0_81, %c120] : memref<4x1024xf32, #tpu.memory_space<vmem>>, vector<4x800xf32>
    %cst_82 = arith.constant dense<0.000000e+00> : vector<32x800xf32>
    %88 = tpu.matmul %86, %87, %cst_82 {dimension_numbers = #tpu.dot_dimension_numbers<[1], [0], [0], [1], [0, 0, 1, 1], [], []>} : vector<32x4xf32>, vector<4x800xf32>, vector<32x800xf32> -> vector<32x800xf32>
    %89 = arith.addf %84, %88 : vector<32x800xf32>
    %c16 = arith.constant 16 : index
    %c0_83 = arith.constant 0 : index
    %c0_84 = arith.constant 0 : index
    %90 = vector.load %arg4[%c16, %c0_83, %c0_84] : memref<27x32x4xf32, #tpu.memory_space<vmem>>, vector<1x32x4xf32>
    %91 = vector.shape_cast %90 : vector<1x32x4xf32> to vector<32x4xf32>
    %c0_85 = arith.constant 0 : index
    %c121 = arith.constant 121 : index
    %92 = vector.load %arg7[%c0_85, %c121] : memref<4x1024xf32, #tpu.memory_space<vmem>>, vector<4x800xf32>
    %cst_86 = arith.constant dense<0.000000e+00> : vector<32x800xf32>
    %93 = tpu.matmul %91, %92, %cst_86 {dimension_numbers = #tpu.dot_dimension_numbers<[1], [0], [0], [1], [0, 0, 1, 1], [], []>} : vector<32x4xf32>, vector<4x800xf32>, vector<32x800xf32> -> vector<32x800xf32>
    %94 = arith.addf %89, %93 : vector<32x800xf32>
    %c17 = arith.constant 17 : index
    %c0_87 = arith.constant 0 : index
    %c0_88 = arith.constant 0 : index
    %95 = vector.load %arg4[%c17, %c0_87, %c0_88] : memref<27x32x4xf32, #tpu.memory_space<vmem>>, vector<1x32x4xf32>
    %96 = vector.shape_cast %95 : vector<1x32x4xf32> to vector<32x4xf32>
    %c0_89 = arith.constant 0 : index
    %c122 = arith.constant 122 : index
    %97 = vector.load %arg7[%c0_89, %c122] : memref<4x1024xf32, #tpu.memory_space<vmem>>, vector<4x800xf32>
    %cst_90 = arith.constant dense<0.000000e+00> : vector<32x800xf32>
    %98 = tpu.matmul %96, %97, %cst_90 {dimension_numbers = #tpu.dot_dimension_numbers<[1], [0], [0], [1], [0, 0, 1, 1], [], []>} : vector<32x4xf32>, vector<4x800xf32>, vector<32x800xf32> -> vector<32x800xf32>
    %99 = arith.addf %94, %98 : vector<32x800xf32>
    %c18 = arith.constant 18 : index
    %c0_91 = arith.constant 0 : index
    %c0_92 = arith.constant 0 : index
    %100 = vector.load %arg4[%c18, %c0_91, %c0_92] : memref<27x32x4xf32, #tpu.memory_space<vmem>>, vector<1x32x4xf32>
    %101 = vector.shape_cast %100 : vector<1x32x4xf32> to vector<32x4xf32>
    %c0_93 = arith.constant 0 : index
    %c200 = arith.constant 200 : index
    %102 = vector.load %arg7[%c0_93, %c200] : memref<4x1024xf32, #tpu.memory_space<vmem>>, vector<4x800xf32>
    %cst_94 = arith.constant dense<0.000000e+00> : vector<32x800xf32>
    %103 = tpu.matmul %101, %102, %cst_94 {dimension_numbers = #tpu.dot_dimension_numbers<[1], [0], [0], [1], [0, 0, 1, 1], [], []>} : vector<32x4xf32>, vector<4x800xf32>, vector<32x800xf32> -> vector<32x800xf32>
    %104 = arith.addf %99, %103 : vector<32x800xf32>
    %c19 = arith.constant 19 : index
    %c0_95 = arith.constant 0 : index
    %c0_96 = arith.constant 0 : index
    %105 = vector.load %arg4[%c19, %c0_95, %c0_96] : memref<27x32x4xf32, #tpu.memory_space<vmem>>, vector<1x32x4xf32>
    %106 = vector.shape_cast %105 : vector<1x32x4xf32> to vector<32x4xf32>
    %c0_97 = arith.constant 0 : index
    %c201 = arith.constant 201 : index
    %107 = vector.load %arg7[%c0_97, %c201] : memref<4x1024xf32, #tpu.memory_space<vmem>>, vector<4x800xf32>
    %cst_98 = arith.constant dense<0.000000e+00> : vector<32x800xf32>
    %108 = tpu.matmul %106, %107, %cst_98 {dimension_numbers = #tpu.dot_dimension_numbers<[1], [0], [0], [1], [0, 0, 1, 1], [], []>} : vector<32x4xf32>, vector<4x800xf32>, vector<32x800xf32> -> vector<32x800xf32>
    %109 = arith.addf %104, %108 : vector<32x800xf32>
    %c20_99 = arith.constant 20 : index
    %c0_100 = arith.constant 0 : index
    %c0_101 = arith.constant 0 : index
    %110 = vector.load %arg4[%c20_99, %c0_100, %c0_101] : memref<27x32x4xf32, #tpu.memory_space<vmem>>, vector<1x32x4xf32>
    %111 = vector.shape_cast %110 : vector<1x32x4xf32> to vector<32x4xf32>
    %c0_102 = arith.constant 0 : index
    %c202 = arith.constant 202 : index
    %112 = vector.load %arg7[%c0_102, %c202] : memref<4x1024xf32, #tpu.memory_space<vmem>>, vector<4x800xf32>
    %cst_103 = arith.constant dense<0.000000e+00> : vector<32x800xf32>
    %113 = tpu.matmul %111, %112, %cst_103 {dimension_numbers = #tpu.dot_dimension_numbers<[1], [0], [0], [1], [0, 0, 1, 1], [], []>} : vector<32x4xf32>, vector<4x800xf32>, vector<32x800xf32> -> vector<32x800xf32>
    %114 = arith.addf %109, %113 : vector<32x800xf32>
    %c21_104 = arith.constant 21 : index
    %c0_105 = arith.constant 0 : index
    %c0_106 = arith.constant 0 : index
    %115 = vector.load %arg4[%c21_104, %c0_105, %c0_106] : memref<27x32x4xf32, #tpu.memory_space<vmem>>, vector<1x32x4xf32>
    %116 = vector.shape_cast %115 : vector<1x32x4xf32> to vector<32x4xf32>
    %c0_107 = arith.constant 0 : index
    %c210 = arith.constant 210 : index
    %117 = vector.load %arg7[%c0_107, %c210] : memref<4x1024xf32, #tpu.memory_space<vmem>>, vector<4x800xf32>
    %cst_108 = arith.constant dense<0.000000e+00> : vector<32x800xf32>
    %118 = tpu.matmul %116, %117, %cst_108 {dimension_numbers = #tpu.dot_dimension_numbers<[1], [0], [0], [1], [0, 0, 1, 1], [], []>} : vector<32x4xf32>, vector<4x800xf32>, vector<32x800xf32> -> vector<32x800xf32>
    %119 = arith.addf %114, %118 : vector<32x800xf32>
    %c22_109 = arith.constant 22 : index
    %c0_110 = arith.constant 0 : index
    %c0_111 = arith.constant 0 : index
    %120 = vector.load %arg4[%c22_109, %c0_110, %c0_111] : memref<27x32x4xf32, #tpu.memory_space<vmem>>, vector<1x32x4xf32>
    %121 = vector.shape_cast %120 : vector<1x32x4xf32> to vector<32x4xf32>
    %c0_112 = arith.constant 0 : index
    %c211 = arith.constant 211 : index
    %122 = vector.load %arg7[%c0_112, %c211] : memref<4x1024xf32, #tpu.memory_space<vmem>>, vector<4x800xf32>
    %cst_113 = arith.constant dense<0.000000e+00> : vector<32x800xf32>
    %123 = tpu.matmul %121, %122, %cst_113 {dimension_numbers = #tpu.dot_dimension_numbers<[1], [0], [0], [1], [0, 0, 1, 1], [], []>} : vector<32x4xf32>, vector<4x800xf32>, vector<32x800xf32> -> vector<32x800xf32>
    %124 = arith.addf %119, %123 : vector<32x800xf32>
    %c23 = arith.constant 23 : index
    %c0_114 = arith.constant 0 : index
    %c0_115 = arith.constant 0 : index
    %125 = vector.load %arg4[%c23, %c0_114, %c0_115] : memref<27x32x4xf32, #tpu.memory_space<vmem>>, vector<1x32x4xf32>
    %126 = vector.shape_cast %125 : vector<1x32x4xf32> to vector<32x4xf32>
    %c0_116 = arith.constant 0 : index
    %c212 = arith.constant 212 : index
    %127 = vector.load %arg7[%c0_116, %c212] : memref<4x1024xf32, #tpu.memory_space<vmem>>, vector<4x800xf32>
    %cst_117 = arith.constant dense<0.000000e+00> : vector<32x800xf32>
    %128 = tpu.matmul %126, %127, %cst_117 {dimension_numbers = #tpu.dot_dimension_numbers<[1], [0], [0], [1], [0, 0, 1, 1], [], []>} : vector<32x4xf32>, vector<4x800xf32>, vector<32x800xf32> -> vector<32x800xf32>
    %129 = arith.addf %124, %128 : vector<32x800xf32>
    %c24 = arith.constant 24 : index
    %c0_118 = arith.constant 0 : index
    %c0_119 = arith.constant 0 : index
    %130 = vector.load %arg4[%c24, %c0_118, %c0_119] : memref<27x32x4xf32, #tpu.memory_space<vmem>>, vector<1x32x4xf32>
    %131 = vector.shape_cast %130 : vector<1x32x4xf32> to vector<32x4xf32>
    %c0_120 = arith.constant 0 : index
    %c220 = arith.constant 220 : index
    %132 = vector.load %arg7[%c0_120, %c220] : memref<4x1024xf32, #tpu.memory_space<vmem>>, vector<4x800xf32>
    %cst_121 = arith.constant dense<0.000000e+00> : vector<32x800xf32>
    %133 = tpu.matmul %131, %132, %cst_121 {dimension_numbers = #tpu.dot_dimension_numbers<[1], [0], [0], [1], [0, 0, 1, 1], [], []>} : vector<32x4xf32>, vector<4x800xf32>, vector<32x800xf32> -> vector<32x800xf32>
    %134 = arith.addf %129, %133 : vector<32x800xf32>
    %c25 = arith.constant 25 : index
    %c0_122 = arith.constant 0 : index
    %c0_123 = arith.constant 0 : index
    %135 = vector.load %arg4[%c25, %c0_122, %c0_123] : memref<27x32x4xf32, #tpu.memory_space<vmem>>, vector<1x32x4xf32>
    %136 = vector.shape_cast %135 : vector<1x32x4xf32> to vector<32x4xf32>
    %c0_124 = arith.constant 0 : index
    %c221 = arith.constant 221 : index
    %137 = vector.load %arg7[%c0_124, %c221] : memref<4x1024xf32, #tpu.memory_space<vmem>>, vector<4x800xf32>
    %cst_125 = arith.constant dense<0.000000e+00> : vector<32x800xf32>
    %138 = tpu.matmul %136, %137, %cst_125 {dimension_numbers = #tpu.dot_dimension_numbers<[1], [0], [0], [1], [0, 0, 1, 1], [], []>} : vector<32x4xf32>, vector<4x800xf32>, vector<32x800xf32> -> vector<32x800xf32>
    %139 = arith.addf %134, %138 : vector<32x800xf32>
    %c26 = arith.constant 26 : index
    %c0_126 = arith.constant 0 : index
    %c0_127 = arith.constant 0 : index
    %140 = vector.load %arg4[%c26, %c0_126, %c0_127] : memref<27x32x4xf32, #tpu.memory_space<vmem>>, vector<1x32x4xf32>
    %141 = vector.shape_cast %140 : vector<1x32x4xf32> to vector<32x4xf32>
    %c0_128 = arith.constant 0 : index
    %c222 = arith.constant 222 : index
    %142 = vector.load %arg7[%c0_128, %c222] : memref<4x1024xf32, #tpu.memory_space<vmem>>, vector<4x800xf32>
    %cst_129 = arith.constant dense<0.000000e+00> : vector<32x800xf32>
    %143 = tpu.matmul %141, %142, %cst_129 {dimension_numbers = #tpu.dot_dimension_numbers<[1], [0], [0], [1], [0, 0, 1, 1], [], []>} : vector<32x4xf32>, vector<4x800xf32>, vector<32x800xf32> -> vector<32x800xf32>
    %144 = arith.addf %139, %143 : vector<32x800xf32>
    %c0_130 = arith.constant 0 : index
    %c0_131 = arith.constant 0 : index
    %145 = vector.load %arg5[%c0_130, %c0_131] : memref<32x1xf32, #tpu.memory_space<vmem>>, vector<32x1xf32>
    %146 = vector.broadcast %145 : vector<32x1xf32> to vector<32x800xf32>
    %147 = arith.addf %144, %146 : vector<32x800xf32>
    %cst_132 = arith.constant 0.000000e+00 : f32
    %148 = vector.broadcast %cst_132 : f32 to vector<32x800xf32>
    %149 = arith.maximumf %147, %148 : vector<32x800xf32>
    %c0_133 = arith.constant 0 : index
    %c0_134 = arith.constant 0 : index
    %c0_135 = arith.constant 0 : index
    %c0_136 = arith.constant 0 : index
    %150 = vector.load %arg6[%c0_133, %c0_134, %c0_135, %c0_136] : memref<1x1x32x800xf32, #tpu.memory_space<vmem>>, vector<1x1x32x800xf32>
    %151 = vector.shape_cast %150 : vector<1x1x32x800xf32> to vector<32x800xf32>
    %152 = vector.shape_cast %149 : vector<32x800xf32> to vector<1x1x32x800xf32>
    tpu.vector_store %arg6[%c0_133, %c0_134, %c0_135, %c0_136], %152 {strides = array<i32>} : memref<1x1x32x800xf32, #tpu.memory_space<vmem>>, vector<1x1x32x800xf32>,
    return
  }
  func.func @transform_0(%arg0: i32, %arg1: i32) -> (i32, i32, i32, i32) {
    %c0_i32 = arith.constant 0 : i32
    %c0_i32_0 = arith.constant 0 : i32
    %c0_i32_1 = arith.constant 0 : i32
    return %arg0, %arg1, %c0_i32, %c0_i32_0 : i32, i32, i32, i32
  }
  func.func @transform_1(%arg0: i32, %arg1: i32) -> (i32, i32) {
    %c0_i32 = arith.constant 0 : i32
    %c0_i32_0 = arith.constant 0 : i32
    %c0_i32_1 = arith.constant 0 : i32
    return %c0_i32, %c0_i32_0 : i32, i32
  }
  func.func @transform_2(%arg0: i32, %arg1: i32) -> (i32, i32, i32) {
    %c0_i32 = arith.constant 0 : i32
    %c0_i32_0 = arith.constant 0 : i32
    %c0_i32_1 = arith.constant 0 : i32
    %c0_i32_2 = arith.constant 0 : i32
    return %c0_i32, %c0_i32_0, %c0_i32_1 : i32, i32, i32
  }
  func.func @transform_3(%arg0: i32, %arg1: i32) -> (i32, i32) {
    %c0_i32 = arith.constant 0 : i32
    %c0_i32_0 = arith.constant 0 : i32
    %c0_i32_1 = arith.constant 0 : i32
    return %c0_i32, %c0_i32_0 : i32, i32
  }
  func.func @transform_4(%arg0: i32, %arg1: i32) -> (i32, i32, i32, i32) {
    %c0_i32 = arith.constant 0 : i32
    %c0_i32_0 = arith.constant 0 : i32
    %c0_i32_1 = arith.constant 0 : i32
    return %arg0, %arg1, %c0_i32, %c0_i32_0 : i32, i32, i32, i32
  }
}

</mosaic_0001>

<bundles_post_ra>
// kernel: fire_block.1
= control target key start
LH: loop header
LB: loop body
LE: loop exit
PB: predicated region body
PF: predicated region fallthrough
CT: control target
= control target key end

     0   :  { %s13942_s15 = smov 0   ;;  %s13944_s16 = smov 0   ;;  %s18903_s0 = inlined_call_operand.vmem [shape: f32[2,1,5,1000], index: 0, kind: input, shape index: {}]   ;;  %s18904_s1 = inlined_call_operand.vmem [shape: f32[4,5], index: 1, kind: input, shape index: {}]   ;;  %s18905_s2 = inlined_call_operand.vmem [shape: f32[27,32,4], index: 2, kind: input, shape index: {}]   ;;  %s18906_s3 = inlined_call_operand.vmem [shape: f32[32,1], index: 3, kind: input, shape index: {}]   ;;  %s18907_s4 = inlined_call_operand.vmem [shape: f32[2,1,32,800], index: 4, kind: output, shape index: {}]  }
   0x1   :  { %s13946_s17 = smov 0  }
   0x2 LB: > { %s26_s18 = sadd.s32 1, %s13883_s16  ;;  %p12705_p0 = scmp.ge.s32.totalorder %s13887_s17, 1  ;;  %s13887_s17 = sphi %s13946_s17, %s14_s17   ;;  %s13883_s16 = sphi %s13944_s16, %s19004_s16   ;;  %s13879_s15 = sphi %s13942_s15, %s19003_s15  }
   0x3   : > { %p28_p1 = scmp.ge.s32.totalorder %s26_s18, 2  ;;  %p182_p2 = scmp.lt.s32.totalorder %s13887_s17, 3 }
   0x5   : > { %s19006_s18 = smov (%p28_p1, %s26_s18), 0  ;;  %p183_p3 = pnand %p12705_p0, %p182_p2 }
   0x7   : > { %186 = sbr.rel (%p183_p3) target bundleno = 1301 (0x515), region = 36 }
   0xc   : > { %p216_p4 = scmp.lt.s32.totalorder %s13879_s15, 1  ;;  %v18909_v0 = vmov 0.0   ;;  %vm247_vm0 = vcmask 1044480   ;;  %v242_v1 = vld [vmem:[%s18904_s1] sm:$0xf]  ;;  %vm243_vm1 = vcmask 39936  }
   0xd   : > { %336 = vmatprep.mubr.f32.mxu1 %v18909_v0  ;;  %567 = vst [vmem:[#allocation2 + $0x18] sm:$0xff] %v18909_v0  ;;  %478 = vmatprep.mubr.f32.mxu0 %v18909_v0  ;;  %s13890_s25 = smov 127   ;;  %vm587_vm2 = vcmask 1043456   ;;  %vm588_vm3 = vcmask 850948   ;;  %s13891_s26 = smov 126   ;;  %vm625_vm5 = vcmask 1039360  }
   0xe   : > { %s19008_s15 = smov (!%p216_p4, %s13879_s15), 1  ;;  %vm589_vm4 = vmor %vm588_vm3, %vm587_vm2  ;;  %s13892_s27 = smov 118   ;;  %v14063_v46 = vld [vmem:[%s18905_s2 + $0x20] sm:$0xff]  ;;  %vm632_vm6 = vcmask 31744   ;;  %v12722_v53 = vld [vmem:[%s18905_s2 + $0x28] sm:$0xff]  ;;  %vm1419_vm7 = vcmask 1031168  }
   0xf   : > { %s13448_s19 = sshll.u32 %s19008_s15, 6  ;;  %s13893_s28 = smov 117   ;;  %v12723_v58 = vld [vmem:[%s18905_s2 + $0x30] sm:$0xff]  ;;  %v12724_v62 = vld [vmem:[%s18905_s2 + $0x38] sm:$0xff]  ;;  %vm1862_vm8 = vcmask 965632   ;;  %vm2305_vm9 = vcmask 957440  }
  0x10   : > { %s224_s22 = scalar_lea.vmem %s18903_s0, %s13448_s19  ;;  %s13894_s29 = smov 116   ;;  %vm2748_vm10 = vcmask 949248   ;;  %vm3191_vm11 = vcmask 883712   ;;  %vm3634_vm12 = vcmask 875520   ;;  %vm4077_vm13 = vcmask 867328  }
  0x11   : > { %v235_v2 = vld [vmem:[%s224_s22 + $0x8] sm:$0x1f]  ;;  %v234_v3 = vld [vmem:[%s224_s22] sm:$0x1f]  ;;  %v237_v4 = vld [vmem:[%s224_s22 + $0x18] sm:$0x1f] }
  0x12   : > { %12709 = vmatprep.subr.msk.mxu1 %vm247_vm0, %v235_v2  ;;  %v239_v5 = vld [vmem:[%s224_s22 + $0x28] sm:$0x1f]  ;;  %v236_v6 = vld [vmem:[%s224_s22 + $0x10] sm:$0x1f]  ;;  %v238_v7 = vld [vmem:[%s224_s22 + $0x20] sm:$0x1f] }
  0x13   : > { %12710 = vmatpush1.msk.msra.mxu1 %vm247_vm0, %v234_v3  ;;  %12715 = vmatprep.subr.msk.mxu0 %vm247_vm0, %v239_v5  ;;  %v241_v8 = vld [vmem:[%s224_s22 + $0x38] sm:$0x1f]  ;;  %v240_v9 = vld [vmem:[%s224_s22 + $0x30] sm:$0x1f]  ;;  %s13895_s30 = smov 108   ;;  %s13896_s5 = smov 107  }
  0x14   : > { %12711 = vmatmul.mubr.msk.f32.vlgmr.msra.gmra.mxu1 %vm243_vm1, %v242_v1  ;;  %12712 = vmatprep.subr.msk.mxu1 %vm247_vm0, %v237_v4  ;;  %s13897_s6 = smov 106   ;;  %s13898_s7 = smov 28   ;;  %vm4523_vm14 = vcmask 228352   ;;  %vm4970_vm15 = vcmask 220160   ;;  %vm6311_vm3 = vcmask 138240  }
  0x15   : > { %12713 = vmatpush1.msk.msra.mxu1 %vm247_vm0, %v236_v6  ;;  %407 = vmatprep.mubr.f32.mxu1 %v18909_v0  ;;  %s13899_s12 = smov 27   ;;  %s13900_s21 = smov 26   ;;  %v591_v6 = vld [vmem:[%s18905_s2] sm:$0xff] }
  0x16   : > { %12716 = vmatpush1.msk.msra.mxu0 %vm247_vm0, %v238_v7  ;;  %12718 = vmatprep.subr.msk.mxu1 %vm247_vm0, %v241_v8  ;;  %s13903_s14 = smov 16   ;;  %s13911_s10 = smov 45  }
  0x17   : > { %12717 = vmatmul.mubr.msk.f32.vlgmr.msra.gmra.mxu0 %vm243_vm1, %v242_v1  ;;  %s13912_s19 = smov 44   ;;  %s13913_s24 = smov 36  }
  0x18   : > { %12714 = vmatmul.mubr.msk.f32.vlgmr.msra.gmra.mxu1 %vm243_vm1, %v242_v1  ;;  %723 = vmatprep.mubr.f32.mxu0 %v18909_v0  ;;  %s13915_s8 = smov 34  }
  0x19   : > { %12719 = vmatpush1.msk.msra.mxu1 %vm247_vm0, %v240_v9  ;;  %549 = vmatprep.mubr.f32.mxu1 %v18909_v0  ;;  %v592_v9 = vld [vmem:[%s18905_s2 + $0x8] sm:$0xff]  ;;  %vm5417_vm0 = vcmask 211968  }
  0x1c   : > { %12720 = vmatmul.mubr.msk.f32.vlgmr.msra.gmra.mxu1 %vm243_vm1, %v242_v1  ;;  %vm5864_vm1 = vcmask 146432  }
  0x1d   : > { %812 = vmatprep.mubr.f32.mxu1 %v18909_v0 }
  0xd4   : > { %v338_v10 = vpop.f32.mrf.mxu1 }
  0xd5   : > { %v556_v12 = vmax.f32 %v338_v10, 0.0 }
  0xd6   : > { %v340_v11 = vpop.f32.mrf.mxu1 }
  0xd7   : > { %v557_v13 = vmax.f32 %v340_v11, 0.0  ;;  %v480_v14 = vpop.f32.mrf.mxu0 }
  0xd8   : > { %v409_v15 = vpop.f32.mrf.mxu1  ;;  %v560_v16 = vmax.f32 %v480_v14, 0.0 }
  0xd9   : > { %v13988_v17 = vcombine.low %v556_v12, %v557_v13  ;;  %v558_v18 = vmax.f32 %v409_v15, 0.0  ;;  %v482_v19 = vpop.f32.mrf.mxu0  ;;  %v13992_v23 = vcombine.low %v557_v13, %v557_v13  ;;  %v593_v12 = vld [vmem:[%s18905_s2 + $0x10] sm:$0xff]  ;;  %v594_v15 = vld [vmem:[%s18905_s2 + $0x18] sm:$0xff] }
  0xda   : > { %v411_v20 = vpop.f32.mrf.mxu1  ;;  %v561_v21 = vmax.f32 %v482_v19, 0.0 }
  0xdb   : > { %584 = vst [vmem:[#allocation2] sm:$0xff] %v13988_v17  ;;  %v559_v22 = vmax.f32 %v411_v20, 0.0  ;;  %611 = vrot.lane.b32.xlu1 %v13988_v17, %s13890_s25  ;;  %613 = vrot.lane.b32.xlu0 %v13992_v23, %s13890_s25 }
  0xdc   : > { %v13994_v24 = vcombine.low %v560_v16, %v561_v21  ;;  %v551_v25 = vpop.f32.mrf.mxu1  ;;  %v14006_v32 = vcombine.low %v561_v21, %v561_v21 }
  0xdd   : > { %v13996_v26 = vcombine.low %v558_v18, %v559_v22  ;;  %v562_v27 = vmax.f32 %v551_v25, 0.0  ;;  %v14001_v30 = vcombine.low %v559_v22, %v559_v22 }
  0xde   : > { %586 = vst [vmem:[#allocation2 + $0x10] sm:$0xff] %v13994_v24  ;;  %v553_v28 = vpop.f32.mrf.mxu1 }
  0xdf   : > { %585 = vst [vmem:[#allocation2 + $0x8] sm:$0xff] %v13996_v26  ;;  %v563_v29 = vmax.f32 %v553_v28, 0.0  ;;  %615 = vrot.lane.b32.xlu0 %v13996_v26, %s13890_s25  ;;  %617 = vrot.lane.b32.xlu1 %v14001_v30, %s13890_s25  ;;  %v12771_v28 = vld [vmem:[%s18905_s2 + $0x40] sm:$0xff] }
  0xe1   : > { %v579_v31 = vcombine.low %v562_v27, %v563_v29 }
  0xe3   : > { %590 = vst.msk [vmem:[#allocation2 + $0x18] sm:$0xff] %vm589_vm4, %v579_v31  ;;  %619 = vrot.lane.b32.xlu0 %v13994_v24, %s13890_s25  ;;  %621 = vrot.lane.b32.xlu1 %v14006_v32, %s13890_s25  ;;  %vm6758_vm4 = vcmask 130048  }
  0xe7   : > { %1407 = vrot.lane.b32.xlu1 %v13992_v23, %s13891_s26 }
  0xea   : > { %v14011_v33 = vld [vmem:[#allocation2 + $0x18] sm:$0xf] }
  0xeb   : > { %623 = vrot.lane.b32.xlu0 %v14011_v33, %s13890_s25  ;;  %1405 = vrot.lane.b32.xlu1 %v13988_v17, %s13891_s26  ;;  %v1397_v34 = vld [vmem:[#allocation2 + $0x18] sm:$0xf] }
  0xec   : > { %v1840_v35 = vld [vmem:[#allocation2 + $0x18] sm:$0xf] }
  0xed   : > { %v2283_v36 = vld [vmem:[#allocation2 + $0x18] sm:$0xf] }
  0xee   : > { %v2726_v37 = vld [vmem:[#allocation2 + $0x18] sm:$0xf] }
  0xef   : > { %1409 = vrot.lane.b32.xlu0 %v13996_v26, %s13891_s26  ;;  %1413 = vrot.lane.b32.xlu1 %v13994_v24, %s13891_s26  ;;  %v3169_v38 = vld [vmem:[#allocation2 + $0x18] sm:$0xf] }
  0xf0   : > { %v3612_v39 = vld [vmem:[#allocation2 + $0x18] sm:$0xf] }
  0xf1   : > { %v4055_v40 = vld [vmem:[#allocation2 + $0x18] sm:$0xf] }
  0xf2   : > { %v14065_v47 = vld [vmem:[#allocation2 + $0x18] sm:$0xff] }
  0xf3   : > { %1411 = vrot.lane.b32.xlu0 %v14001_v30, %s13891_s26  ;;  %1417 = vrot.lane.b32.xlu1 %v1397_v34, %s13891_s26  ;;  %v14076_v51 = vcombine.high %v14065_v47, %v14065_v47  ;;  %v12772_v34 = vld [vmem:[%s18905_s2 + $0x48] sm:$0xff] }
  0xf7   : > { %1415 = vrot.lane.b32.xlu0 %v14006_v32, %s13891_s26  ;;  %1852 = vrot.lane.b32.xlu1 %v13996_v26, %s13892_s27  ;;  %s13909_s26 = smov 54  }
  0xfb   : > { %1850 = vrot.lane.b32.xlu0 %v13992_v23, %s13892_s27  ;;  %1856 = vrot.lane.b32.xlu1 %v13994_v24, %s13892_s27 }
  0xff   : > { %1854 = vrot.lane.b32.xlu0 %v14001_v30, %s13892_s27  ;;  %1858 = vrot.lane.b32.xlu1 %v14006_v32, %s13892_s27 }
 0x103   : > { %1848 = vrot.lane.b32.xlu0 %v13988_v17, %s13892_s27  ;;  %2293 = vrot.lane.b32.xlu1 %v13992_v23, %s13893_s28 }
 0x107   : > { %1860 = vrot.lane.b32.xlu0 %v1840_v35, %s13892_s27  ;;  %2291 = vrot.lane.b32.xlu1 %v13988_v17, %s13893_s28 }
 0x10b   : > { %2295 = vrot.lane.b32.xlu0 %v13996_v26, %s13893_s28  ;;  %2299 = vrot.lane.b32.xlu1 %v13994_v24, %s13893_s28 }
 0x10f   : > { %2297 = vrot.lane.b32.xlu0 %v14001_v30, %s13893_s28  ;;  %2303 = vrot.lane.b32.xlu1 %v2283_v36, %s13893_s28 }
 0x113   : > { %2301 = vrot.lane.b32.xlu0 %v14006_v32, %s13893_s28  ;;  %2738 = vrot.lane.b32.xlu1 %v13996_v26, %s13894_s29  ;;  %s13901_s28 = smov 18  }
 0x117   : > { %2736 = vrot.lane.b32.xlu0 %v13992_v23, %s13894_s29  ;;  %2742 = vrot.lane.b32.xlu1 %v13994_v24, %s13894_s29 }
 0x11b   : > { %2740 = vrot.lane.b32.xlu0 %v14001_v30, %s13894_s29  ;;  %2744 = vrot.lane.b32.xlu1 %v14006_v32, %s13894_s29 }
 0x11f   : > { %2734 = vrot.lane.b32.xlu0 %v13988_v17, %s13894_s29  ;;  %3179 = vrot.lane.b32.xlu1 %v13992_v23, %s13895_s30 }
 0x123   : > { %2746 = vrot.lane.b32.xlu0 %v2726_v37, %s13894_s29  ;;  %3177 = vrot.lane.b32.xlu1 %v13988_v17, %s13895_s30  ;;  %s13914_s29 = smov 35  }
 0x127   : > { %3181 = vrot.lane.b32.xlu0 %v13996_v26, %s13895_s30  ;;  %3185 = vrot.lane.b32.xlu1 %v13994_v24, %s13895_s30 }
 0x12b   : > { %3183 = vrot.lane.b32.xlu0 %v14001_v30, %s13895_s30  ;;  %3189 = vrot.lane.b32.xlu1 %v3169_v38, %s13895_s30  ;;  %v12773_v38 = vld [vmem:[%s18905_s2 + $0x50] sm:$0xff] }
 0x12f   : > { %3187 = vrot.lane.b32.xlu0 %v14006_v32, %s13895_s30  ;;  %3624 = vrot.lane.b32.xlu1 %v13996_v26, %s13896_s5 }
 0x133   : > { %3622 = vrot.lane.b32.xlu0 %v13992_v23, %s13896_s5  ;;  %3628 = vrot.lane.b32.xlu1 %v13994_v24, %s13896_s5 }
 0x137   : > { %3626 = vrot.lane.b32.xlu0 %v14001_v30, %s13896_s5  ;;  %3630 = vrot.lane.b32.xlu1 %v14006_v32, %s13896_s5 }
 0x13b   : > { %3620 = vrot.lane.b32.xlu0 %v13988_v17, %s13896_s5  ;;  %4065 = vrot.lane.b32.xlu1 %v13992_v23, %s13897_s6 }
 0x13f   : > { %3632 = vrot.lane.b32.xlu0 %v3612_v39, %s13896_s5  ;;  %4063 = vrot.lane.b32.xlu1 %v13988_v17, %s13897_s6  ;;  %s13902_s5 = smov 17  }
 0x143   : > { %4067 = vrot.lane.b32.xlu0 %v13996_v26, %s13897_s6  ;;  %4071 = vrot.lane.b32.xlu1 %v13994_v24, %s13897_s6 }
 0x147   : > { %4069 = vrot.lane.b32.xlu0 %v14001_v30, %s13897_s6  ;;  %4075 = vrot.lane.b32.xlu1 %v4055_v40, %s13897_s6  ;;  %v12774_v40 = vld [vmem:[%s18905_s2 + $0x58] sm:$0xff] }
 0x14b   : > { %4073 = vrot.lane.b32.xlu0 %v14006_v32, %s13897_s6  ;;  %4511 = vrot.lane.b32.xlu1 %v13996_v26, %s13898_s7 }
 0x14d   : > { %v612_v41 = vpop.permute.xlu1 %611  ;;  %v614_v42 = vpop.permute.xlu0 %613 }
 0x14e   : > { %v626_v48 = vsel %vm625_vm5, %v612_v41, %v614_v42 }
 0x14f   : > { %4509 = vrot.lane.b32.xlu0 %v13992_v23, %s13898_s7  ;;  %4515 = vrot.lane.b32.xlu1 %v13994_v24, %s13898_s7 }
 0x151   : > { %v616_v43 = vpop.permute.xlu0 %615  ;;  %v618_v44 = vpop.permute.xlu1 %617 }
 0x152   : > { %v627_v45 = vsel %vm625_vm5, %v614_v42, %v616_v43  ;;  %v628_v54 = vsel %vm625_vm5, %v616_v43, %v618_v44 }
 0x153   : > { %4513 = vrot.lane.b32.xlu0 %v14001_v30, %s13898_s7  ;;  %12725 = vmatprep.subr.msk.mxu0 %vm587_vm2, %v627_v45 }
 0x154   : > { %4517 = vrot.lane.b32.xlu1 %v14006_v32, %s13898_s7  ;;  %12726 = vmatpush1.msk.msra.mxu0 %vm587_vm2, %v626_v48 }
 0x155   : > { %12727 = vmatmul.mubr.msk.f32.vlgmr.msra.gmra.mxu0 %vm632_vm6, %v14063_v46  ;;  %v620_v49 = vpop.permute.xlu0 %619  ;;  %v622_v50 = vpop.permute.xlu1 %621 }
 0x156   : > { %v629_v52 = vsel %vm625_vm5, %v618_v44, %v620_v49  ;;  %729 = vmatprep.mubr.f32.mxu0 %v18909_v0  ;;  %v630_v59 = vsel %vm625_vm5, %v620_v49, %v622_v50 }
 0x157   : > { %4507 = vrot.lane.b32.xlu0 %v13988_v17, %s13898_s7  ;;  %12731 = vmatprep.subr.msk.mxu1 %vm587_vm2, %v629_v52 }
 0x158   : > { %4521 = vrot.lane.b32.xlu1 %v14076_v51, %s13898_s7  ;;  %12732 = vmatpush1.msk.msra.mxu1 %vm587_vm2, %v628_v54 }
 0x159   : > { %12728 = vmatmul.mubr.msk.f32.gmra.mxu0 %vm632_vm6, %v12722_v53  ;;  %v14089_v55 = vpop.permute.xlu1 %1407  ;;  %12733 = vmatmul.mubr.msk.f32.vlgmr.msra.gmra.mxu1 %vm632_vm6, %v14063_v46 }
 0x15a   : > { %735 = vmatprep.mubr.f32.mxu0 %v18909_v0  ;;  %818 = vmatprep.mubr.f32.mxu1 %v18909_v0 }
 0x15b   : > { %4519 = vrot.lane.b32.xlu0 %v14065_v47, %s13898_s7  ;;  %s13906_s7 = smov 6  }
 0x15c   : > { %4958 = vrot.lane.b32.xlu1 %v13996_v26, %s13899_s12 }
 0x15d   : > { %v624_v56 = vpop.permute.xlu0 %623  ;;  %12729 = vmatmul.mubr.msk.f32.gmra.mxu0 %vm632_vm6, %v12723_v58  ;;  %v14111_v60 = vpop.permute.xlu1 %1405  ;;  %12734 = vmatmul.mubr.msk.f32.gmra.mxu1 %vm632_vm6, %v12722_v53 }
 0x15e   : > { %13584 = vmatprep.subr.msk.mxu1 %vm587_vm2, %v624_v56  ;;  %v631_v57 = vsel %vm625_vm5, %v622_v50, %v624_v56  ;;  %741 = vmatprep.mubr.f32.mxu0 %v18909_v0  ;;  %v1420_v21 = vsel %vm1419_vm7, %v14111_v60, %v14089_v55  ;;  %v12798_v50 = vld [vmem:[%s18905_s2 + $0x60] sm:$0xff]  ;;  %vm7205_vm5 = vcmask 64512  }
 0x15f   : > { %4956 = vrot.lane.b32.xlu0 %v13992_v23, %s13899_s12  ;;  %12737 = vmatprep.subr.msk.mxu0 %vm587_vm2, %v631_v57 }
 0x160   : > { %13585 = vmatpush3.msk.msra.mxu1 %vm587_vm2, %v624_v56  ;;  %12738 = vmatpush1.msk.msra.mxu0 %vm587_vm2, %v630_v59  ;;  %v12799_v56 = vld [vmem:[%s18905_s2 + $0x68] sm:$0xff] }
 0x161   : > { %12748 = vmatprep.subr.msk.mxu1 %vm587_vm2, %v13992_v23  ;;  %v14113_v61 = vpop.permute.xlu0 %1409  ;;  %12754 = vmatprep.subr.msk.mxu0 %vm587_vm2, %v14001_v30  ;;  %v14132_v1 = vpop.permute.xlu1 %1413 }
 0x162   : > { %4960 = vrot.lane.b32.xlu1 %v14001_v30, %s13899_s12  ;;  %824 = vmatprep.mubr.f32.mxu1 %v18909_v0  ;;  %v1421_v11 = vsel %vm1419_vm7, %v14089_v55, %v14113_v61 }
 0x163   : > { %4954 = vrot.lane.b32.xlu0 %v13988_v17, %s13899_s12  ;;  %12730 = vmatmul.mubr.msk.f32.gmra.mxu0 %vm632_vm6, %v12724_v62 }
 0x164   : > { %12735 = vmatmul.mubr.msk.f32.gmra.mxu1 %vm632_vm6, %v12723_v58  ;;  %901 = vmatprep.mubr.f32.mxu0 %v18909_v0 }
 0x165   : > { %v14128_v63 = vpop.permute.xlu0 %1411  ;;  %830 = vmatprep.mubr.f32.mxu1 %v18909_v0  ;;  %v14153_v3 = vpop.permute.xlu1 %1417 }
 0x166   : > { %4964 = vrot.lane.b32.xlu1 %v14006_v32, %s13899_s12  ;;  %v1423_v8 = vsel %vm1419_vm7, %v14128_v63, %v14132_v1  ;;  %v1422_v19 = vsel %vm1419_vm7, %v14113_v61, %v14128_v63 }
 0x167   : > { %4962 = vrot.lane.b32.xlu0 %v13994_v24, %s13899_s12  ;;  %12739 = vmatmul.mubr.msk.f32.vlgmr.msra.gmra.mxu0 %vm632_vm6, %v14063_v46 }
 0x168   : > { %12736 = vmatmul.mubr.msk.f32.gmra.mxu1 %vm632_vm6, %v12724_v62  ;;  %12755 = vmatpush1.msk.msra.mxu0 %vm587_vm2, %v13996_v26 }
 0x169   : > { %v14144_v2 = vpop.permute.xlu0 %1415  ;;  %13592 = vmatprep.subr.msk.mxu0 %vm587_vm2, %v14011_v33  ;;  %907 = vmatprep.mubr.f32.mxu0 %v18909_v0  ;;  %v14174_v5 = vpop.permute.xlu1 %1852 }
 0x16a   : > { %4968 = vrot.lane.b32.xlu1 %v14076_v51, %s13899_s12  ;;  %13586 = vmatprep.mubr.msk.f32.mxu1 %vm632_vm6, %v14063_v46  ;;  %v1425_v25 = vsel %vm1419_vm7, %v14144_v2, %v14153_v3  ;;  %v1424_v31 = vsel %vm1419_vm7, %v14132_v1, %v14144_v2  ;;  %vm7652_vm7 = vcmask 56320  }
 0x16b   : > { %4966 = vrot.lane.b32.xlu0 %v14065_v47, %s13899_s12  ;;  %12740 = vmatmul.mubr.msk.f32.gmra.mxu0 %vm632_vm6, %v12722_v53  ;;  %s13907_s12 = smov 56  }
 0x16c   : > { %13587 = vmatmul.mubr.msk.f32.vlgmr.msra.gmra.mxu1 %vm632_vm6, %v12722_v53  ;;  %913 = vmatprep.mubr.f32.mxu0 %v18909_v0 }
 0x16d   : > { %12749 = vmatpush1.msk.msra.mxu1 %vm587_vm2, %v13988_v17  ;;  %v14168_v4 = vpop.permute.xlu0 %1850  ;;  %13589 = vmatprep.mubr.msk.f32.mxu1 %vm632_vm6, %v12723_v58  ;;  %v14202_v10 = vpop.permute.xlu1 %1856 }
 0x16e   : > { %5405 = vrot.lane.b32.xlu1 %v13996_v26, %s13900_s21  ;;  %12760 = vmatprep.subr.msk.mxu1 %vm587_vm2, %v14006_v32  ;;  %v1864_v37 = vsel %vm1862_vm8, %v14168_v4, %v14174_v5 }
 0x16f   : > { %5403 = vrot.lane.b32.xlu0 %v13992_v23, %s13900_s21  ;;  %12741 = vmatmul.mubr.msk.f32.gmra.mxu0 %vm632_vm6, %v12723_v58 }
 0x170   : > { %13590 = vmatmul.mubr.msk.f32.gmra.mxu1 %vm632_vm6, %v12724_v62  ;;  %919 = vmatprep.mubr.f32.mxu0 %v18909_v0 }
 0x171   : > { %1101 = vmatprep.mubr.f32.mxu1 %v18909_v0  ;;  %v14187_v7 = vpop.permute.xlu0 %1854  ;;  %v14226_v14 = vpop.permute.xlu1 %1858 }
 0x172   : > { %5409 = vrot.lane.b32.xlu1 %v13994_v24, %s13900_s21  ;;  %v1865_v43 = vsel %vm1862_vm8, %v14174_v5, %v14187_v7  ;;  %v1867_v53 = vsel %vm1862_vm8, %v14202_v10, %v14226_v14 }
 0x173   : > { %5407 = vrot.lane.b32.xlu0 %v14001_v30, %s13900_s21  ;;  %12742 = vmatmul.mubr.msk.f32.gmra.mxu0 %vm632_vm6, %v12724_v62 }
 0x174   : > { %12750 = vmatmul.mubr.msk.f32.vlgmr.msra.gmra.mxu1 %vm632_vm6, %v591_v6  ;;  %1190 = vmatprep.mubr.f32.mxu0 %v18909_v0 }
 0x175   : > { %12761 = vmatpush1.msk.msra.mxu1 %vm587_vm2, %v13994_v24  ;;  %1107 = vmatprep.mubr.f32.mxu1 %v18909_v0  ;;  %v14221_v13 = vpop.permute.xlu0 %1848  ;;  %v14247_v18 = vpop.permute.xlu1 %2293 }
 0x176   : > { %5411 = vrot.lane.b32.xlu1 %v14006_v32, %s13900_s21  ;;  %12781 = vmatprep.subr.msk.mxu1 %vm587_vm2, %v1423_v8  ;;  %v1863_v45 = vsel %vm1862_vm8, %v14221_v13, %v14168_v4 }
 0x177   : > { %5401 = vrot.lane.b32.xlu0 %v13988_v17, %s13900_s21  ;;  %12756 = vmatmul.mubr.msk.f32.vlgmr.msra.gmra.mxu0 %vm632_vm6, %v591_v6 }
 0x178   : > { %12751 = vmatmul.mubr.msk.f32.gmra.mxu1 %vm632_vm6, %v592_v9  ;;  %13593 = vmatpush3.msk.msra.mxu0 %vm587_vm2, %v14011_v33  ;;  %v1866_v33 = vsel %vm1862_vm8, %v14187_v7, %v14202_v10  ;;  %v12826_v10 = vld [vmem:[%s18905_s2 + $0x88] sm:$0xff] }
 0x179   : > { %12775 = vmatprep.subr.msk.mxu0 %vm587_vm2, %v1421_v11  ;;  %1113 = vmatprep.mubr.f32.mxu1 %v18909_v0  ;;  %v14239_v16 = vpop.permute.xlu0 %1860  ;;  %v14270_v22 = vpop.permute.xlu1 %2291 }
 0x17a   : > { %5415 = vrot.lane.b32.xlu1 %v14076_v51, %s13900_s21  ;;  %1196 = vmatprep.mubr.f32.mxu0 %v18909_v0  ;;  %v1868_v48 = vsel %vm1862_vm8, %v14226_v14, %v14239_v16  ;;  %v2306_v2 = vsel %vm2305_vm9, %v14270_v22, %v14247_v18  ;;  %v12827_v14 = vld [vmem:[%s18905_s2 + $0x90] sm:$0xff]  ;;  %vm8099_vm8 = vcmask 48128  }
 0x17b   : > { %5413 = vrot.lane.b32.xlu0 %v14065_v47, %s13900_s21  ;;  %12757 = vmatmul.mubr.msk.f32.gmra.mxu0 %vm632_vm6, %v592_v9  ;;  %s13904_s21 = smov 8  }
 0x17c   : > { %12752 = vmatmul.mubr.msk.f32.gmra.mxu1 %vm632_vm6, %v593_v12  ;;  %1202 = vmatprep.mubr.f32.mxu0 %v18909_v0 }
 0x17d   : > { %1119 = vmatprep.mubr.f32.mxu1 %v18909_v0  ;;  %v14261_v20 = vpop.permute.xlu0 %2295  ;;  %v14296_v29 = vpop.permute.xlu1 %2299 }
 0x17e   : > { %5852 = vrot.lane.b32.xlu1 %v13996_v26, %s13901_s28  ;;  %v2307_v58 = vsel %vm2305_vm9, %v14247_v18, %v14261_v20 }
 0x17f   : > { %5850 = vrot.lane.b32.xlu0 %v13992_v23, %s13901_s28  ;;  %12758 = vmatmul.mubr.msk.f32.gmra.mxu0 %vm632_vm6, %v593_v12 }
 0x180   : > { %12753 = vmatmul.mubr.msk.f32.gmra.mxu1 %vm632_vm6, %v594_v15  ;;  %1208 = vmatprep.mubr.f32.mxu0 %v18909_v0 }
 0x181   : > { %1279 = vmatprep.mubr.f32.mxu1 %v18909_v0  ;;  %v14285_v27 = vpop.permute.xlu0 %2297  ;;  %v14321_v36 = vpop.permute.xlu1 %2303 }
 0x182   : > { %5854 = vrot.lane.b32.xlu1 %v14001_v30, %s13901_s28  ;;  %v2309_v55 = vsel %vm2305_vm9, %v14285_v27, %v14296_v29 }
 0x183   : > { %5848 = vrot.lane.b32.xlu0 %v13988_v17, %s13901_s28  ;;  %12759 = vmatmul.mubr.msk.f32.gmra.mxu0 %vm632_vm6, %v594_v15 }
 0x184   : > { %12762 = vmatmul.mubr.msk.f32.vlgmr.msra.gmra.mxu1 %vm632_vm6, %v591_v6  ;;  %13594 = vmatprep.mubr.msk.f32.mxu0 %vm632_vm6, %v591_v6 }
 0x185   : > { %12782 = vmatpush1.msk.msra.mxu1 %vm587_vm2, %v1422_v19  ;;  %1285 = vmatprep.mubr.f32.mxu1 %v18909_v0  ;;  %v14315_v35 = vpop.permute.xlu0 %2301  ;;  %v14351_v41 = vpop.permute.xlu1 %2738  ;;  %v12828_v19 = vld [vmem:[%s18905_s2 + $0x98] sm:$0xff] }
 0x186   : > { %5858 = vrot.lane.b32.xlu1 %v14006_v32, %s13901_s28  ;;  %13600 = vmatprep.subr.msk.mxu1 %vm587_vm2, %v14153_v3  ;;  %v2310_v7 = vsel %vm2305_vm9, %v14296_v29, %v14315_v35 }
 0x187   : > { %5856 = vrot.lane.b32.xlu0 %v13994_v24, %s13901_s28  ;;  %13595 = vmatmul.mubr.msk.f32.vlgmr.msra.gmra.mxu0 %vm632_vm6, %v592_v9 }
 0x188   : > { %12763 = vmatmul.mubr.msk.f32.gmra.mxu1 %vm632_vm6, %v592_v9  ;;  %12776 = vmatpush1.msk.msra.mxu0 %vm587_vm2, %v1420_v21 }
 0x189   : > { %12787 = vmatprep.subr.msk.mxu0 %vm587_vm2, %v1425_v25  ;;  %1291 = vmatprep.mubr.f32.mxu1 %v18909_v0  ;;  %v14340_v39 = vpop.permute.xlu0 %2736  ;;  %v14368_v44 = vpop.permute.xlu1 %2742  ;;  %v14597_v25 = vld [vmem:[#allocation2 + $0x4] sm:$0xff] }
 0x18a   : > { %5862 = vrot.lane.b32.xlu1 %v14076_v51, %s13901_s28  ;;  %13597 = vmatprep.mubr.msk.f32.mxu0 %vm632_vm6, %v593_v12  ;;  %v2750_v13 = vsel %vm2748_vm10, %v14340_v39, %v14351_v41  ;;  %v14616_v29 = vcombine.high %v14597_v25, %v14597_v25 }
 0x18b   : > { %5860 = vrot.lane.b32.xlu0 %v14065_v47, %s13901_s28  ;;  %13598 = vmatmul.mubr.msk.f32.gmra.mxu0 %vm632_vm6, %v594_v15  ;;  %s13905_s28 = smov 7  }
 0x18c   : > { %12764 = vmatmul.mubr.msk.f32.gmra.mxu1 %vm632_vm6, %v593_v12  ;;  %1516 = vmatprep.mubr.f32.mxu0 %v18909_v0  ;;  %v8072_v12 = vld [vmem:[#allocation2 + $0x8] sm:$0xff] }
 0x18d   : > { %1297 = vmatprep.mubr.f32.mxu1 %v18909_v0  ;;  %v14361_v42 = vpop.permute.xlu0 %2740  ;;  %v14395_v49 = vpop.permute.xlu1 %2744 }
 0x18e   : > { %6299 = vrot.lane.b32.xlu1 %v13996_v26, %s13902_s5  ;;  %v2752_v9 = vsel %vm2748_vm10, %v14361_v42, %v14368_v44  ;;  %v2751_v22 = vsel %vm2748_vm10, %v14351_v41, %v14361_v42  ;;  %v12853_v41 = vld [vmem:[%s18905_s2 + $0xa8] sm:$0xff] }
 0x18f   : > { %6297 = vrot.lane.b32.xlu0 %v13992_v23, %s13902_s5  ;;  %12777 = vmatmul.mubr.msk.f32.vlgmr.msra.gmra.mxu0 %vm632_vm6, %v12771_v28 }
 0x190   : > { %12765 = vmatmul.mubr.msk.f32.gmra.mxu1 %vm632_vm6, %v594_v15  ;;  %12788 = vmatpush1.msk.msra.mxu0 %vm587_vm2, %v1424_v31 }
 0x191   : > { %12808 = vmatprep.subr.msk.mxu0 %vm587_vm2, %v1866_v33  ;;  %1522 = vmatprep.mubr.f32.mxu0 %v18909_v0  ;;  %v14384_v46 = vpop.permute.xlu0 %2734  ;;  %v14417_v54 = vpop.permute.xlu1 %3179 }
 0x192   : > { %6303 = vrot.lane.b32.xlu1 %v13994_v24, %s13902_s5  ;;  %1605 = vmatprep.mubr.f32.mxu1 %v18909_v0 }
 0x193   : > { %6301 = vrot.lane.b32.xlu0 %v14001_v30, %s13902_s5  ;;  %12778 = vmatmul.mubr.msk.f32.gmra.mxu0 %vm632_vm6, %v12772_v34 }
 0x194   : > { %12783 = vmatmul.mubr.msk.f32.vlgmr.msra.gmra.mxu1 %vm632_vm6, %v12771_v28  ;;  %1528 = vmatprep.mubr.f32.mxu0 %v18909_v0 }
 0x195   : > { %13601 = vmatpush3.msk.msra.mxu1 %vm587_vm2, %v14153_v3  ;;  %1611 = vmatprep.mubr.f32.mxu1 %v18909_v0  ;;  %v14410_v52 = vpop.permute.xlu0 %2746  ;;  %v14450_v59 = vpop.permute.xlu1 %3177  ;;  %v2311_v3 = vsel %vm2305_vm9, %v14315_v35, %v14321_v36 }
 0x196   : > { %6305 = vrot.lane.b32.xlu1 %v14006_v32, %s13902_s5  ;;  %12802 = vmatprep.subr.msk.mxu1 %vm587_vm2, %v1864_v37  ;;  %v2754_v31 = vsel %vm2748_vm10, %v14395_v49, %v14410_v52 }
 0x197   : > { %6295 = vrot.lane.b32.xlu0 %v13988_v17, %s13902_s5  ;;  %12779 = vmatmul.mubr.msk.f32.gmra.mxu0 %vm632_vm6, %v12773_v38 }
 0x198   : > { %12784 = vmatmul.mubr.msk.f32.gmra.mxu1 %vm632_vm6, %v12772_v34  ;;  %1534 = vmatprep.mubr.f32.mxu0 %v18909_v0 }
 0x199   : > { %1617 = vmatprep.mubr.f32.mxu1 %v18909_v0  ;;  %v14435_v57 = vpop.permute.xlu0 %3181  ;;  %v14469_v61 = vpop.permute.xlu1 %3185 }
 0x19a   : > { %6309 = vrot.lane.b32.xlu1 %v14076_v51, %s13902_s5 }
 0x19b   : > { %6307 = vrot.lane.b32.xlu0 %v14065_v47, %s13902_s5  ;;  %12780 = vmatmul.mubr.msk.f32.gmra.mxu0 %vm632_vm6, %v12774_v40  ;;  %s13910_s5 = smov 46  }
 0x19c   : > { %12785 = vmatmul.mubr.msk.f32.gmra.mxu1 %vm632_vm6, %v12773_v38  ;;  %1694 = vmatprep.mubr.f32.mxu0 %v18909_v0 }
 0x19d   : > { %1623 = vmatprep.mubr.f32.mxu1 %v18909_v0  ;;  %v14465_v60 = vpop.permute.xlu0 %3183  ;;  %v14494_v1 = vpop.permute.xlu1 %3189 }
 0x19e   : > { %6746 = vrot.lane.b32.xlu1 %v13996_v26, %s13903_s14 }
 0x19f   : > { %6744 = vrot.lane.b32.xlu0 %v13992_v23, %s13903_s14  ;;  %12789 = vmatmul.mubr.msk.f32.vlgmr.msra.gmra.mxu0 %vm632_vm6, %v12771_v28 }
 0x1a0   : > { %12786 = vmatmul.mubr.msk.f32.gmra.mxu1 %vm632_vm6, %v12774_v40  ;;  %12809 = vmatpush1.msk.msra.mxu0 %vm587_vm2, %v1865_v43 }
 0x1a1   : > { %13608 = vmatprep.subr.msk.mxu0 %vm587_vm2, %v14239_v16  ;;  %1700 = vmatprep.mubr.f32.mxu0 %v18909_v0  ;;  %v14486_v63 = vpop.permute.xlu0 %3187  ;;  %v14518_v6 = vpop.permute.xlu1 %3624 }
 0x1a2   : > { %6748 = vrot.lane.b32.xlu1 %v14001_v30, %s13903_s14  ;;  %13602 = vmatprep.mubr.msk.f32.mxu1 %vm632_vm6, %v12771_v28  ;;  %v2749_v28 = vsel %vm2748_vm10, %v14384_v46, %v14340_v39  ;;  %v2753_v39 = vsel %vm2748_vm10, %v14368_v44, %v14395_v49  ;;  %v3193_v44 = vsel %vm3191_vm11, %v14417_v54, %v14435_v57  ;;  %v12854_v46 = vld [vmem:[%s18905_s2 + $0xb0] sm:$0xff]  ;;  %v12855_v49 = vld [vmem:[%s18905_s2 + $0xb8] sm:$0xff]  ;;  %vm8986_vm10 = vcmask 449536  }
 0x1a3   : > { %6742 = vrot.lane.b32.xlu0 %v13988_v17, %s13903_s14  ;;  %12790 = vmatmul.mubr.msk.f32.gmra.mxu0 %vm632_vm6, %v12772_v34 }
 0x1a4   : > { %13603 = vmatmul.mubr.msk.f32.vlgmr.msra.gmra.mxu1 %vm632_vm6, %v12772_v34  ;;  %1706 = vmatprep.mubr.f32.mxu0 %v18909_v0  ;;  %v14637_v34 = vld [vmem:[#allocation2 + $0x14] sm:$0xff] }
 0x1a5   : > { %12803 = vmatpush1.msk.msra.mxu1 %vm587_vm2, %v1863_v45  ;;  %13605 = vmatprep.mubr.msk.f32.mxu1 %vm632_vm6, %v12773_v38  ;;  %v14512_v4 = vpop.permute.xlu0 %3622  ;;  %v14546_v11 = vpop.permute.xlu1 %3628  ;;  %v8521_v45 = vld [vmem:[#allocation2 + $0x1c] sm:$0xf] }
 0x1a6   : > { %6752 = vrot.lane.b32.xlu1 %v14006_v32, %s13903_s14  ;;  %12814 = vmatprep.subr.msk.mxu1 %vm587_vm2, %v1868_v48 }
 0x1a7   : > { %6750 = vrot.lane.b32.xlu0 %v13994_v24, %s13903_s14  ;;  %12791 = vmatmul.mubr.msk.f32.gmra.mxu0 %vm632_vm6, %v12773_v38  ;;  %v14654_v38 = vcombine.high %v14637_v34, %v14637_v34 }
 0x1a8   : > { %13606 = vmatmul.mubr.msk.f32.gmra.mxu1 %vm632_vm6, %v12774_v40  ;;  %1712 = vmatprep.mubr.f32.mxu0 %v18909_v0 }
 0x1a9   : > { %1959 = vmatprep.mubr.f32.mxu1 %v18909_v0  ;;  %v14532_v8 = vpop.permute.xlu0 %3626  ;;  %v14569_v18 = vpop.permute.xlu1 %3630 }
 0x1aa   : > { %6756 = vrot.lane.b32.xlu1 %v14076_v51, %s13903_s14 }
 0x1ab   : > { %6754 = vrot.lane.b32.xlu0 %v14065_v47, %s13903_s14  ;;  %12792 = vmatmul.mubr.msk.f32.gmra.mxu0 %vm632_vm6, %v12774_v40  ;;  %v3195_v40 = vsel %vm3191_vm11, %v14465_v60, %v14469_v61 }
 0x1ac   : > { %12804 = vmatmul.mubr.msk.f32.vlgmr.msra.gmra.mxu1 %vm632_vm6, %v12798_v50  ;;  %2048 = vmatprep.mubr.f32.mxu0 %v18909_v0 }
 0x1ad   : > { %12815 = vmatpush1.msk.msra.mxu1 %vm587_vm2, %v1867_v53  ;;  %1965 = vmatprep.mubr.f32.mxu1 %v18909_v0  ;;  %v14563_v15 = vpop.permute.xlu0 %3620  ;;  %v14587_v21 = vpop.permute.xlu1 %4065  ;;  %v3194_v53 = vsel %vm3191_vm11, %v14435_v57, %v14465_v60  ;;  %v3192_v57 = vsel %vm3191_vm11, %v14450_v59, %v14417_v54  ;;  %v12879_v59 = vld [vmem:[%s18905_s2 + $0xc0] sm:$0xff]  ;;  %v3196_v60 = vsel %vm3191_vm11, %v14469_v61, %v14486_v63  ;;  %v12880_v61 = vld [vmem:[%s18905_s2 + $0xc8] sm:$0xff] }
 0x1ae   : > { %7193 = vrot.lane.b32.xlu1 %v13996_v26, %s13904_s21  ;;  %12835 = vmatprep.subr.msk.mxu1 %vm587_vm2, %v2309_v55  ;;  %v8964_v55 = vld [vmem:[#allocation2 + $0x1c] sm:$0xf] }
 0x1af   : > { %7191 = vrot.lane.b32.xlu0 %v13992_v23, %s13904_s21  ;;  %12810 = vmatmul.mubr.msk.f32.vlgmr.msra.gmra.mxu0 %vm632_vm6, %v12798_v50  ;;  %v12800_v23 = vld [vmem:[%s18905_s2 + $0x70] sm:$0xff] }
 0x1b0   : > { %12805 = vmatmul.mubr.msk.f32.gmra.mxu1 %vm632_vm6, %v12799_v56  ;;  %13609 = vmatpush3.msk.msra.mxu0 %vm587_vm2, %v14239_v16  ;;  %v8080_v16 = vcombine.high %v8072_v12, %v8072_v12 }
 0x1b1   : > { %12829 = vmatprep.subr.msk.mxu0 %vm587_vm2, %v2307_v58  ;;  %1971 = vmatprep.mubr.f32.mxu1 %v18909_v0 }
 0x1b2   : > { %7197 = vrot.lane.b32.xlu1 %v13994_v24, %s13904_s21  ;;  %2054 = vmatprep.mubr.f32.mxu0 %v18909_v0  ;;  %v12801_v24 = vld [vmem:[%s18905_s2 + $0x78] sm:$0xff] }
 0x1b3   : > { %7195 = vrot.lane.b32.xlu0 %v14001_v30, %s13904_s21  ;;  %12811 = vmatmul.mubr.msk.f32.gmra.mxu0 %vm632_vm6, %v12799_v56 }
 0x1b4   : > { %12806 = vmatmul.mubr.msk.f32.gmra.mxu1 %vm632_vm6, %v12800_v23  ;;  %2060 = vmatprep.mubr.f32.mxu0 %v18909_v0 }
 0x1b5   : > { %1977 = vmatprep.mubr.f32.mxu1 %v18909_v0 }
 0x1b6   : > { %7199 = vrot.lane.b32.xlu1 %v14006_v32, %s13904_s21  ;;  %v14474_v32 = vld [vmem:[#allocation2] sm:$0xff] }
 0x1b7   : > { %7189 = vrot.lane.b32.xlu0 %v13988_v17, %s13904_s21  ;;  %12812 = vmatmul.mubr.msk.f32.gmra.mxu0 %vm632_vm6, %v12800_v23  ;;  %v2308_v17 = vsel %vm2305_vm9, %v14261_v20, %v14285_v27  ;;  %v7632_v62 = vcombine.high %v14474_v32, %v14474_v32  ;;  %v14580_v20 = vpop.permute.xlu0 %3632  ;;  %vm8543_vm9 = vcmask 457728  }
 0x1b8   : > { %12807 = vmatmul.mubr.msk.f32.gmra.mxu1 %vm632_vm6, %v12801_v24  ;;  %2066 = vmatprep.mubr.f32.mxu0 %v18909_v0 }
 0x1b9   : > { %2137 = vmatprep.mubr.f32.mxu1 %v18909_v0 }
 0x1ba   : > { %7203 = vrot.lane.b32.xlu1 %v14076_v51, %s13904_s21 }
 0x1bb   : > { %7201 = vrot.lane.b32.xlu0 %v14065_v47, %s13904_s21  ;;  %12813 = vmatmul.mubr.msk.f32.gmra.mxu0 %vm632_vm6, %v12801_v24  ;;  %v14603_v27 = vpop.permute.xlu0 %4067  ;;  %s13908_s21 = smov 55  }
 0x1bc   : > { %12816 = vmatmul.mubr.msk.f32.vlgmr.msra.gmra.mxu1 %vm632_vm6, %v12798_v50  ;;  %13610 = vmatprep.mubr.msk.f32.mxu0 %vm632_vm6, %v12798_v50 }
 0x1bd   : > { %12836 = vmatpush1.msk.msra.mxu1 %vm587_vm2, %v2308_v17  ;;  %2143 = vmatprep.mubr.f32.mxu1 %v18909_v0  ;;  %v3638_v17 = vsel %vm3634_vm12, %v14532_v8, %v14546_v11 }
 0x1be   : > { %7640 = vrot.lane.b32.xlu1 %v13996_v26, %s13905_s28  ;;  %13616 = vmatprep.subr.msk.mxu1 %vm587_vm2, %v14321_v36  ;;  %v7626_v26 = vld [vmem:[#allocation2 + $0x10] sm:$0xff] }
 0x1bf   : > { %7638 = vrot.lane.b32.xlu0 %v7632_v62, %s13905_s28  ;;  %13611 = vmatmul.mubr.msk.f32.vlgmr.msra.gmra.mxu0 %vm632_vm6, %v12799_v56  ;;  %v7634_v5 = vcombine.high %v7626_v26, %v7626_v26  ;;  %v14639_v35 = vpop.permute.xlu0 %4069 }
 0x1c0   : > { %12817 = vmatmul.mubr.msk.f32.gmra.mxu1 %vm632_vm6, %v12799_v56  ;;  %12830 = vmatpush1.msk.msra.mxu0 %vm587_vm2, %v2306_v2  ;;  %v9407_v2 = vld [vmem:[#allocation2 + $0x1c] sm:$0xf] }
 0x1c1   : > { %12841 = vmatprep.subr.msk.mxu0 %vm587_vm2, %v2311_v3  ;;  %2149 = vmatprep.mubr.f32.mxu1 %v18909_v0 }
 0x1c2   : > { %7642 = vrot.lane.b32.xlu1 %v14001_v30, %s13905_s28  ;;  %13613 = vmatprep.mubr.msk.f32.mxu0 %vm632_vm6, %v12800_v23  ;;  %v12825_v30 = vld [vmem:[%s18905_s2 + $0x80] sm:$0xff] }
 0x1c3   : > { %7636 = vrot.lane.b32.xlu0 %v14474_v32, %s13905_s28  ;;  %13614 = vmatmul.mubr.msk.f32.gmra.mxu0 %vm632_vm6, %v12801_v24  ;;  %v14673_v42 = vpop.permute.xlu0 %4073 }
 0x1c4   : > { %12818 = vmatmul.mubr.msk.f32.gmra.mxu1 %vm632_vm6, %v12800_v23  ;;  %2402 = vmatprep.mubr.f32.mxu0 %v18909_v0  ;;  %v3197_v23 = vsel %vm3191_vm11, %v14486_v63, %v14494_v1  ;;  %v3636_v63 = vsel %vm3634_vm12, %v14512_v4, %v14518_v6  ;;  %vm9429_vm11 = vcmask 441344  }
 0x1c5   : > { %2155 = vmatprep.mubr.f32.mxu1 %v18909_v0 }
 0x1c6   : > { %7646 = vrot.lane.b32.xlu1 %v7634_v5, %s13905_s28 }
 0x1c7   : > { %7644 = vrot.lane.b32.xlu0 %v7626_v26, %s13905_s28  ;;  %12831 = vmatmul.mubr.msk.f32.vlgmr.msra.gmra.mxu0 %vm632_vm6, %v12825_v30  ;;  %v14697_v48 = vpop.permute.xlu0 %4509 }
 0x1c8   : > { %12819 = vmatmul.mubr.msk.f32.gmra.mxu1 %vm632_vm6, %v12801_v24  ;;  %12842 = vmatpush1.msk.msra.mxu0 %vm587_vm2, %v2310_v7  ;;  %v3637_v7 = vsel %vm3634_vm12, %v14518_v6, %v14532_v8  ;;  %v3635_v6 = vsel %vm3634_vm12, %v14563_v15, %v14512_v4  ;;  %v3640_v8 = vsel %vm3634_vm12, %v14569_v18, %v14580_v20 }
 0x1c9   : > { %12862 = vmatprep.subr.msk.mxu0 %vm587_vm2, %v2752_v9  ;;  %2408 = vmatprep.mubr.f32.mxu0 %v18909_v0  ;;  %v9850_v9 = vld [vmem:[#allocation2 + $0x1c] sm:$0xf] }
 0x1ca   : > { %7650 = vrot.lane.b32.xlu1 %v14076_v51, %s13905_s28  ;;  %2491 = vmatprep.mubr.f32.mxu1 %v18909_v0 }
 0x1cb   : > { %7648 = vrot.lane.b32.xlu0 %v14065_v47, %s13905_s28  ;;  %12832 = vmatmul.mubr.msk.f32.gmra.mxu0 %vm632_vm6, %v12826_v10 }
 0x1cc   : > { %12837 = vmatmul.mubr.msk.f32.vlgmr.msra.gmra.mxu1 %vm632_vm6, %v12825_v30  ;;  %2414 = vmatprep.mubr.f32.mxu0 %v18909_v0 }
 0x1cd   : > { %13617 = vmatpush3.msk.msra.mxu1 %vm587_vm2, %v14321_v36  ;;  %2497 = vmatprep.mubr.f32.mxu1 %v18909_v0  ;;  %v12852_v36 = vld [vmem:[%s18905_s2 + $0xa0] sm:$0xff] }
 0x1ce   : > { %8087 = vrot.lane.b32.xlu1 %v8072_v12, %s13906_s7  ;;  %12856 = vmatprep.subr.msk.mxu1 %vm587_vm2, %v2750_v13 }
 0x1cf   : > { %8085 = vrot.lane.b32.xlu0 %v7632_v62, %s13906_s7  ;;  %12833 = vmatmul.mubr.msk.f32.gmra.mxu0 %vm632_vm6, %v12827_v14 }
 0x1d0   : > { %12838 = vmatmul.mubr.msk.f32.gmra.mxu1 %vm632_vm6, %v12826_v10  ;;  %2420 = vmatprep.mubr.f32.mxu0 %v18909_v0 }
 0x1d1   : > { %2503 = vmatprep.mubr.f32.mxu1 %v18909_v0 }
 0x1d2   : > { %8091 = vrot.lane.b32.xlu1 %v7626_v26, %s13906_s7  ;;  %v12881_v26 = vld [vmem:[%s18905_s2 + $0xd0] sm:$0xff] }
 0x1d3   : > { %8089 = vrot.lane.b32.xlu0 %v8080_v16, %s13906_s7  ;;  %12834 = vmatmul.mubr.msk.f32.gmra.mxu0 %vm632_vm6, %v12828_v19 }
 0x1d4   : > { %12839 = vmatmul.mubr.msk.f32.gmra.mxu1 %vm632_vm6, %v12827_v14  ;;  %2580 = vmatprep.mubr.f32.mxu0 %v18909_v0 }
 0x1d5   : > { %2509 = vmatprep.mubr.f32.mxu1 %v18909_v0 }
 0x1d6   : > { %8093 = vrot.lane.b32.xlu1 %v7634_v5, %s13906_s7 }
 0x1d7   : > { %8083 = vrot.lane.b32.xlu0 %v14474_v32, %s13906_s7  ;;  %12843 = vmatmul.mubr.msk.f32.vlgmr.msra.gmra.mxu0 %vm632_vm6, %v12825_v30 }
 0x1d8   : > { %12840 = vmatmul.mubr.msk.f32.gmra.mxu1 %vm632_vm6, %v12828_v19  ;;  %12863 = vmatpush1.msk.msra.mxu0 %vm587_vm2, %v2751_v22 }
 0x1d9   : > { %13624 = vmatprep.subr.msk.mxu0 %vm587_vm2, %v14410_v52  ;;  %2586 = vmatprep.mubr.f32.mxu0 %v18909_v0 }
 0x1da   : > { %8097 = vrot.lane.b32.xlu1 %v14076_v51, %s13906_s7  ;;  %13618 = vmatprep.mubr.msk.f32.mxu1 %vm632_vm6, %v12825_v30  ;;  %v14612_v51 = vld [vmem:[#allocation2 + $0xc] sm:$0xff] }
 0x1db   : > { %8095 = vrot.lane.b32.xlu0 %v14065_v47, %s13906_s7  ;;  %12844 = vmatmul.mubr.msk.f32.gmra.mxu0 %vm632_vm6, %v12826_v10  ;;  %v14618_v47 = vpop.permute.xlu1 %4063  ;;  %v14631_v33 = vcombine.high %v14612_v51, %v14612_v51  ;;  %s13800_s7 = smul.u32 224, %s19008_s15 }
 0x1dc   : > { %13619 = vmatmul.mubr.msk.f32.vlgmr.msra.gmra.mxu1 %vm632_vm6, %v12826_v10  ;;  %2592 = vmatprep.mubr.f32.mxu0 %v18909_v0 }
 0x1dd   : > { %12857 = vmatpush1.msk.msra.mxu1 %vm587_vm2, %v2749_v28  ;;  %13621 = vmatprep.mubr.msk.f32.mxu1 %vm632_vm6, %v12827_v14  ;;  %s18768_s9 = scalar_lea.vmem %s18907_s4, %s13800_s7 }
 0x1de   : > { %8533 = vrot.lane.b32.xlu1 %v14612_v51, %s13907_s12  ;;  %12868 = vmatprep.subr.msk.mxu1 %vm587_vm2, %v2754_v31  ;;  %v3639_v31 = vsel %vm3634_vm12, %v14546_v11, %v14569_v18  ;;  %v14911_v11 = vld [vmem:[%s18905_s2 + $0xe8] sm:$0xff]  ;;  %vm9872_vm12 = vcmask 375808  }
 0x1df   : > { %8531 = vrot.lane.b32.xlu0 %v14616_v29, %s13907_s12  ;;  %12845 = vmatmul.mubr.msk.f32.gmra.mxu0 %vm632_vm6, %v12827_v14  ;;  %v14650_v37 = vpop.permute.xlu1 %4071 }
 0x1e0   : > { %13622 = vmatmul.mubr.msk.f32.gmra.mxu1 %vm632_vm6, %v12828_v19  ;;  %2598 = vmatprep.mubr.f32.mxu0 %v18909_v0 }
 0x1e1   : > { %2845 = vmatprep.mubr.f32.mxu1 %v18909_v0 }
 0x1e2   : > { %8535 = vrot.lane.b32.xlu1 %v14631_v33, %s13907_s12 }
 0x1e3   : > { %8529 = vrot.lane.b32.xlu0 %v14597_v25, %s13907_s12  ;;  %12846 = vmatmul.mubr.msk.f32.gmra.mxu0 %vm632_vm6, %v12828_v19  ;;  %v14679_v43 = vpop.permute.xlu1 %4075  ;;  %v14883_v19 = vld [vmem:[%s18905_s2 + $0xe0] sm:$0xff] }
 0x1e4   : > { %12858 = vmatmul.mubr.msk.f32.vlgmr.msra.gmra.mxu1 %vm632_vm6, %v12852_v36  ;;  %2934 = vmatprep.mubr.f32.mxu0 %v18909_v0 }
 0x1e5   : > { %12869 = vmatpush1.msk.msra.mxu1 %vm587_vm2, %v2753_v39  ;;  %2851 = vmatprep.mubr.f32.mxu1 %v18909_v0 }
 0x1e6   : > { %8539 = vrot.lane.b32.xlu1 %v14654_v38, %s13907_s12  ;;  %12889 = vmatprep.subr.msk.mxu1 %vm587_vm2, %v3195_v40  ;;  %v4081_v40 = vsel %vm4077_vm13, %v14639_v35, %v14650_v37 }
 0x1e7   : > { %8537 = vrot.lane.b32.xlu0 %v14637_v34, %s13907_s12  ;;  %12864 = vmatmul.mubr.msk.f32.vlgmr.msra.gmra.mxu0 %vm632_vm6, %v12852_v36  ;;  %v14708_v50 = vpop.permute.xlu1 %4511 }
 0x1e8   : > { %12859 = vmatmul.mubr.msk.f32.gmra.mxu1 %vm632_vm6, %v12853_v41  ;;  %13625 = vmatpush3.msk.msra.mxu0 %vm587_vm2, %v14410_v52  ;;  %v14718_v52 = vpop.permute.xlu0 %4513 }
 0x1e9   : > { %12883 = vmatprep.subr.msk.mxu0 %vm587_vm2, %v3193_v44  ;;  %2857 = vmatprep.mubr.f32.mxu1 %v18909_v0 }
 0x1ea   : > { %8974 = vrot.lane.b32.xlu1 %v14616_v29, %s13908_s21  ;;  %2940 = vmatprep.mubr.f32.mxu0 %v18909_v0 }
 0x1eb   : > { %8541 = vrot.lane.b32.xlu0 %v8521_v45, %s13907_s12  ;;  %12865 = vmatmul.mubr.msk.f32.gmra.mxu0 %vm632_vm6, %v12853_v41  ;;  %v14725_v56 = vpop.permute.xlu1 %4515  ;;  %v4079_v45 = vsel %vm4077_vm13, %v14587_v21, %v14603_v27 }
 0x1ec   : > { %12860 = vmatmul.mubr.msk.f32.gmra.mxu1 %vm632_vm6, %v12854_v46  ;;  %2946 = vmatprep.mubr.f32.mxu0 %v18909_v0  ;;  %v14740_v58 = vpop.permute.xlu0 %4507 }
 0x1ed   : > { %2863 = vmatprep.mubr.f32.mxu1 %v18909_v0 }
 0x1ee   : > { %8978 = vrot.lane.b32.xlu1 %v14631_v33, %s13908_s21 }
 0x1ef   : > { %8976 = vrot.lane.b32.xlu0 %v14612_v51, %s13908_s21  ;;  %12866 = vmatmul.mubr.msk.f32.gmra.mxu0 %vm632_vm6, %v12854_v46  ;;  %v14751_v54 = vpop.permute.xlu1 %4517 }
 0x1f0   : > { %12861 = vmatmul.mubr.msk.f32.gmra.mxu1 %vm632_vm6, %v12855_v49  ;;  %2952 = vmatprep.mubr.f32.mxu0 %v18909_v0  ;;  %v14766_v24 = vpop.permute.xlu0 %4519 }
 0x1f1   : > { %3023 = vmatprep.mubr.f32.mxu1 %v18909_v0 }
 0x1f2   : > { %8972 = vrot.lane.b32.xlu1 %v14597_v25, %s13908_s21 }
 0x1f3   : > { %8980 = vrot.lane.b32.xlu0 %v14637_v34, %s13908_s21  ;;  %12867 = vmatmul.mubr.msk.f32.gmra.mxu0 %vm632_vm6, %v12855_v49  ;;  %v14773_v32 = vpop.permute.xlu1 %4521 }
 0x1f4   : > { %12870 = vmatmul.mubr.msk.f32.vlgmr.msra.gmra.mxu1 %vm632_vm6, %v12852_v36  ;;  %13626 = vmatprep.mubr.msk.f32.mxu0 %vm632_vm6, %v12852_v36  ;;  %v14791_v62 = vpop.permute.xlu0 %4956 }
 0x1f5   : > { %12890 = vmatpush1.msk.msra.mxu1 %vm587_vm2, %v3194_v53  ;;  %3029 = vmatprep.mubr.f32.mxu1 %v18909_v0  ;;  %v14940_v53 = vld [vmem:[%s18905_s2 + $0xf0] sm:$0xff] }
 0x1f6   : > { %8984 = vrot.lane.b32.xlu1 %v8964_v55, %s13908_s21  ;;  %13632 = vmatprep.subr.msk.mxu1 %vm587_vm2, %v14494_v1 }
 0x1f7   : > { %8982 = vrot.lane.b32.xlu0 %v14654_v38, %s13908_s21  ;;  %13627 = vmatmul.mubr.msk.f32.vlgmr.msra.gmra.mxu0 %vm632_vm6, %v12853_v41  ;;  %v14805_v3 = vpop.permute.xlu1 %4958 }
 0x1f8   : > { %12871 = vmatmul.mubr.msk.f32.gmra.mxu1 %vm632_vm6, %v12853_v41  ;;  %12884 = vmatpush1.msk.msra.mxu0 %vm587_vm2, %v3192_v57  ;;  %v14820_v5 = vpop.permute.xlu0 %4954 }
 0x1f9   : > { %12895 = vmatprep.subr.msk.mxu0 %vm587_vm2, %v3197_v23  ;;  %3035 = vmatprep.mubr.f32.mxu1 %v18909_v0 }
 0x1fa   : > { %9419 = vrot.lane.b32.xlu1 %v14612_v51, %s13909_s26  ;;  %13629 = vmatprep.mubr.msk.f32.mxu0 %vm632_vm6, %v12854_v46 }
 0x1fb   : > { %9417 = vrot.lane.b32.xlu0 %v14616_v29, %s13909_s26  ;;  %13630 = vmatmul.mubr.msk.f32.gmra.mxu0 %vm632_vm6, %v12855_v49  ;;  %v14824_v30 = vpop.permute.xlu1 %4960 }
 0x1fc   : > { %12872 = vmatmul.mubr.msk.f32.gmra.mxu1 %vm632_vm6, %v12854_v46  ;;  %3288 = vmatprep.mubr.f32.mxu0 %v18909_v0  ;;  %v14837_v10 = vpop.permute.xlu0 %4962 }
 0x1fd   : > { %3041 = vmatprep.mubr.f32.mxu1 %v18909_v0 }
 0x1fe   : > { %9421 = vrot.lane.b32.xlu1 %v14631_v33, %s13909_s26 }
 0x1ff   : > { %9415 = vrot.lane.b32.xlu0 %v14597_v25, %s13909_s26  ;;  %12885 = vmatmul.mubr.msk.f32.vlgmr.msra.gmra.mxu0 %vm632_vm6, %v12879_v59  ;;  %v14845_v12 = vpop.permute.xlu1 %4964 }
 0x200   : > { %12873 = vmatmul.mubr.msk.f32.gmra.mxu1 %vm632_vm6, %v12855_v49  ;;  %12896 = vmatpush1.msk.msra.mxu0 %vm587_vm2, %v3196_v60  ;;  %v14865_v4 = vpop.permute.xlu0 %4966  ;;  %v10293_v49 = vld [vmem:[#allocation2 + $0x1c] sm:$0xf] }
 0x201   : > { %12916 = vmatprep.subr.msk.mxu0 %vm587_vm2, %v3638_v17  ;;  %3294 = vmatprep.mubr.f32.mxu0 %v18909_v0  ;;  %v14968_v17 = vld [vmem:[%s18905_s2 + $0xf8] sm:$0xff] }
 0x202   : > { %9425 = vrot.lane.b32.xlu1 %v14654_v38, %s13909_s26  ;;  %3377 = vmatprep.mubr.f32.mxu1 %v18909_v0 }
 0x203   : > { %9423 = vrot.lane.b32.xlu0 %v14637_v34, %s13909_s26  ;;  %12886 = vmatmul.mubr.msk.f32.gmra.mxu0 %vm632_vm6, %v12880_v61  ;;  %v14873_v15 = vpop.permute.xlu1 %4968 }
 0x204   : > { %12891 = vmatmul.mubr.msk.f32.vlgmr.msra.gmra.mxu1 %vm632_vm6, %v12879_v59  ;;  %3300 = vmatprep.mubr.f32.mxu0 %v18909_v0  ;;  %v14900_v39 = vpop.permute.xlu0 %5403 }
 0x205   : > { %13633 = vmatpush3.msk.msra.mxu1 %vm587_vm2, %v14494_v1  ;;  %3383 = vmatprep.mubr.f32.mxu1 %v18909_v0  ;;  %v12882_v1 = vld [vmem:[%s18905_s2 + $0xd8] sm:$0xff]  ;;  %18922 = vst [vmem:[#allocation3_spill] sm:$0xff] %v14900_v39  ;;  %v4082_v39 = vsel %vm4077_vm13, %v14650_v37, %v14673_v42  ;;  %v4527_v37 = vsel %vm4523_vm14, %v14718_v52, %v14725_v56 }
 0x206   : > { %9860 = vrot.lane.b32.xlu1 %v14616_v29, %s13910_s5  ;;  %12910 = vmatprep.subr.msk.mxu1 %vm587_vm2, %v3636_v63 }
 0x207   : > { %9427 = vrot.lane.b32.xlu0 %v9407_v2, %s13909_s26  ;;  %12887 = vmatmul.mubr.msk.f32.gmra.mxu0 %vm632_vm6, %v12881_v26  ;;  %v14916_v18 = vpop.permute.xlu1 %5405 }
 0x208   : > { %12892 = vmatmul.mubr.msk.f32.gmra.mxu1 %vm632_vm6, %v12880_v61  ;;  %3306 = vmatprep.mubr.f32.mxu0 %v18909_v0  ;;  %18923 = vst [vmem:[#allocation4_spill] sm:$0xff] %v14916_v18 }
 0x209   : > { %3389 = vmatprep.mubr.f32.mxu1 %v18909_v0 }
 0x20a   : > { %9864 = vrot.lane.b32.xlu1 %v14631_v33, %s13910_s5 }
 0x20b   : > { %9862 = vrot.lane.b32.xlu0 %v14612_v51, %s13910_s5  ;;  %12888 = vmatmul.mubr.msk.f32.gmra.mxu0 %vm632_vm6, %v12882_v1 }
 0x20c   : > { %12893 = vmatmul.mubr.msk.f32.gmra.mxu1 %vm632_vm6, %v12881_v26  ;;  %3466 = vmatprep.mubr.f32.mxu0 %v18909_v0 }
 0x20d   : > { %3395 = vmatprep.mubr.f32.mxu1 %v18909_v0 }
 0x20e   : > { %9858 = vrot.lane.b32.xlu1 %v14597_v25, %s13910_s5 }
 0x20f   : > { %9866 = vrot.lane.b32.xlu0 %v14637_v34, %s13910_s5  ;;  %12897 = vmatmul.mubr.msk.f32.vlgmr.msra.gmra.mxu0 %vm632_vm6, %v12879_v59 }
 0x210   : > { %12894 = vmatmul.mubr.msk.f32.gmra.mxu1 %vm632_vm6, %v12882_v1  ;;  %12917 = vmatpush1.msk.msra.mxu0 %vm587_vm2, %v3637_v7 }
 0x211   : > { %13640 = vmatprep.subr.msk.mxu0 %vm587_vm2, %v14580_v20  ;;  %3472 = vmatprep.mubr.f32.mxu0 %v18909_v0 }
 0x212   : > { %9870 = vrot.lane.b32.xlu1 %v9850_v9, %s13910_s5  ;;  %13634 = vmatprep.mubr.msk.f32.mxu1 %vm632_vm6, %v12879_v59  ;;  %v14958_v59 = vpop.permute.xlu1 %5409 }
 0x213   : > { %9868 = vrot.lane.b32.xlu0 %v14654_v38, %s13910_s5  ;;  %12898 = vmatmul.mubr.msk.f32.gmra.mxu0 %vm632_vm6, %v12880_v61  ;;  %18925 = vst [vmem:[#allocation6_spill] sm:$0xff] %v14958_v59 }
 0x214   : > { %13635 = vmatmul.mubr.msk.f32.vlgmr.msra.gmra.mxu1 %vm632_vm6, %v12880_v61  ;;  %3478 = vmatprep.mubr.f32.mxu0 %v18909_v0 }
 0x215   : > { %12911 = vmatpush1.msk.msra.mxu1 %vm587_vm2, %v3635_v6  ;;  %v14860_v13 = vpop.f32.mrf.mxu0  ;;  %13637 = vmatprep.mubr.msk.f32.mxu1 %vm632_vm6, %v12881_v26 }
 0x216   : > { %10305 = vrot.lane.b32.xlu1 %v14612_v51, %s13911_s10  ;;  %12922 = vmatprep.subr.msk.mxu1 %vm587_vm2, %v3640_v8  ;;  %v14995_v9 = vpop.permute.xlu1 %5411  ;;  %v4080_v8 = vsel %vm4077_vm13, %v14603_v27, %v14639_v35 }
 0x217   : > { %10303 = vrot.lane.b32.xlu0 %v14616_v29, %s13911_s10  ;;  %v14869_v14 = vpop.f32.mrf.mxu0  ;;  %12899 = vmatmul.mubr.msk.f32.gmra.mxu0 %vm632_vm6, %v12881_v26  ;;  %18927 = vst [vmem:[#allocation8_spill] sm:$0xff] %v14995_v9 }
 0x218   : > { %13638 = vmatmul.mubr.msk.f32.gmra.mxu1 %vm632_vm6, %v12882_v1  ;;  %3484 = vmatprep.mubr.f32.mxu0 %v18909_v0 }
 0x219   : > { %v14878_v16 = vpop.f32.mrf.mxu0  ;;  %3731 = vmatprep.mubr.f32.mxu1 %v18909_v0  ;;  %v14888_v22 = vpop.f32.mrf.mxu1 }
 0x21a   : > { %10307 = vrot.lane.b32.xlu1 %v14631_v33, %s13911_s10  ;;  %v15034_v9 = vpop.permute.xlu1 %5415 }
 0x21b   : > { %10301 = vrot.lane.b32.xlu0 %v14597_v25, %s13911_s10  ;;  %v14890_v28 = vpop.f32.mrf.mxu0  ;;  %12900 = vmatmul.mubr.msk.f32.gmra.mxu0 %vm632_vm6, %v12882_v1  ;;  %v14898_v36 = vpop.f32.mrf.mxu1  ;;  %18929 = vst [vmem:[#allocation10_spill] sm:$0xff] %v15034_v9  ;;  %v15071_v9 = vld [vmem:[%s18905_s2 + $0x100] sm:$0xff] }
 0x21c   : > { %12912 = vmatmul.mubr.msk.f32.vlgmr.msra.gmra.mxu1 %vm632_vm6, %v14883_v19  ;;  %3820 = vmatprep.mubr.f32.mxu0 %v18909_v0 }
 0x21d   : > { %12923 = vmatpush1.msk.msra.mxu1 %vm587_vm2, %v3639_v31  ;;  %3737 = vmatprep.mubr.f32.mxu1 %v18909_v0  ;;  %v14920_v41 = vpop.f32.mrf.mxu0  ;;  %v14922_v44 = vpop.f32.mrf.mxu1 }
 0x21e   : > { %10311 = vrot.lane.b32.xlu1 %v14654_v38, %s13911_s10  ;;  %12943 = vmatprep.subr.msk.mxu1 %vm587_vm2, %v4081_v40  ;;  %v10736_v40 = vld [vmem:[#allocation2 + $0x1c] sm:$0xf] }
 0x21f   : > { %10309 = vrot.lane.b32.xlu0 %v14637_v34, %s13911_s10  ;;  %12918 = vmatmul.mubr.msk.f32.vlgmr.msra.gmra.mxu0 %vm632_vm6, %v14883_v19  ;;  %v14933_v46 = vpop.f32.mrf.mxu0  ;;  %v14943_v55 = vpop.f32.mrf.mxu1 }
 0x220   : > { %12913 = vmatmul.mubr.msk.f32.gmra.mxu1 %vm632_vm6, %v14911_v11  ;;  %13641 = vmatpush3.msk.msra.mxu0 %vm587_vm2, %v14580_v20  ;;  %v14946_v20 = vpop.permute.xlu0 %5407 }
 0x221   : > { %12937 = vmatprep.subr.msk.mxu0 %vm587_vm2, %v4079_v45  ;;  %18924 = vst [vmem:[#allocation5_spill] sm:$0xff] %v14946_v20  ;;  %3743 = vmatprep.mubr.f32.mxu1 %v18909_v0 }
 0x222   : > { %10746 = vrot.lane.b32.xlu1 %v14616_v29, %s13912_s19  ;;  %3826 = vmatprep.mubr.f32.mxu0 %v18909_v0 }
 0x223   : > { %10313 = vrot.lane.b32.xlu0 %v10293_v49, %s13911_s10  ;;  %v14950_v57 = vpop.f32.mrf.mxu0  ;;  %12919 = vmatmul.mubr.msk.f32.gmra.mxu0 %vm632_vm6, %v14911_v11 }
 0x224   : > { %v14952_v23 = vpop.f32.mrf.mxu1  ;;  %12914 = vmatmul.mubr.msk.f32.gmra.mxu1 %vm632_vm6, %v14940_v53  ;;  %3832 = vmatprep.mubr.f32.mxu0 %v18909_v0  ;;  %v14983_v26 = vpop.permute.xlu0 %5401 }
 0x225   : > { %v14960_v60 = vpop.f32.mrf.mxu0  ;;  %3749 = vmatprep.mubr.f32.mxu1 %v18909_v0  ;;  %18926 = vst [vmem:[#allocation7_spill] sm:$0xff] %v14983_v26 }
 0x226   : > { %10750 = vrot.lane.b32.xlu1 %v14631_v33, %s13912_s19  ;;  %v14970_v61 = vpop.f32.mrf.mxu1 }
 0x227   : > { %10748 = vrot.lane.b32.xlu0 %v14612_v51, %s13912_s19  ;;  %v14975_v63 = vpop.f32.mrf.mxu0  ;;  %12920 = vmatmul.mubr.msk.f32.gmra.mxu0 %vm632_vm6, %v14940_v53 }
 0x228   : > { %v14977_v2 = vpop.f32.mrf.mxu1  ;;  %12915 = vmatmul.mubr.msk.f32.gmra.mxu1 %vm632_vm6, %v14968_v17  ;;  %3838 = vmatprep.mubr.f32.mxu0 %v18909_v0  ;;  %v15018_v27 = vpop.permute.xlu0 %5413 }
 0x229   : > { %v14987_v1 = vpop.f32.mrf.mxu0  ;;  %3909 = vmatprep.mubr.f32.mxu1 %v18909_v0  ;;  %18928 = vst [vmem:[#allocation9_spill] sm:$0xff] %v15018_v27  ;;  %v18931_v27 = vmov 0.0  }
 0x22a   : > { %10744 = vrot.lane.b32.xlu1 %v14597_v25, %s13912_s19  ;;  %v14990_v7 = vpop.f32.mrf.mxu1 }
 0x22b   : > { %10752 = vrot.lane.b32.xlu0 %v14637_v34, %s13912_s19  ;;  %v14997_v6 = vpop.f32.mrf.mxu0  ;;  %12921 = vmatmul.mubr.msk.f32.gmra.mxu0 %vm632_vm6, %v14968_v17 }
 0x22c   : > { %v15002_v31 = vpop.f32.mrf.mxu1  ;;  %12924 = vmatmul.mubr.msk.f32.vlgmr.msra.gmra.mxu1 %vm632_vm6, %v14883_v19  ;;  %13642 = vmatprep.mubr.msk.f32.mxu0 %vm632_vm6, %v14883_v19  ;;  %v4083_v19 = vsel %vm4077_vm13, %v14673_v42, %v14679_v43 }
 0x22d   : > { %12944 = vmatpush1.msk.msra.mxu1 %vm587_vm2, %v4080_v8  ;;  %v15010_v45 = vpop.f32.mrf.mxu0  ;;  %3915 = vmatprep.mubr.f32.mxu1 %v18909_v0  ;;  %v4078_v8 = vsel %vm4077_vm13, %v14618_v47, %v14587_v21  ;;  %vm10315_vm13 = vcmask 367616  }
 0x22e   : > { %10756 = vrot.lane.b32.xlu1 %v10736_v40, %s13912_s19  ;;  %13648 = vmatprep.subr.msk.mxu1 %vm587_vm2, %v14679_v43  ;;  %v15014_v49 = vpop.f32.mrf.mxu1 }
 0x22f   : > { %10754 = vrot.lane.b32.xlu0 %v14654_v38, %s13912_s19  ;;  %v15023_v35 = vpop.f32.mrf.mxu0  ;;  %13643 = vmatmul.mubr.msk.f32.vlgmr.msra.gmra.mxu0 %vm632_vm6, %v14911_v11 }
 0x230   : > { %v15028_v40 = vpop.f32.mrf.mxu1  ;;  %12925 = vmatmul.mubr.msk.f32.gmra.mxu1 %vm632_vm6, %v14911_v11  ;;  %12938 = vmatpush1.msk.msra.mxu0 %vm587_vm2, %v4078_v8 }
 0x231   : > { %v15042_v21 = vpop.f32.mrf.mxu0  ;;  %12949 = vmatprep.subr.msk.mxu0 %vm587_vm2, %v4083_v19  ;;  %3921 = vmatprep.mubr.f32.mxu1 %v18909_v0  ;;  %v15058_v19 = vpop.permute.xlu0 %5850 }
 0x232   : > { %11191 = vrot.lane.b32.xlu1 %v14612_v51, %s13913_s24  ;;  %v15045_v47 = vpop.f32.mrf.mxu1  ;;  %13645 = vmatprep.mubr.msk.f32.mxu0 %vm632_vm6, %v14940_v53  ;;  %18930 = vst [vmem:[#allocation11_spill] sm:$0xff] %v15058_v19 }
 0x233   : > { %11189 = vrot.lane.b32.xlu0 %v14616_v29, %s13913_s24  ;;  %v15052_v11 = vpop.f32.mrf.mxu0  ;;  %13646 = vmatmul.mubr.msk.f32.gmra.mxu0 %vm632_vm6, %v14968_v17 }
 0x234   : > { %v1103_v8 = vpop.f32.mrf.mxu1  ;;  %12926 = vmatmul.mubr.msk.f32.gmra.mxu1 %vm632_vm6, %v14940_v53  ;;  %4174 = vmatprep.mubr.f32.mxu0 %v18931_v27 }
 0x235   : > { %v15061_v26 = vadd.f32 %v1103_v8, %v14860_v13  ;;  %v15065_v0 = vpop.f32.mrf.mxu0  ;;  %3927 = vmatprep.mubr.f32.mxu1 %v18931_v27  ;;  %v15076_v13 = vpop.permute.xlu1 %5852 }
 0x236   : > { %11193 = vrot.lane.b32.xlu1 %v14631_v33, %s13913_s24  ;;  %v1105_v53 = vpop.f32.mrf.mxu1  ;;  %18932 = vst [vmem:[#allocation12_spill] sm:$0xff] %v15076_v13 }
 0x237   : > { %11187 = vrot.lane.b32.xlu0 %v14597_v25, %s13913_s24  ;;  %v15079_v8 = vadd.f32 %v1105_v53, %v14869_v14  ;;  %v1192_v19 = vpop.f32.mrf.mxu0  ;;  %12939 = vmatmul.mubr.msk.f32.vlgmr.msra.gmra.mxu0 %vm632_vm6, %v15071_v9  ;;  %v15103_v14 = vld [vmem:[%s18905_s2 + $0x108] sm:$0xff] }
 0x238   : > { %v1109_v18 = vpop.f32.mrf.mxu1  ;;  %v15085_v20 = vadd.f32 %v1192_v19, %v14888_v22  ;;  %12927 = vmatmul.mubr.msk.f32.gmra.mxu1 %vm632_vm6, %v14968_v17  ;;  %12950 = vmatpush1.msk.msra.mxu0 %vm587_vm2, %v4082_v39  ;;  %v15111_v39 = vpop.permute.xlu0 %5848 }
 0x239   : > { %v15092_v13 = vadd.f32 %v1109_v18, %v14878_v16  ;;  %v1194_v42 = vpop.f32.mrf.mxu0  ;;  %12970 = vmatprep.subr.msk.mxu0 %vm587_vm2, %v4527_v37  ;;  %18933 = vst [vmem:[#allocation13_spill] sm:$0xff] %v15111_v39  ;;  %4180 = vmatprep.mubr.f32.mxu0 %v18931_v27  ;;  %v4525_v37 = vsel %vm4523_vm14, %v14697_v48, %v14708_v50 }
 0x23a   : > { %11197 = vrot.lane.b32.xlu1 %v14654_v38, %s13913_s24  ;;  %v1111_v22 = vpop.f32.mrf.mxu1  ;;  %v15107_v16 = vadd.f32 %v1194_v42, %v14898_v36  ;;  %4263 = vmatprep.mubr.f32.mxu1 %v18931_v27  ;;  %v15122_v36 = vpop.permute.xlu1 %5854  ;;  %v11179_v42 = vld [vmem:[#allocation2 + $0x1c] sm:$0xf] }
 0x23b   : > { %11195 = vrot.lane.b32.xlu0 %v14637_v34, %s13913_s24  ;;  %v15114_v18 = vadd.f32 %v1111_v22, %v14890_v28  ;;  %v1198_v19 = vpop.f32.mrf.mxu0  ;;  %12940 = vmatmul.mubr.msk.f32.gmra.mxu0 %vm632_vm6, %v15103_v14  ;;  %18934 = vst [vmem:[#allocation14_spill] sm:$0xff] %v15122_v36 }
 0x23c   : > { %v1115_v17 = vpop.f32.mrf.mxu1  ;;  %12945 = vmatmul.mubr.msk.f32.vlgmr.msra.gmra.mxu1 %vm632_vm6, %v15071_v9  ;;  %v15128_v28 = vadd.f32 %v1198_v19, %v14922_v44  ;;  %4186 = vmatprep.mubr.f32.mxu0 %v18931_v27 }
 0x23d   : > { %v15125_v53 = vadd.f32 %v1115_v17, %v14920_v41  ;;  %13649 = vmatpush3.msk.msra.mxu1 %vm587_vm2, %v14679_v43  ;;  %v15140_v41 = vld [vmem:[%s18905_s2 + $0x110] sm:$0xff]  ;;  %v1200_v22 = vpop.f32.mrf.mxu0  ;;  %4269 = vmatprep.mubr.f32.mxu1 %v18931_v27 }
 0x23e   : > { %11632 = vrot.lane.b32.xlu1 %v14616_v29, %s13914_s29  ;;  %12964 = vmatprep.subr.msk.mxu1 %vm587_vm2, %v4525_v37  ;;  %v1117_v44 = vpop.f32.mrf.mxu1  ;;  %v15148_v17 = vadd.f32 %v1200_v22, %v14943_v55  ;;  %v15156_v37 = vpop.permute.xlu0 %5856 }
 0x23f   : > { %11199 = vrot.lane.b32.xlu0 %v11179_v42, %s13913_s24  ;;  %v15145_v43 = vadd.f32 %v1117_v44, %v14933_v46  ;;  %v1204_v39 = vpop.f32.mrf.mxu0  ;;  %12941 = vmatmul.mubr.msk.f32.gmra.mxu0 %vm632_vm6, %v15140_v41  ;;  %18935 = vst [vmem:[#allocation15_spill] sm:$0xff] %v15156_v37  ;;  %v15170_v42 = vld [vmem:[%s18905_s2 + $0x118] sm:$0xff] }
 0x240   : > { %v1121_v19 = vpop.f32.mrf.mxu1  ;;  %12946 = vmatmul.mubr.msk.f32.gmra.mxu1 %vm632_vm6, %v15103_v14  ;;  %v15162_v55 = vadd.f32 %v1204_v39, %v14952_v23  ;;  %4192 = vmatprep.mubr.f32.mxu0 %v18931_v27 }
 0x241   : > { %v15159_v46 = vadd.f32 %v1121_v19, %v14950_v57  ;;  %v1206_v22 = vpop.f32.mrf.mxu0  ;;  %4275 = vmatprep.mubr.f32.mxu1 %v18931_v27  ;;  %v15175_v57 = vpop.permute.xlu1 %5858 }
 0x242   : > { %11636 = vrot.lane.b32.xlu1 %v14631_v33, %s13914_s29  ;;  %v1123_v44 = vpop.f32.mrf.mxu1  ;;  %18936 = vst [vmem:[#allocation16_spill] sm:$0xff] %v15175_v57  ;;  %v15181_v39 = vadd.f32 %v1206_v22, %v14970_v61  ;;  %v11622_v57 = vld [vmem:[#allocation2 + $0x1c] sm:$0xf] }
 0x243   : > { %11634 = vrot.lane.b32.xlu0 %v14612_v51, %s13914_s29  ;;  %v15178_v23 = vadd.f32 %v1123_v44, %v14960_v60  ;;  %v1210_v19 = vpop.f32.mrf.mxu0  ;;  %12942 = vmatmul.mubr.msk.f32.gmra.mxu0 %vm632_vm6, %v15170_v42  ;;  %v15199_v44 = vpop.permute.xlu0 %5860 }
 0x244   : > { %v1281_v36 = vpop.f32.mrf.mxu1  ;;  %12947 = vmatmul.mubr.msk.f32.gmra.mxu1 %vm632_vm6, %v15140_v41  ;;  %v15188_v37 = vadd.f32 %v1210_v19, %v14977_v2  ;;  %4352 = vmatprep.mubr.f32.mxu0 %v18931_v27  ;;  %18937 = vst [vmem:[#allocation17_spill] sm:$0xff] %v15199_v44 }
 0x245   : > { %v15191_v59 = vadd.f32 %v1281_v36, %v14975_v63  ;;  %4281 = vmatprep.mubr.f32.mxu1 %v18931_v27  ;;  %v1212_v60 = vpop.f32.mrf.mxu0  ;;  %v4526_v36 = vsel %vm4523_vm14, %v14708_v50, %v14718_v52  ;;  %v15214_v44 = vpop.permute.xlu1 %5862  ;;  %v15226_v50 = vsel %vm4523_vm14, %v14766_v24, %v14773_v32  ;;  %v4524_v32 = vsel %vm4523_vm14, %v14740_v58, %v14697_v48 }
 0x246   : > { %11630 = vrot.lane.b32.xlu1 %v14597_v25, %s13914_s29  ;;  %v1283_v61 = vpop.f32.mrf.mxu1  ;;  %v15202_v2 = vadd.f32 %v1212_v60, %v14990_v7  ;;  %v4529_v48 = vsel %vm4523_vm14, %v14751_v54, %v14766_v24 }
 0x247   : > { %11638 = vrot.lane.b32.xlu0 %v14637_v34, %s13914_s29  ;;  %v15205_v63 = vadd.f32 %v1283_v61, %v14987_v1  ;;  %v13596_v19 = vpop.f32.mrf.mxu0  ;;  %12951 = vmatmul.mubr.msk.f32.vlgmr.msra.gmra.mxu0 %vm632_vm6, %v15071_v9 }
 0x248   : > { %v1287_v22 = vpop.f32.mrf.mxu1  ;;  %12948 = vmatmul.mubr.msk.f32.gmra.mxu1 %vm632_vm6, %v15170_v42  ;;  %v15220_v1 = vadd.f32 %v13596_v19, %v15002_v31  ;;  %12971 = vmatpush1.msk.msra.mxu0 %vm587_vm2, %v4526_v36  ;;  %v4528_v19 = vsel %vm4523_vm14, %v14725_v56, %v14751_v54  ;;  %v4974_v56 = vsel %vm4970_vm15, %v14824_v30, %v14837_v10  ;;  %v15330_v54 = vld [vmem:[%s18905_s2 + $0x128] sm:$0xff]  ;;  %vm10758_vm14 = vcmask 359424  }
 0x249   : > { %v15217_v7 = vadd.f32 %v1287_v22, %v14997_v6  ;;  %13656 = vmatprep.subr.msk.mxu0 %vm587_vm2, %v15226_v50  ;;  %v1370_v60 = vpop.f32.mrf.mxu0  ;;  %4358 = vmatprep.mubr.f32.mxu0 %v18931_v27 }
 0x24a   : > { %11642 = vrot.lane.b32.xlu1 %v11622_v57, %s13914_s29  ;;  %v1289_v52 = vpop.f32.mrf.mxu1  ;;  %v15237_v31 = vadd.f32 %v1370_v60, %v15014_v49  ;;  %13650 = vmatprep.mubr.msk.f32.mxu1 %vm632_vm6, %v15071_v9 }
 0x24b   : > { %11640 = vrot.lane.b32.xlu0 %v14654_v38, %s13914_s29  ;;  %v15234_v6 = vadd.f32 %v1289_v52, %v15010_v45  ;;  %v13599_v61 = vpop.f32.mrf.mxu0  ;;  %12952 = vmatmul.mubr.msk.f32.gmra.mxu0 %vm632_vm6, %v15103_v14  ;;  %v15249_v45 = vpop.permute.xlu0 %6297 }
 0x24c   : > { %v1293_v57 = vpop.f32.mrf.mxu1  ;;  %13651 = vmatmul.mubr.msk.f32.vlgmr.msra.gmra.mxu1 %vm632_vm6, %v15103_v14  ;;  %v15255_v36 = vadd.f32 %v13599_v61, %v15028_v40  ;;  %4364 = vmatprep.mubr.f32.mxu0 %v18931_v27 }
 0x24d   : > { %v15252_v49 = vadd.f32 %v1293_v57, %v15023_v35  ;;  %12965 = vmatpush1.msk.msra.mxu1 %vm587_vm2, %v4524_v32  ;;  %v1380_v9 = vpop.f32.mrf.mxu0  ;;  %v15266_v35 = vpop.permute.xlu1 %6299  ;;  %13653 = vmatprep.mubr.msk.f32.mxu1 %vm632_vm6, %v15140_v41 }
 0x24e   : > { %12077 = vrot.lane.b32.xlu1 %v14612_v51, %s13915_s8  ;;  %12976 = vmatprep.subr.msk.mxu1 %vm587_vm2, %v4529_v48  ;;  %v1295_v58 = vpop.f32.mrf.mxu1  ;;  %v15272_v14 = vadd.f32 %v1380_v9, %v15045_v47  ;;  %v15293_v47 = vld [vmem:[%s18905_s2 + $0x120] sm:$0xff]  ;;  %v12065_v48 = vld [vmem:[#allocation2 + $0x1c] sm:$0xf] }
 0x24f   : > { %12075 = vrot.lane.b32.xlu0 %v14616_v29, %s13915_s8  ;;  %v15269_v40 = vadd.f32 %v1295_v58, %v15042_v21  ;;  %v1518_v24 = vpop.f32.mrf.mxu0  ;;  %12953 = vmatmul.mubr.msk.f32.gmra.mxu0 %vm632_vm6, %v15140_v41  ;;  %v15364_v58 = vld [vmem:[%s18905_s2 + $0x130] sm:$0xff] }
 0x250   : > { %v1299_v51 = vpop.f32.mrf.mxu1  ;;  %13654 = vmatmul.mubr.msk.f32.gmra.mxu1 %vm632_vm6, %v15170_v42  ;;  %v15285_v21 = vadd.f32 %v1518_v24, %v15061_v26  ;;  %4370 = vmatprep.mubr.f32.mxu0 %v18931_v27 }
 0x251   : > { %v15282_v29 = vadd.f32 %v1299_v51, %v15052_v11  ;;  %v1520_v22 = vpop.f32.mrf.mxu0  ;;  %4621 = vmatprep.mubr.f32.mxu1 %v18931_v27  ;;  %v15298_v11 = vpop.permute.xlu0 %6301 }
 0x252   : > { %12079 = vrot.lane.b32.xlu1 %v14631_v33, %s13915_s8  ;;  %v1301_v41 = vpop.f32.mrf.mxu1  ;;  %v15304_v33 = vadd.f32 %v1520_v22, %v15079_v8 }
 0x253   : > { %12073 = vrot.lane.b32.xlu0 %v14597_v25, %s13915_s8  ;;  %v15301_v26 = vadd.f32 %v1301_v41, %v15065_v0  ;;  %v1524_v52 = vpop.f32.mrf.mxu0  ;;  %12954 = vmatmul.mubr.msk.f32.gmra.mxu0 %vm632_vm6, %v15170_v42  ;;  %v15313_v25 = vpop.permute.xlu1 %6303 }
 0x254   : > { %v1607_v60 = vpop.f32.mrf.mxu1  ;;  %12966 = vmatmul.mubr.msk.f32.vlgmr.msra.gmra.mxu1 %vm632_vm6, %v15293_v47  ;;  %v15316_v0 = vadd.f32 %v1524_v52, %v15092_v13  ;;  %4710 = vmatprep.mubr.f32.mxu0 %v18931_v27 }
 0x255   : > { %v15319_v8 = vadd.f32 %v1607_v60, %v15085_v20  ;;  %12977 = vmatpush1.msk.msra.mxu1 %vm587_vm2, %v4528_v19  ;;  %v1526_v13 = vpop.f32.mrf.mxu0  ;;  %4627 = vmatprep.mubr.f32.mxu1 %v18931_v27  ;;  %v15347_v61 = vpop.permute.xlu0 %6295 }
 0x256   : > { %12083 = vrot.lane.b32.xlu1 %v14654_v38, %s13915_s8  ;;  %12997 = vmatprep.subr.msk.mxu1 %vm587_vm2, %v4974_v56  ;;  %v1609_v42 = vpop.f32.mrf.mxu1  ;;  %v15336_v20 = vadd.f32 %v1526_v13, %v15114_v18  ;;  %v4972_v18 = vsel %vm4970_vm15, %v14791_v62, %v14805_v3 }
 0x257   : > { %12081 = vrot.lane.b32.xlu0 %v14637_v34, %s13915_s8  ;;  %v15339_v32 = vadd.f32 %v1609_v42, %v15107_v16  ;;  %v1530_v38 = vpop.f32.mrf.mxu0  ;;  %12972 = vmatmul.mubr.msk.f32.vlgmr.msra.gmra.mxu0 %vm632_vm6, %v15293_v47 }
 0x258   : > { %v1613_v57 = vpop.f32.mrf.mxu1  ;;  %12967 = vmatmul.mubr.msk.f32.gmra.mxu1 %vm632_vm6, %v15330_v54  ;;  %v15350_v34 = vadd.f32 %v1530_v38, %v15125_v53  ;;  %13657 = vmatpush3.msk.msra.mxu0 %vm587_vm2, %v15226_v50 }
 0x259   : > { %v15353_v16 = vadd.f32 %v1613_v57, %v15128_v28  ;;  %4633 = vmatprep.mubr.f32.mxu1 %v18931_v27  ;;  %12991 = vmatprep.subr.msk.mxu0 %vm587_vm2, %v4972_v18  ;;  %v1532_v53 = vpop.f32.mrf.mxu0 }
 0x25a   : > { %v1615_v28 = vpop.f32.mrf.mxu1  ;;  %v15369_v50 = vadd.f32 %v1532_v53, %v15145_v43  ;;  %4716 = vmatprep.mubr.f32.mxu0 %v18931_v27  ;;  %v15390_v43 = vld [vmem:[%s18905_s2 + $0x138] sm:$0xff] }
 0x25b   : > { %12085 = vrot.lane.b32.xlu0 %v12065_v48, %s13915_s8  ;;  %v15372_v9 = vadd.f32 %v1615_v28, %v15148_v17  ;;  %v1536_v51 = vpop.f32.mrf.mxu0  ;;  %12973 = vmatmul.mubr.msk.f32.gmra.mxu0 %vm632_vm6, %v15330_v54  ;;  %v4971_v48 = vsel %vm4970_vm15, %v14820_v5, %v14791_v62  ;;  %v4976_v62 = vsel %vm4970_vm15, %v14845_v12, %v14865_v4 }
 0x25c   : > { %v1619_v24 = vpop.f32.mrf.mxu1  ;;  %12968 = vmatmul.mubr.msk.f32.gmra.mxu1 %vm632_vm6, %v15364_v58  ;;  %v15380_v41 = vadd.f32 %v1536_v51, %v15159_v46  ;;  %4722 = vmatprep.mubr.f32.mxu0 %v18931_v27 }
 0x25d   : > { %v15383_v22 = vadd.f32 %v1619_v24, %v15162_v55  ;;  %4639 = vmatprep.mubr.f32.mxu1 %v18931_v27  ;;  %v1538_v17 = vpop.f32.mrf.mxu0 }
 0x25e   : > { %v1621_v19 = vpop.f32.mrf.mxu1  ;;  %v15393_v52 = vadd.f32 %v1538_v17, %v15178_v23 }
 0x25f   : > { %v15396_v46 = vadd.f32 %v1621_v19, %v15181_v39  ;;  %v1696_v55 = vpop.f32.mrf.mxu0  ;;  %12974 = vmatmul.mubr.msk.f32.gmra.mxu0 %vm632_vm6, %v15364_v58 }
 0x260   : > { %v1625_v60 = vpop.f32.mrf.mxu1  ;;  %12969 = vmatmul.mubr.msk.f32.gmra.mxu1 %vm632_vm6, %v15390_v43  ;;  %v15406_v13 = vadd.f32 %v1696_v55, %v15191_v59  ;;  %4728 = vmatprep.mubr.f32.mxu0 %v18931_v27  ;;  %v18939_v55 = vld [vmem:[#allocation5_spill] sm:$0xff] }
 0x261   : > { %v15403_v56 = vadd.f32 %v1625_v60, %v15188_v37  ;;  %4799 = vmatprep.mubr.f32.mxu1 %v18931_v27  ;;  %v1698_v39 = vpop.f32.mrf.mxu0  ;;  %v4973_v37 = vsel %vm4970_vm15, %v14805_v3, %v14824_v30  ;;  %v4977_v3 = vsel %vm4970_vm15, %v14865_v4, %v14873_v15 }
 0x262   : > { %v1627_v23 = vpop.f32.mrf.mxu1  ;;  %v15414_v38 = vadd.f32 %v1698_v39, %v15205_v63 }
 0x263   : > { %v15411_v42 = vadd.f32 %v1627_v23, %v15202_v2  ;;  %v1702_v57 = vpop.f32.mrf.mxu0  ;;  %12975 = vmatmul.mubr.msk.f32.gmra.mxu0 %vm632_vm6, %v15390_v43 }
 0x264   : > { %v13604_v18 = vpop.f32.mrf.mxu1  ;;  %12978 = vmatmul.mubr.msk.f32.vlgmr.msra.gmra.mxu1 %vm632_vm6, %v15293_v47  ;;  %v15424_v59 = vadd.f32 %v1702_v57, %v15217_v7  ;;  %13658 = vmatprep.mubr.msk.f32.mxu0 %vm632_vm6, %v15293_v47 }
 0x265   : > { %v15427_v2 = vadd.f32 %v13604_v18, %v15220_v1  ;;  %12998 = vmatpush1.msk.msra.mxu1 %vm587_vm2, %v4973_v37  ;;  %4805 = vmatprep.mubr.f32.mxu1 %v18931_v27  ;;  %v1704_v30 = vpop.f32.mrf.mxu0 }
 0x266   : > { %13664 = vmatprep.subr.msk.mxu1 %vm587_vm2, %v4977_v3  ;;  %v1785_v63 = vpop.f32.mrf.mxu1  ;;  %v15438_v7 = vadd.f32 %v1704_v30, %v15234_v6  ;;  %v18941_v30 = vld [vmem:[#allocation3_spill] sm:$0xff] }
 0x267   : > { %v15441_v1 = vadd.f32 %v1785_v63, %v15237_v31  ;;  %v1708_v15 = vpop.f32.mrf.mxu0  ;;  %13659 = vmatmul.mubr.msk.f32.vlgmr.msra.gmra.mxu0 %vm632_vm6, %v15330_v54  ;;  %v15542_v63 = vld [vmem:[%s18905_s2 + $0x150] sm:$0xff] }
 0x268   : > { %v13607_v53 = vpop.f32.mrf.mxu1  ;;  %12979 = vmatmul.mubr.msk.f32.gmra.mxu1 %vm632_vm6, %v15330_v54  ;;  %v15451_v47 = vadd.f32 %v1708_v15, %v15252_v49  ;;  %12992 = vmatpush1.msk.msra.mxu0 %vm587_vm2, %v4971_v48 }
 0x269   : > { %v15454_v6 = vadd.f32 %v13607_v53, %v15255_v36  ;;  %4811 = vmatprep.mubr.f32.mxu1 %v18931_v27  ;;  %13003 = vmatprep.subr.msk.mxu0 %vm587_vm2, %v4976_v62  ;;  %v1710_v5 = vpop.f32.mrf.mxu0 }
 0x26a   : > { %v1795_v31 = vpop.f32.mrf.mxu1  ;;  %13661 = vmatprep.mubr.msk.f32.mxu0 %vm632_vm6, %v15364_v58  ;;  %v15465_v49 = vadd.f32 %v1710_v5, %v15269_v40  ;;  %v15485_v40 = vld [vmem:[%s18905_s2 + $0x140] sm:$0xff] }
 0x26b   : > { %v15468_v36 = vadd.f32 %v1795_v31, %v15272_v14  ;;  %v1714_v54 = vpop.f32.mrf.mxu0  ;;  %13662 = vmatmul.mubr.msk.f32.gmra.mxu0 %vm632_vm6, %v15390_v43 }
 0x26c   : > { %v1961_v28 = vpop.f32.mrf.mxu1  ;;  %12980 = vmatmul.mubr.msk.f32.gmra.mxu1 %vm632_vm6, %v15364_v58  ;;  %v15475_v4 = vadd.f32 %v1714_v54, %v15282_v29  ;;  %5068 = vmatprep.mubr.f32.mxu0 %v18931_v27 }
 0x26d   : > { %v15478_v51 = vadd.f32 %v1961_v28, %v15285_v21  ;;  %4817 = vmatprep.mubr.f32.mxu1 %v18931_v27  ;;  %v1716_v14 = vpop.f32.mrf.mxu0  ;;  %v4975_v21 = vsel %vm4970_vm15, %v14837_v10, %v14845_v12  ;;  %v15514_v12 = vld [vmem:[%s18905_s2 + $0x148] sm:$0xff]  ;;  %vm11201_vm15 = vcmask 293888  }
 0x26e   : > { %v1963_v58 = vpop.f32.mrf.mxu1  ;;  %v15488_v24 = vadd.f32 %v1716_v14, %v15301_v26 }
 0x26f   : > { %v15491_v29 = vadd.f32 %v1963_v58, %v15304_v33  ;;  %v2050_v19 = vpop.f32.mrf.mxu0  ;;  %12993 = vmatmul.mubr.msk.f32.vlgmr.msra.gmra.mxu0 %vm632_vm6, %v15485_v40  ;;  %v18938_v33 = vld [vmem:[#allocation6_spill] sm:$0xff] }
 0x270   : > { %v1967_v17 = vpop.f32.mrf.mxu1  ;;  %12981 = vmatmul.mubr.msk.f32.gmra.mxu1 %vm632_vm6, %v15390_v43  ;;  %v15504_v26 = vadd.f32 %v2050_v19, %v15319_v8  ;;  %13004 = vmatpush1.msk.msra.mxu0 %vm587_vm2, %v4975_v21  ;;  %v5421_v10 = vsel %vm5417_vm0, %v18939_v55, %v18938_v33 }
 0x271   : > { %v15501_v60 = vadd.f32 %v1967_v17, %v15316_v0  ;;  %5074 = vmatprep.mubr.f32.mxu0 %v18931_v27  ;;  %13024 = vmatprep.subr.msk.mxu0 %vm587_vm2, %v5421_v10  ;;  %v2052_v43 = vpop.f32.mrf.mxu0 }
 0x272   : > { %v1969_v0 = vpop.f32.mrf.mxu1  ;;  %5157 = vmatprep.mubr.f32.mxu1 %v18931_v27  ;;  %v15522_v23 = vadd.f32 %v2052_v43, %v15339_v32 }
 0x273   : > { %v15519_v8 = vadd.f32 %v1969_v0, %v15336_v20  ;;  %v2056_v37 = vpop.f32.mrf.mxu0  ;;  %12994 = vmatmul.mubr.msk.f32.gmra.mxu0 %vm632_vm6, %v15514_v12  ;;  %v18940_v20 = vld [vmem:[#allocation4_spill] sm:$0xff]  ;;  %v18943_v0 = vld [vmem:[#allocation9_spill] sm:$0xff] }
 0x274   : > { %v1973_v39 = vpop.f32.mrf.mxu1  ;;  %12999 = vmatmul.mubr.msk.f32.vlgmr.msra.gmra.mxu1 %vm632_vm6, %v15485_v40  ;;  %v15532_v18 = vadd.f32 %v2056_v37, %v15353_v16  ;;  %v5419_v32 = vsel %vm5417_vm0, %v18941_v30, %v18940_v20  ;;  %5080 = vmatprep.mubr.f32.mxu0 %v18931_v27  ;;  %v18944_v37 = vld [vmem:[#allocation7_spill] sm:$0xff] }
 0x275   : > { %v15529_v57 = vadd.f32 %v1973_v39, %v15350_v34  ;;  %13665 = vmatpush3.msk.msra.mxu1 %vm587_vm2, %v4977_v3  ;;  %v2058_v48 = vpop.f32.mrf.mxu0  ;;  %5163 = vmatprep.mubr.f32.mxu1 %v18931_v27 }
 0x276   : > { %13018 = vmatprep.subr.msk.mxu1 %vm587_vm2, %v5419_v32  ;;  %v1975_v34 = vpop.f32.mrf.mxu1  ;;  %v15550_v3 = vadd.f32 %v2058_v48, %v15372_v9 }
 0x277   : > { %v15547_v16 = vadd.f32 %v1975_v34, %v15369_v50  ;;  %v2062_v53 = vpop.f32.mrf.mxu0  ;;  %12995 = vmatmul.mubr.msk.f32.gmra.mxu0 %vm632_vm6, %v15542_v63  ;;  %v15567_v50 = vld [vmem:[%s18905_s2 + $0x158] sm:$0xff] }
 0x278   : > { %v1979_v15 = vpop.f32.mrf.mxu1  ;;  %13000 = vmatmul.mubr.msk.f32.gmra.mxu1 %vm632_vm6, %v15514_v12  ;;  %v15560_v5 = vadd.f32 %v2062_v53, %v15383_v22  ;;  %5086 = vmatprep.mubr.f32.mxu0 %v18931_v27 }
 0x279   : > { %v15557_v62 = vadd.f32 %v1979_v15, %v15380_v41  ;;  %5169 = vmatprep.mubr.f32.mxu1 %v18931_v27  ;;  %v2064_v31 = vpop.f32.mrf.mxu0 }
 0x27a   : > { %v1981_v9 = vpop.f32.mrf.mxu1  ;;  %v15573_v41 = vadd.f32 %v2064_v31, %v15396_v46 }
 0x27b   : > { %v15570_v54 = vadd.f32 %v1981_v9, %v15393_v52  ;;  %v2068_v28 = vpop.f32.mrf.mxu0  ;;  %12996 = vmatmul.mubr.msk.f32.gmra.mxu0 %vm632_vm6, %v15567_v50 }
 0x27c   : > { %v2139_v22 = vpop.f32.mrf.mxu1  ;;  %13001 = vmatmul.mubr.msk.f32.gmra.mxu1 %vm632_vm6, %v15542_v63  ;;  %v15580_v14 = vadd.f32 %v2068_v28, %v15403_v56  ;;  %5246 = vmatprep.mubr.f32.mxu0 %v18931_v27  ;;  %v5420_v56 = vsel %vm5417_vm0, %v18940_v20, %v18939_v55  ;;  %v5418_v20 = vsel %vm5417_vm0, %v18944_v37, %v18941_v30  ;;  %v18949_v37 = vld [vmem:[#allocation11_spill] sm:$0xff] }
 0x27d   : > { %v15583_v58 = vadd.f32 %v2139_v22, %v15406_v13  ;;  %5175 = vmatprep.mubr.f32.mxu1 %v18931_v27  ;;  %v2070_v52 = vpop.f32.mrf.mxu0 }
 0x27e   : > { %v2141_v46 = vpop.f32.mrf.mxu1  ;;  %v15588_v21 = vadd.f32 %v2070_v52, %v15411_v42 }
 0x27f   : > { %v15591_v17 = vadd.f32 %v2141_v46, %v15414_v38  ;;  %v13612_v10 = vpop.f32.mrf.mxu0  ;;  %13005 = vmatmul.mubr.msk.f32.vlgmr.msra.gmra.mxu0 %vm632_vm6, %v15485_v40  ;;  %v18942_v38 = vld [vmem:[#allocation10_spill] sm:$0xff] }
 0x280   : > { %v2145_v19 = vpop.f32.mrf.mxu1  ;;  %13002 = vmatmul.mubr.msk.f32.gmra.mxu1 %vm632_vm6, %v15567_v50  ;;  %v15604_v42 = vadd.f32 %v13612_v10, %v15427_v2  ;;  %13025 = vmatpush1.msk.msra.mxu0 %vm587_vm2, %v5420_v56  ;;  %v5424_v55 = vsel %vm5417_vm0, %v18943_v0, %v18942_v38  ;;  %v18947_v56 = vld [vmem:[#allocation14_spill] sm:$0xff] }
 0x281   : > { %v15601_v13 = vadd.f32 %v2145_v19, %v15424_v59  ;;  %5252 = vmatprep.mubr.f32.mxu0 %v18931_v27  ;;  %13672 = vmatprep.subr.msk.mxu0 %vm587_vm2, %v5424_v55  ;;  %v2228_v39 = vpop.f32.mrf.mxu0 }
 0x282   : > { %v2147_v43 = vpop.f32.mrf.mxu1  ;;  %13666 = vmatprep.mubr.msk.f32.mxu1 %vm632_vm6, %v15485_v40  ;;  %v15618_v2 = vadd.f32 %v2228_v39, %v15441_v1  ;;  %v18945_v1 = vld [vmem:[#allocation8_spill] sm:$0xff] }
 0x283   : > { %v15615_v59 = vadd.f32 %v2147_v43, %v15438_v7  ;;  %v13615_v34 = vpop.f32.mrf.mxu0  ;;  %13006 = vmatmul.mubr.msk.f32.gmra.mxu0 %vm632_vm6, %v15514_v12  ;;  %v5423_v30 = vsel %vm5417_vm0, %v18945_v1, %v18943_v0 }
 0x284   : > { %v2151_v32 = vpop.f32.mrf.mxu1  ;;  %13667 = vmatmul.mubr.msk.f32.vlgmr.msra.gmra.mxu1 %vm632_vm6, %v15514_v12  ;;  %v15631_v7 = vadd.f32 %v13615_v34, %v15454_v6  ;;  %5258 = vmatprep.mubr.f32.mxu0 %v18931_v27 }
 0x285   : > { %v15628_v40 = vadd.f32 %v2151_v32, %v15451_v47  ;;  %13019 = vmatpush1.msk.msra.mxu1 %vm587_vm2, %v5418_v20  ;;  %v2238_v15 = vpop.f32.mrf.mxu0  ;;  %13669 = vmatprep.mubr.msk.f32.mxu1 %vm632_vm6, %v15542_v63  ;;  %v15719_v20 = vld [vmem:[%s18905_s2 + $0x170] sm:$0xff] }
 0x286   : > { %13030 = vmatprep.subr.msk.mxu1 %vm587_vm2, %v5423_v30  ;;  %v2153_v48 = vpop.f32.mrf.mxu1  ;;  %v15645_v6 = vadd.f32 %v2238_v15, %v15468_v36 }
 0x287   : > { %v15642_v47 = vadd.f32 %v2153_v48, %v15465_v49  ;;  %v2404_v53 = vpop.f32.mrf.mxu0  ;;  %13007 = vmatmul.mubr.msk.f32.gmra.mxu0 %vm632_vm6, %v15542_v63  ;;  %v15662_v49 = vld [vmem:[%s18905_s2 + $0x160] sm:$0xff] }
 0x288   : > { %v2157_v12 = vpop.f32.mrf.mxu1  ;;  %13670 = vmatmul.mubr.msk.f32.gmra.mxu1 %vm632_vm6, %v15567_v50  ;;  %v15655_v31 = vadd.f32 %v2404_v53, %v15478_v51  ;;  %5264 = vmatprep.mubr.f32.mxu0 %v18931_v27  ;;  %v5422_v51 = vsel %vm5417_vm0, %v18938_v33, %v18945_v1  ;;  %vm11644_vm0 = vcmask 285696  }
 0x289   : > { %v15652_v9 = vadd.f32 %v2157_v12, %v15475_v4  ;;  %5515 = vmatprep.mubr.f32.mxu1 %v18931_v27  ;;  %v2406_v63 = vpop.f32.mrf.mxu0 }
 0x28a   : > { %v2159_v36 = vpop.f32.mrf.mxu1  ;;  %v15668_v4 = vadd.f32 %v2406_v63, %v15491_v29  ;;  %v18946_v29 = vld [vmem:[#allocation15_spill] sm:$0xff] }
 0x28b   : > { %v15665_v28 = vadd.f32 %v2159_v36, %v15488_v24  ;;  %v2410_v22 = vpop.f32.mrf.mxu0  ;;  %13008 = vmatmul.mubr.msk.f32.gmra.mxu0 %vm632_vm6, %v15567_v50  ;;  %v5868_v33 = vsel %vm5864_vm1, %v18947_v56, %v18946_v29  ;;  %v15691_v50 = vld [vmem:[%s18905_s2 + $0x168] sm:$0xff] }
 0x28c   : > { %v2493_v52 = vpop.f32.mrf.mxu1  ;;  %13020 = vmatmul.mubr.msk.f32.vlgmr.msra.gmra.mxu1 %vm632_vm6, %v15662_v49  ;;  %v15678_v46 = vadd.f32 %v2410_v22, %v15501_v60  ;;  %5604 = vmatprep.mubr.f32.mxu0 %v18931_v27 }
 0x28d   : > { %v15681_v24 = vadd.f32 %v2493_v52, %v15504_v26  ;;  %13031 = vmatpush1.msk.msra.mxu1 %vm587_vm2, %v5422_v51  ;;  %5521 = vmatprep.mubr.f32.mxu1 %v18931_v27  ;;  %v2412_v60 = vpop.f32.mrf.mxu0 }
 0x28e   : > { %13051 = vmatprep.subr.msk.mxu1 %vm587_vm2, %v5868_v33  ;;  %v2495_v19 = vpop.f32.mrf.mxu1  ;;  %v15696_v26 = vadd.f32 %v2412_v60, %v15519_v8  ;;  %v18948_v8 = vld [vmem:[#allocation12_spill] sm:$0xff] }
 0x28f   : > { %v15699_v10 = vadd.f32 %v2495_v19, %v15522_v23  ;;  %v2416_v38 = vpop.f32.mrf.mxu0  ;;  %13026 = vmatmul.mubr.msk.f32.vlgmr.msra.gmra.mxu0 %vm632_vm6, %v15662_v49  ;;  %v5866_v23 = vsel %vm5864_vm1, %v18949_v37, %v18948_v8 }
 0x290   : > { %v2499_v0 = vpop.f32.mrf.mxu1  ;;  %13021 = vmatmul.mubr.msk.f32.gmra.mxu1 %vm632_vm6, %v15691_v50  ;;  %v15706_v43 = vadd.f32 %v2416_v38, %v15529_v57  ;;  %13673 = vmatpush3.msk.msra.mxu0 %vm587_vm2, %v5424_v55  ;;  %v18951_v38 = vld [vmem:[#allocation13_spill] sm:$0xff] }
 0x291   : > { %v15709_v39 = vadd.f32 %v2499_v0, %v15532_v18  ;;  %5527 = vmatprep.mubr.f32.mxu1 %v18931_v27  ;;  %13045 = vmatprep.subr.msk.mxu0 %vm587_vm2, %v5866_v23  ;;  %v2418_v57 = vpop.f32.mrf.mxu0  ;;  %v5865_v0 = vsel %vm5864_vm1, %v18951_v38, %v18949_v37 }
 0x292   : > { %v2501_v32 = vpop.f32.mrf.mxu1  ;;  %5610 = vmatprep.mubr.f32.mxu0 %v18931_v27  ;;  %v15724_v18 = vadd.f32 %v2418_v57, %v15547_v16  ;;  %v15744_v16 = vld [vmem:[%s18905_s2 + $0x178] sm:$0xff] }
 0x293   : > { %v15727_v55 = vadd.f32 %v2501_v32, %v15550_v3  ;;  %v2422_v34 = vpop.f32.mrf.mxu0  ;;  %13027 = vmatmul.mubr.msk.f32.gmra.mxu0 %vm632_vm6, %v15691_v50 }
 0x294   : > { %v2505_v1 = vpop.f32.mrf.mxu1  ;;  %13022 = vmatmul.mubr.msk.f32.gmra.mxu1 %vm632_vm6, %v15719_v20  ;;  %v15734_v30 = vadd.f32 %v2422_v34, %v15557_v62  ;;  %5616 = vmatprep.mubr.f32.mxu0 %v18931_v27 }
 0x295   : > { %v15737_v48 = vadd.f32 %v2505_v1, %v15560_v5  ;;  %5533 = vmatprep.mubr.f32.mxu1 %v18931_v27  ;;  %v2424_v3 = vpop.f32.mrf.mxu0 }
 0x296   : > { %v2507_v15 = vpop.f32.mrf.mxu1  ;;  %v15747_v12 = vadd.f32 %v2424_v3, %v15570_v54 }
 0x297   : > { %v15750_v62 = vadd.f32 %v2507_v15, %v15573_v41  ;;  %v2582_v5 = vpop.f32.mrf.mxu0  ;;  %13028 = vmatmul.mubr.msk.f32.gmra.mxu0 %vm632_vm6, %v15719_v20 }
 0x298   : > { %v2511_v53 = vpop.f32.mrf.mxu1  ;;  %13023 = vmatmul.mubr.msk.f32.gmra.mxu1 %vm632_vm6, %v15744_v16  ;;  %v15760_v63 = vadd.f32 %v2582_v5, %v15583_v58  ;;  %5622 = vmatprep.mubr.f32.mxu0 %v18931_v27 }
 0x299   : > { %v15757_v36 = vadd.f32 %v2511_v53, %v15580_v14  ;;  %5693 = vmatprep.mubr.f32.mxu1 %v18931_v27  ;;  %v2584_v41 = vpop.f32.mrf.mxu0  ;;  %v5867_v14 = vsel %vm5864_vm1, %v18948_v8, %v18947_v56 }
 0x29a   : > { %v2513_v54 = vpop.f32.mrf.mxu1  ;;  %v15768_v22 = vadd.f32 %v2584_v41, %v15591_v17  ;;  %v18950_v17 = vld [vmem:[#allocation17_spill] sm:$0xff] }
 0x29b   : > { %v15765_v51 = vadd.f32 %v2513_v54, %v15588_v21  ;;  %v2588_v52 = vpop.f32.mrf.mxu0  ;;  %13029 = vmatmul.mubr.msk.f32.gmra.mxu0 %vm632_vm6, %v15744_v16  ;;  %v5871_v56 = vsel %vm5864_vm1, %v18950_v17, %v15214_v44 }
 0x29c   : > { %v13620_v33 = vpop.f32.mrf.mxu1  ;;  %13032 = vmatmul.mubr.msk.f32.vlgmr.msra.gmra.mxu1 %vm632_vm6, %v15662_v49  ;;  %v15778_v58 = vadd.f32 %v2588_v52, %v15601_v13  ;;  %13674 = vmatprep.mubr.msk.f32.mxu0 %vm632_vm6, %v15662_v49 }
 0x29d   : > { %v15781_v21 = vadd.f32 %v13620_v33, %v15604_v42  ;;  %13052 = vmatpush1.msk.msra.mxu1 %vm587_vm2, %v5867_v14  ;;  %5699 = vmatprep.mubr.f32.mxu1 %v18931_v27  ;;  %v2590_v60 = vpop.f32.mrf.mxu0 }
 0x29e   : > { %13680 = vmatprep.subr.msk.mxu1 %vm587_vm2, %v5871_v56  ;;  %v2671_v19 = vpop.f32.mrf.mxu1  ;;  %v15792_v13 = vadd.f32 %v2590_v60, %v15615_v59 }
 0x29f   : > { %v15795_v42 = vadd.f32 %v2671_v19, %v15618_v2  ;;  %v2594_v44 = vpop.f32.mrf.mxu0  ;;  %13675 = vmatmul.mubr.msk.f32.vlgmr.msra.gmra.mxu0 %vm632_vm6, %v15691_v50  ;;  %v18952_v2 = vld [vmem:[#allocation16_spill] sm:$0xff] }
 0x2a0   : > { %v13623_v8 = vpop.f32.mrf.mxu1  ;;  %13033 = vmatmul.mubr.msk.f32.gmra.mxu1 %vm632_vm6, %v15691_v50  ;;  %v15805_v49 = vadd.f32 %v2594_v44, %v15628_v40  ;;  %13046 = vmatpush1.msk.msra.mxu0 %vm587_vm2, %v5865_v0  ;;  %v5870_v37 = vsel %vm5864_vm1, %v18952_v2, %v18950_v17  ;;  %v15910_v0 = vpop.permute.xlu1 %6305 }
 0x2a1   : > { %v15808_v59 = vadd.f32 %v13623_v8, %v15631_v7  ;;  %5705 = vmatprep.mubr.f32.mxu1 %v18931_v27  ;;  %13057 = vmatprep.subr.msk.mxu0 %vm587_vm2, %v5870_v37  ;;  %v2596_v23 = vpop.f32.mrf.mxu0 }
 0x2a2   : > { %v2681_v57 = vpop.f32.mrf.mxu1  ;;  %13677 = vmatprep.mubr.msk.f32.mxu0 %vm632_vm6, %v15719_v20  ;;  %v15819_v40 = vadd.f32 %v2596_v23, %v15642_v47  ;;  %v15839_v47 = vld [vmem:[%s18905_s2 + $0x180] sm:$0xff] }
 0x2a3   : > { %v15822_v7 = vadd.f32 %v2681_v57, %v15645_v6  ;;  %v2600_v50 = vpop.f32.mrf.mxu0  ;;  %13678 = vmatmul.mubr.msk.f32.gmra.mxu0 %vm632_vm6, %v15744_v16 }
 0x2a4   : > { %v2847_v32 = vpop.f32.mrf.mxu1  ;;  %13034 = vmatmul.mubr.msk.f32.gmra.mxu1 %vm632_vm6, %v15719_v20  ;;  %v15829_v34 = vadd.f32 %v2600_v50, %v15652_v9  ;;  %5962 = vmatprep.mubr.f32.mxu0 %v18931_v27 }
 0x2a5   : > { %v15832_v1 = vadd.f32 %v2847_v32, %v15655_v31  ;;  %5711 = vmatprep.mubr.f32.mxu1 %v18931_v27  ;;  %v2602_v6 = vpop.f32.mrf.mxu0  ;;  %v5869_v31 = vsel %vm5864_vm1, %v18946_v29, %v18952_v2  ;;  %v15868_v29 = vld [vmem:[%s18905_s2 + $0x188] sm:$0xff]  ;;  %vm12087_vm1 = vcmask 277504  }
 0x2a6   : > { %v2849_v20 = vpop.f32.mrf.mxu1  ;;  %v15842_v3 = vadd.f32 %v2602_v6, %v15665_v28  ;;  %v6310_v6 = vpop.permute.xlu1 %6309 }
 0x2a7   : > { %v15845_v9 = vadd.f32 %v2849_v20, %v15668_v4  ;;  %v2936_v53 = vpop.f32.mrf.mxu0  ;;  %13047 = vmatmul.mubr.msk.f32.vlgmr.msra.gmra.mxu0 %vm632_vm6, %v15839_v47  ;;  %v6315_v4 = vsel %vm6311_vm3, %v15298_v11, %v15313_v25 }
 0x2a8   : > { %v2853_v15 = vpop.f32.mrf.mxu1  ;;  %13035 = vmatmul.mubr.msk.f32.gmra.mxu1 %vm632_vm6, %v15744_v16  ;;  %v15858_v28 = vadd.f32 %v2936_v53, %v15681_v24  ;;  %13058 = vmatpush1.msk.msra.mxu0 %vm587_vm2, %v5869_v31 }
 0x2a9   : > { %v15855_v5 = vadd.f32 %v2853_v15, %v15678_v46  ;;  %5968 = vmatprep.mubr.f32.mxu0 %v18931_v27  ;;  %13078 = vmatprep.subr.msk.mxu0 %vm587_vm2, %v6315_v4  ;;  %v2938_v16 = vpop.f32.mrf.mxu0 }
 0x2aa   : > { %v2855_v46 = vpop.f32.mrf.mxu1  ;;  %6051 = vmatprep.mubr.f32.mxu1 %v18931_v27  ;;  %v15876_v54 = vadd.f32 %v2938_v16, %v15699_v10  ;;  %v15896_v10 = vld [vmem:[%s18905_s2 + $0x190] sm:$0xff] }
 0x2ab   : > { %v15873_v24 = vadd.f32 %v2855_v46, %v15696_v26  ;;  %v2942_v14 = vpop.f32.mrf.mxu0  ;;  %13048 = vmatmul.mubr.msk.f32.gmra.mxu0 %vm632_vm6, %v15868_v29  ;;  %v6313_v26 = vsel %vm6311_vm3, %v15249_v45, %v15266_v35  ;;  %v6312_v46 = vsel %vm6311_vm3, %v15347_v61, %v15249_v45 }
 0x2ac   : > { %v2859_v41 = vpop.f32.mrf.mxu1  ;;  %13053 = vmatmul.mubr.msk.f32.vlgmr.msra.gmra.mxu1 %vm632_vm6, %v15839_v47  ;;  %v15886_v33 = vadd.f32 %v2942_v14, %v15709_v39  ;;  %5974 = vmatprep.mubr.f32.mxu0 %v18931_v27  ;;  %v6308_v39 = vpop.permute.xlu0 %6307 }
 0x2ad   : > { %v15883_v52 = vadd.f32 %v2859_v41, %v15706_v43  ;;  %13681 = vmatpush3.msk.msra.mxu1 %vm587_vm2, %v5871_v56  ;;  %v2944_v17 = vpop.f32.mrf.mxu0  ;;  %6057 = vmatprep.mubr.f32.mxu1 %v18931_v27  ;;  %v6317_v45 = vsel %vm6311_vm3, %v15910_v0, %v6308_v39 }
 0x2ae   : > { %13072 = vmatprep.subr.msk.mxu1 %vm587_vm2, %v6313_v26  ;;  %v2861_v43 = vpop.f32.mrf.mxu1  ;;  %v15904_v60 = vadd.f32 %v2944_v17, %v15727_v55 }
 0x2af   : > { %v15901_v56 = vadd.f32 %v2861_v43, %v15724_v18  ;;  %v2948_v38 = vpop.f32.mrf.mxu0  ;;  %13049 = vmatmul.mubr.msk.f32.gmra.mxu0 %vm632_vm6, %v15896_v10  ;;  %v15923_v18 = vld [vmem:[%s18905_s2 + $0x198] sm:$0xff] }
 0x2b0   : > { %v2865_v19 = vpop.f32.mrf.mxu1  ;;  %13054 = vmatmul.mubr.msk.f32.gmra.mxu1 %vm632_vm6, %v15868_v29  ;;  %v15916_v8 = vadd.f32 %v2948_v38, %v15737_v48  ;;  %5980 = vmatprep.mubr.f32.mxu0 %v18931_v27  ;;  %v15935_v57 = vpop.permute.xlu0 %6744 }
 0x2b1   : > { %v15913_v44 = vadd.f32 %v2865_v19, %v15734_v30  ;;  %6063 = vmatprep.mubr.f32.mxu1 %v18931_v27  ;;  %v2950_v2 = vpop.f32.mrf.mxu0 }
 0x2b2   : > { %v2867_v55 = vpop.f32.mrf.mxu1  ;;  %v15929_v30 = vadd.f32 %v2950_v2, %v15750_v62 }
 0x2b3   : > { %v15926_v37 = vadd.f32 %v2867_v55, %v15747_v12  ;;  %v2954_v23 = vpop.f32.mrf.mxu0  ;;  %13050 = vmatmul.mubr.msk.f32.gmra.mxu0 %vm632_vm6, %v15923_v18 }
 0x2b4   : > { %v3025_v48 = vpop.f32.mrf.mxu1  ;;  %13055 = vmatmul.mubr.msk.f32.gmra.mxu1 %vm632_vm6, %v15896_v10  ;;  %v15938_v50 = vadd.f32 %v2954_v23, %v15757_v36  ;;  %6140 = vmatprep.mubr.f32.mxu0 %v18931_v27  ;;  %v6314_v36 = vsel %vm6311_vm3, %v15266_v35, %v15298_v11 }
 0x2b5   : > { %v15941_v32 = vadd.f32 %v3025_v48, %v15760_v63  ;;  %6069 = vmatprep.mubr.f32.mxu1 %v18931_v27  ;;  %v2956_v12 = vpop.f32.mrf.mxu0 }
 0x2b6   : > { %v3027_v62 = vpop.f32.mrf.mxu1  ;;  %v15946_v20 = vadd.f32 %v2956_v12, %v15765_v51 }
 0x2b7   : > { %v15949_v31 = vadd.f32 %v3027_v62, %v15768_v22  ;;  %v13628_v63 = vpop.f32.mrf.mxu0  ;;  %13059 = vmatmul.mubr.msk.f32.vlgmr.msra.gmra.mxu0 %vm632_vm6, %v15839_v47  ;;  %v15966_v22 = vsel %vm6311_vm3, %v6308_v39, %v6310_v6 }
 0x2b8   : > { %v3031_v15 = vpop.f32.mrf.mxu1  ;;  %13056 = vmatmul.mubr.msk.f32.gmra.mxu1 %vm632_vm6, %v15923_v18  ;;  %v15962_v51 = vadd.f32 %v13628_v63, %v15781_v21  ;;  %13079 = vmatpush1.msk.msra.mxu0 %vm587_vm2, %v6314_v36 }
 0x2b9   : > { %v15959_v53 = vadd.f32 %v3031_v15, %v15778_v58  ;;  %6146 = vmatprep.mubr.f32.mxu0 %v18931_v27  ;;  %13688 = vmatprep.subr.msk.mxu0 %vm587_vm2, %v15966_v22  ;;  %v3114_v11 = vpop.f32.mrf.mxu0  ;;  %v15973_v58 = vpop.permute.xlu0 %6742 }
 0x2ba   : > { %v3033_v35 = vpop.f32.mrf.mxu1  ;;  %13682 = vmatprep.mubr.msk.f32.mxu1 %vm632_vm6, %v15839_v47  ;;  %v15979_v4 = vadd.f32 %v3114_v11, %v15795_v42  ;;  %v15988_v47 = vpop.permute.xlu1 %6746 }
 0x2bb   : > { %v15976_v21 = vadd.f32 %v3033_v35, %v15792_v13  ;;  %v13631_v41 = vpop.f32.mrf.mxu0  ;;  %13060 = vmatmul.mubr.msk.f32.gmra.mxu0 %vm632_vm6, %v15868_v29  ;;  %v6760_v62 = vsel %vm6758_vm4, %v15935_v57, %v15988_v47 }
 0x2bc   : > { %v3037_v16 = vpop.f32.mrf.mxu1  ;;  %13683 = vmatmul.mubr.msk.f32.vlgmr.msra.gmra.mxu1 %vm632_vm6, %v15868_v29  ;;  %v15994_v42 = vadd.f32 %v13631_v41, %v15808_v59  ;;  %6152 = vmatprep.mubr.f32.mxu0 %v18931_v27 }
 0x2bd   : > { %v15991_v13 = vadd.f32 %v3037_v16, %v15805_v49  ;;  %13073 = vmatpush1.msk.msra.mxu1 %vm587_vm2, %v6312_v46  ;;  %v3124_v14 = vpop.f32.mrf.mxu0  ;;  %13685 = vmatprep.mubr.msk.f32.mxu1 %vm632_vm6, %v15896_v10  ;;  %v16013_v43 = vpop.permute.xlu0 %6750 }
 0x2be   : > { %13084 = vmatprep.subr.msk.mxu1 %vm587_vm2, %v6317_v45  ;;  %v3039_v61 = vpop.f32.mrf.mxu1  ;;  %v16007_v59 = vadd.f32 %v3124_v14, %v15822_v7  ;;  %v16028_v19 = vpop.permute.xlu1 %6748 }
 0x2bf   : > { %v16004_v49 = vadd.f32 %v3039_v61, %v15819_v40  ;;  %v3290_v26 = vpop.f32.mrf.mxu0  ;;  %13061 = vmatmul.mubr.msk.f32.gmra.mxu0 %vm632_vm6, %v15896_v10  ;;  %v16026_v40 = vld [vmem:[%s18905_s2 + $0x1a0] sm:$0xff] }
 0x2c0   : > { %v3043_v29 = vpop.f32.mrf.mxu1  ;;  %13686 = vmatmul.mubr.msk.f32.gmra.mxu1 %vm632_vm6, %v15923_v18  ;;  %v16019_v39 = vadd.f32 %v3290_v26, %v15832_v1  ;;  %6158 = vmatprep.mubr.f32.mxu0 %v18931_v27  ;;  %v6316_v1 = vsel %vm6311_vm3, %v15313_v25, %v15910_v0  ;;  %v16057_v25 = vld [vmem:[%s18905_s2 + $0x1a8] sm:$0xff] }
 0x2c1   : > { %v16016_v17 = vadd.f32 %v3043_v29, %v15829_v34  ;;  %6409 = vmatprep.mubr.f32.mxu1 %v18931_v27  ;;  %v3292_v10 = vpop.f32.mrf.mxu0  ;;  %v6755_v41 = vpop.permute.xlu0 %6754 }
 0x2c2   : > { %v3045_v7 = vpop.f32.mrf.mxu1  ;;  %v16034_v34 = vadd.f32 %v3292_v10, %v15845_v9  ;;  %v16100_v35 = vpop.permute.xlu1 %6752 }
 0x2c3   : > { %v16031_v38 = vadd.f32 %v3045_v7, %v15842_v3  ;;  %v3296_v55 = vpop.f32.mrf.mxu0  ;;  %13062 = vmatmul.mubr.msk.f32.gmra.mxu0 %vm632_vm6, %v15923_v18  ;;  %v6762_v3 = vsel %vm6758_vm4, %v16028_v19, %v16013_v43 }
 0x2c4   : > { %v3379_v2 = vpop.f32.mrf.mxu1  ;;  %13074 = vmatmul.mubr.msk.f32.vlgmr.msra.gmra.mxu1 %vm632_vm6, %v16026_v40  ;;  %v16047_v9 = vadd.f32 %v3296_v55, %v15855_v5  ;;  %6498 = vmatprep.mubr.f32.mxu0 %v18931_v27 }
 0x2c5   : > { %v16050_v23 = vadd.f32 %v3379_v2, %v15858_v28  ;;  %13085 = vmatpush1.msk.msra.mxu1 %vm587_vm2, %v6316_v1  ;;  %6415 = vmatprep.mubr.f32.mxu1 %v18931_v27  ;;  %v3298_v0 = vpop.f32.mrf.mxu0 }
 0x2c6   : > { %13105 = vmatprep.subr.msk.mxu1 %vm587_vm2, %v6762_v3  ;;  %v3381_v18 = vpop.f32.mrf.mxu1  ;;  %v16062_v5 = vadd.f32 %v3298_v0, %v15873_v24  ;;  %v6757_v26 = vpop.permute.xlu1 %6756 }
 0x2c7   : > { %v16065_v28 = vadd.f32 %v3381_v18, %v15876_v54  ;;  %v3302_v48 = vpop.f32.mrf.mxu0  ;;  %13080 = vmatmul.mubr.msk.f32.vlgmr.msra.gmra.mxu0 %vm632_vm6, %v16026_v40  ;;  %v16086_v54 = vld [vmem:[%s18905_s2 + $0x1b0] sm:$0xff]  ;;  %v16147_v55 = vsel %vm6758_vm4, %v6755_v41, %v6757_v26 }
 0x2c8   : > { %v3385_v12 = vpop.f32.mrf.mxu1  ;;  %13075 = vmatmul.mubr.msk.f32.gmra.mxu1 %vm632_vm6, %v16057_v25  ;;  %v16075_v6 = vadd.f32 %v3302_v48, %v15883_v52  ;;  %13689 = vmatpush3.msk.msra.mxu0 %vm587_vm2, %v15966_v22 }
 0x2c9   : > { %v16078_v24 = vadd.f32 %v3385_v12, %v15886_v33  ;;  %6421 = vmatprep.mubr.f32.mxu1 %v18931_v27  ;;  %13099 = vmatprep.subr.msk.mxu0 %vm587_vm2, %v6760_v62  ;;  %v3304_v36 = vpop.f32.mrf.mxu0 }
 0x2ca   : > { %v3387_v15 = vpop.f32.mrf.mxu1  ;;  %6504 = vmatprep.mubr.f32.mxu0 %v18931_v27  ;;  %v16091_v52 = vadd.f32 %v3304_v36, %v15901_v56  ;;  %v16113_v56 = vld [vmem:[%s18905_s2 + $0x1b8] sm:$0xff] }
 0x2cb   : > { %v16094_v33 = vadd.f32 %v3387_v15, %v15904_v60  ;;  %v3308_v63 = vpop.f32.mrf.mxu0  ;;  %13081 = vmatmul.mubr.msk.f32.gmra.mxu0 %vm632_vm6, %v16057_v25 }
 0x2cc   : > { %v3391_v22 = vpop.f32.mrf.mxu1  ;;  %13076 = vmatmul.mubr.msk.f32.gmra.mxu1 %vm632_vm6, %v16086_v54  ;;  %v16103_v11 = vadd.f32 %v3308_v63, %v15913_v44  ;;  %6510 = vmatprep.mubr.f32.mxu0 %v18931_v27 }
 0x2cd   : > { %v16106_v46 = vadd.f32 %v3391_v22, %v15916_v8  ;;  %6427 = vmatprep.mubr.f32.mxu1 %v18931_v27  ;;  %v3310_v60 = vpop.f32.mrf.mxu0 }
 0x2ce   : > { %v3393_v16 = vpop.f32.mrf.mxu1  ;;  %v16116_v45 = vadd.f32 %v3310_v60, %v15926_v37 }
 0x2cf   : > { %v16119_v44 = vadd.f32 %v3393_v16, %v15929_v30  ;;  %v3468_v61 = vpop.f32.mrf.mxu0  ;;  %13082 = vmatmul.mubr.msk.f32.gmra.mxu0 %vm632_vm6, %v16086_v54 }
 0x2d0   : > { %v3397_v8 = vpop.f32.mrf.mxu1  ;;  %13077 = vmatmul.mubr.msk.f32.gmra.mxu1 %vm632_vm6, %v16113_v56  ;;  %v16129_v29 = vadd.f32 %v3468_v61, %v15941_v32  ;;  %6516 = vmatprep.mubr.f32.mxu0 %v18931_v27 }
 0x2d1   : > { %v16126_v14 = vadd.f32 %v3397_v8, %v15938_v50  ;;  %6587 = vmatprep.mubr.f32.mxu1 %v18931_v27  ;;  %v3470_v30 = vpop.f32.mrf.mxu0  ;;  %v6761_v50 = vsel %vm6758_vm4, %v15988_v47, %v16028_v19 }
 0x2d2   : > { %v3399_v37 = vpop.f32.mrf.mxu1  ;;  %v16137_v10 = vadd.f32 %v3470_v30, %v15949_v31 }
 0x2d3   : > { %v16134_v7 = vadd.f32 %v3399_v37, %v15946_v20  ;;  %v3474_v1 = vpop.f32.mrf.mxu0  ;;  %13083 = vmatmul.mubr.msk.f32.gmra.mxu0 %vm632_vm6, %v16113_v56  ;;  %v16149_v20 = vpop.permute.xlu0 %7191 }
 0x2d4   : > { %v13636_v32 = vpop.f32.mrf.mxu1  ;;  %13086 = vmatmul.mubr.msk.f32.vlgmr.msra.gmra.mxu1 %vm632_vm6, %v16026_v40  ;;  %v16152_v31 = vadd.f32 %v3474_v1, %v15959_v53  ;;  %13690 = vmatprep.mubr.msk.f32.mxu0 %vm632_vm6, %v16026_v40  ;;  %v6764_v40 = vsel %vm6758_vm4, %v16100_v35, %v6755_v41 }
 0x2d5   : > { %v16155_v2 = vadd.f32 %v13636_v32, %v15962_v51  ;;  %13106 = vmatpush1.msk.msra.mxu1 %vm587_vm2, %v6761_v50  ;;  %6593 = vmatprep.mubr.f32.mxu1 %v18931_v27  ;;  %v3476_v47 = vpop.f32.mrf.mxu0  ;;  %v6759_v51 = vsel %vm6758_vm4, %v15973_v58, %v15935_v57 }
 0x2d6   : > { %13696 = vmatprep.subr.msk.mxu1 %vm587_vm2, %v16147_v55  ;;  %v3557_v19 = vpop.f32.mrf.mxu1  ;;  %v16164_v3 = vadd.f32 %v3476_v47, %v15976_v21  ;;  %v16178_v21 = vpop.permute.xlu1 %7193 }
 0x2d7   : > { %v16167_v53 = vadd.f32 %v3557_v19, %v15979_v4  ;;  %v3480_v0 = vpop.f32.mrf.mxu0  ;;  %13691 = vmatmul.mubr.msk.f32.vlgmr.msra.gmra.mxu0 %vm632_vm6, %v16057_v25  ;;  %v7207_v30 = vsel %vm7205_vm5, %v16149_v20, %v16178_v21 }
 0x2d8   : > { %v13639_v18 = vpop.f32.mrf.mxu1  ;;  %13087 = vmatmul.mubr.msk.f32.gmra.mxu1 %vm632_vm6, %v16057_v25  ;;  %v16181_v4 = vadd.f32 %v3480_v0, %v15991_v13  ;;  %13100 = vmatpush1.msk.msra.mxu0 %vm587_vm2, %v6759_v51  ;;  %v16191_v25 = vpop.permute.xlu0 %7195 }
 0x2d9   : > { %v16184_v48 = vadd.f32 %v13639_v18, %v15994_v42  ;;  %6599 = vmatprep.mubr.f32.mxu1 %v18931_v27  ;;  %13111 = vmatprep.subr.msk.mxu0 %vm587_vm2, %v6764_v40  ;;  %v3482_v57 = vpop.f32.mrf.mxu0 }
 0x2da   : > { %v3567_v58 = vpop.f32.mrf.mxu1  ;;  %13693 = vmatprep.mubr.msk.f32.mxu0 %vm632_vm6, %v16086_v54  ;;  %v16194_v12 = vadd.f32 %v3482_v57, %v16004_v49  ;;  %v16214_v49 = vld [vmem:[%s18905_s2 + $0x1c0] sm:$0xff]  ;;  %v16216_v63 = vpop.permute.xlu1 %7197 }
 0x2db   : > { %v16197_v13 = vadd.f32 %v3567_v58, %v16007_v59  ;;  %v3486_v42 = vpop.f32.mrf.mxu0  ;;  %13694 = vmatmul.mubr.msk.f32.gmra.mxu0 %vm632_vm6, %v16113_v56 }
 0x2dc   : > { %v3733_v62 = vpop.f32.mrf.mxu1  ;;  %13088 = vmatmul.mubr.msk.f32.gmra.mxu1 %vm632_vm6, %v16086_v54  ;;  %v16204_v36 = vadd.f32 %v3486_v42, %v16016_v17  ;;  %6856 = vmatprep.mubr.f32.mxu0 %v18931_v27  ;;  %v16234_v41 = vpop.permute.xlu0 %7189 }
 0x2dd   : > { %v16207_v15 = vadd.f32 %v3733_v62, %v16019_v39  ;;  %6605 = vmatprep.mubr.f32.mxu1 %v18931_v27  ;;  %v3488_v59 = vpop.f32.mrf.mxu0  ;;  %v6763_v39 = vsel %vm6758_vm4, %v16013_v43, %v16100_v35  ;;  %v16247_v35 = vld [vmem:[%s18905_s2 + $0x1c8] sm:$0xff] }
 0x2de   : > { %v3735_v54 = vpop.f32.mrf.mxu1  ;;  %v16219_v22 = vadd.f32 %v3488_v59, %v16031_v38  ;;  %v7209_v38 = vsel %vm7205_vm5, %v16191_v25, %v16216_v63  ;;  %v16290_v19 = vpop.permute.xlu1 %7199 }
 0x2df   : > { %v16222_v17 = vadd.f32 %v3735_v54, %v16034_v34  ;;  %v3822_v16 = vpop.f32.mrf.mxu0  ;;  %13101 = vmatmul.mubr.msk.f32.vlgmr.msra.gmra.mxu0 %vm632_vm6, %v16214_v49 }
 0x2e0   : > { %v3739_v60 = vpop.f32.mrf.mxu1  ;;  %13089 = vmatmul.mubr.msk.f32.gmra.mxu1 %vm632_vm6, %v16113_v56  ;;  %v16240_v43 = vadd.f32 %v3822_v16, %v16050_v23  ;;  %13112 = vmatpush1.msk.msra.mxu0 %vm587_vm2, %v6763_v39 }
 0x2e1   : > { %v16237_v34 = vadd.f32 %v3739_v60, %v16047_v9  ;;  %6862 = vmatprep.mubr.f32.mxu0 %v18931_v27  ;;  %13132 = vmatprep.subr.msk.mxu0 %vm587_vm2, %v7209_v38  ;;  %v3824_v8 = vpop.f32.mrf.mxu0 }
 0x2e2   : > { %v3741_v56 = vpop.f32.mrf.mxu1  ;;  %6945 = vmatprep.mubr.f32.mxu1 %v18931_v27  ;;  %v16255_v23 = vadd.f32 %v3824_v8, %v16065_v28  ;;  %v16276_v28 = vld [vmem:[%s18905_s2 + $0x1d0] sm:$0xff]  ;;  %v7204_v59 = vpop.permute.xlu1 %7203 }
 0x2e3   : > { %v16252_v9 = vadd.f32 %v3741_v56, %v16062_v5  ;;  %v3828_v37 = vpop.f32.mrf.mxu0  ;;  %13102 = vmatmul.mubr.msk.f32.gmra.mxu0 %vm632_vm6, %v16247_v35  ;;  %v7206_v56 = vsel %vm7205_vm5, %v16234_v41, %v16149_v20 }
 0x2e4   : > { %v3745_v61 = vpop.f32.mrf.mxu1  ;;  %13107 = vmatmul.mubr.msk.f32.vlgmr.msra.gmra.mxu1 %vm632_vm6, %v16214_v49  ;;  %v16268_v5 = vadd.f32 %v3828_v37, %v16078_v24  ;;  %6868 = vmatprep.mubr.f32.mxu0 %v18931_v27 }
 0x2e5   : > { %v16265_v26 = vadd.f32 %v3745_v61, %v16075_v6  ;;  %13697 = vmatpush3.msk.msra.mxu1 %vm587_vm2, %v16147_v55  ;;  %v3830_v1 = vpop.f32.mrf.mxu0  ;;  %6951 = vmatprep.mubr.f32.mxu1 %v18931_v27  ;;  %v7202_v6 = vpop.permute.xlu0 %7201 }
 0x2e6   : > { %13126 = vmatprep.subr.msk.mxu1 %vm587_vm2, %v7207_v30  ;;  %v3747_v50 = vpop.f32.mrf.mxu1  ;;  %v16284_v32 = vadd.f32 %v3830_v1, %v16094_v33  ;;  %v16339_v16 = vsel %vm7205_vm5, %v7202_v6, %v7204_v59 }
 0x2e7   : > { %v16281_v24 = vadd.f32 %v3747_v50, %v16091_v52  ;;  %v3834_v47 = vpop.f32.mrf.mxu0  ;;  %13103 = vmatmul.mubr.msk.f32.gmra.mxu0 %vm632_vm6, %v16276_v28  ;;  %v16303_v52 = vld [vmem:[%s18905_s2 + $0x1d8] sm:$0xff] }
 0x2e8   : > { %v3751_v55 = vpop.f32.mrf.mxu1  ;;  %13108 = vmatmul.mubr.msk.f32.gmra.mxu1 %vm632_vm6, %v16247_v35  ;;  %v16296_v0 = vadd.f32 %v3834_v47, %v16106_v46  ;;  %6874 = vmatprep.mubr.f32.mxu0 %v18931_v27 }
 0x2e9   : > { %v16293_v51 = vadd.f32 %v3751_v55, %v16103_v11  ;;  %6957 = vmatprep.mubr.f32.mxu1 %v18931_v27  ;;  %v3836_v18 = vpop.f32.mrf.mxu0  ;;  %v16315_v58 = vpop.permute.xlu0 %7638 }
 0x2ea   : > { %v3753_v33 = vpop.f32.mrf.mxu1  ;;  %v16309_v11 = vadd.f32 %v3836_v18, %v16119_v44 }
 0x2eb   : > { %v16306_v40 = vadd.f32 %v3753_v33, %v16116_v45  ;;  %v3840_v57 = vpop.f32.mrf.mxu0  ;;  %13104 = vmatmul.mubr.msk.f32.gmra.mxu0 %vm632_vm6, %v16303_v52 }
 0x2ec   : > { %v3911_v46 = vpop.f32.mrf.mxu1  ;;  %13109 = vmatmul.mubr.msk.f32.gmra.mxu1 %vm632_vm6, %v16276_v28  ;;  %v16318_v42 = vadd.f32 %v3840_v57, %v16126_v14  ;;  %7034 = vmatprep.mubr.f32.mxu0 %v18931_v27  ;;  %v7208_v14 = vsel %vm7205_vm5, %v16178_v21, %v16191_v25 }
 0x2ed   : > { %v16321_v62 = vadd.f32 %v3911_v46, %v16129_v29  ;;  %6963 = vmatprep.mubr.f32.mxu1 %v18931_v27  ;;  %v3842_v45 = vpop.f32.mrf.mxu0  ;;  %v16353_v38 = vpop.permute.xlu0 %7636 }
 0x2ee   : > { %v3913_v44 = vpop.f32.mrf.mxu1  ;;  %v16326_v54 = vadd.f32 %v3842_v45, %v16134_v7 }
 0x2ef   : > { %v16329_v39 = vadd.f32 %v3913_v44, %v16137_v10  ;;  %v13644_v29 = vpop.f32.mrf.mxu0  ;;  %13113 = vmatmul.mubr.msk.f32.vlgmr.msra.gmra.mxu0 %vm632_vm6, %v16214_v49 }
 0x2f0   : > { %v3917_v60 = vpop.f32.mrf.mxu1  ;;  %13110 = vmatmul.mubr.msk.f32.gmra.mxu1 %vm632_vm6, %v16303_v52  ;;  %v16345_v10 = vadd.f32 %v13644_v29, %v16155_v2  ;;  %13133 = vmatpush1.msk.msra.mxu0 %vm587_vm2, %v7208_v14 }
 0x2f1   : > { %v16342_v7 = vadd.f32 %v3917_v60, %v16152_v31  ;;  %7040 = vmatprep.mubr.f32.mxu0 %v18931_v27  ;;  %13704 = vmatprep.subr.msk.mxu0 %vm587_vm2, %v16339_v16  ;;  %v4000_v25 = vpop.f32.mrf.mxu0  ;;  %v16393_v50 = vpop.permute.xlu0 %7644 }
 0x2f2   : > { %v3919_v21 = vpop.f32.mrf.mxu1  ;;  %13698 = vmatprep.mubr.msk.f32.mxu1 %vm632_vm6, %v16214_v49  ;;  %v16359_v2 = vadd.f32 %v4000_v25, %v16167_v53  ;;  %v7211_v49 = vsel %vm7205_vm5, %v16290_v19, %v7202_v6 }
 0x2f3   : > { %v16356_v31 = vadd.f32 %v3919_v21, %v16164_v3  ;;  %v13647_v61 = vpop.f32.mrf.mxu0  ;;  %13114 = vmatmul.mubr.msk.f32.gmra.mxu0 %vm632_vm6, %v16247_v35  ;;  %v16370_v3 = vpop.permute.xlu1 %7640 }
 0x2f4   : > { %v3923_v8 = vpop.f32.mrf.mxu1  ;;  %13699 = vmatmul.mubr.msk.f32.vlgmr.msra.gmra.mxu1 %vm632_vm6, %v16247_v35  ;;  %v16376_v37 = vadd.f32 %v13647_v61, %v16184_v48  ;;  %7046 = vmatprep.mubr.f32.mxu0 %v18931_v27  ;;  %v7654_v44 = vsel %vm7652_vm7, %v16315_v58, %v16370_v3 }
 0x2f5   : > { %v16373_v53 = vadd.f32 %v3923_v8, %v16181_v4  ;;  %13127 = vmatpush1.msk.msra.mxu1 %vm587_vm2, %v7206_v56  ;;  %v4010_v41 = vpop.f32.mrf.mxu0  ;;  %13701 = vmatprep.mubr.msk.f32.mxu1 %vm632_vm6, %v16276_v28  ;;  %v7649_v61 = vpop.permute.xlu0 %7648 }
 0x2f6   : > { %13138 = vmatprep.subr.msk.mxu1 %vm587_vm2, %v7211_v49  ;;  %v3925_v20 = vpop.f32.mrf.mxu1  ;;  %v16387_v4 = vadd.f32 %v4010_v41, %v16197_v13 }
 0x2f7   : > { %v16384_v35 = vadd.f32 %v3925_v20, %v16194_v12  ;;  %v4176_v48 = vpop.f32.mrf.mxu0  ;;  %13115 = vmatmul.mubr.msk.f32.gmra.mxu0 %vm632_vm6, %v16276_v28  ;;  %v16406_v12 = vld [vmem:[%s18905_s2 + $0x1e0] sm:$0xff]  ;;  %v16408_v55 = vpop.permute.xlu1 %7642 }
 0x2f8   : > { %v3929_v30 = vpop.f32.mrf.mxu1  ;;  %13702 = vmatmul.mubr.msk.f32.gmra.mxu1 %vm632_vm6, %v16303_v52  ;;  %v16399_v6 = vadd.f32 %v4176_v48, %v16207_v15  ;;  %7052 = vmatprep.mubr.f32.mxu0 %v18931_v27  ;;  %v7210_v15 = vsel %vm7205_vm5, %v16216_v63, %v16290_v19  ;;  %v16437_v63 = vld [vmem:[%s18905_s2 + $0x1e8] sm:$0xff] }
 0x2f9   : > { %v16396_v1 = vadd.f32 %v3929_v30, %v16204_v36  ;;  %7303 = vmatprep.mubr.f32.mxu1 %v18931_v27  ;;  %v4178_v28 = vpop.f32.mrf.mxu0 }
 0x2fa   : > { %v3931_v13 = vpop.f32.mrf.mxu1  ;;  %v16414_v36 = vadd.f32 %v4178_v28, %v16222_v17 }
 0x2fb   : > { %v16411_v47 = vadd.f32 %v3931_v13, %v16219_v22  ;;  %v4182_v33 = vpop.f32.mrf.mxu0  ;;  %13116 = vmatmul.mubr.msk.f32.gmra.mxu0 %vm632_vm6, %v16303_v52  ;;  %v7656_v22 = vsel %vm7652_vm7, %v16408_v55, %v16393_v50  ;;  %v16480_v21 = vpop.permute.xlu1 %7646 }
 0x2fc   : > { %v4265_v18 = vpop.f32.mrf.mxu1  ;;  %13128 = vmatmul.mubr.msk.f32.vlgmr.msra.gmra.mxu1 %vm632_vm6, %v16406_v12  ;;  %v16427_v17 = vadd.f32 %v4182_v33, %v16237_v34  ;;  %7392 = vmatprep.mubr.f32.mxu0 %v18931_v27 }
 0x2fd   : > { %v16430_v57 = vadd.f32 %v4265_v18, %v16240_v43  ;;  %13139 = vmatpush1.msk.msra.mxu1 %vm587_vm2, %v7210_v15  ;;  %7309 = vmatprep.mubr.f32.mxu1 %v18931_v27  ;;  %v4184_v19 = vpop.f32.mrf.mxu0 }
 0x2fe   : > { %13159 = vmatprep.subr.msk.mxu1 %vm587_vm2, %v7656_v22  ;;  %v4267_v52 = vpop.f32.mrf.mxu1  ;;  %v16442_v34 = vadd.f32 %v4184_v19, %v16252_v9 }
 0x2ff   : > { %v16445_v43 = vadd.f32 %v4267_v52, %v16255_v23  ;;  %v4188_v46 = vpop.f32.mrf.mxu0  ;;  %13134 = vmatmul.mubr.msk.f32.vlgmr.msra.gmra.mxu0 %vm632_vm6, %v16406_v12  ;;  %v16466_v23 = vld [vmem:[%s18905_s2 + $0x1f0] sm:$0xff]  ;;  %v7651_v48 = vpop.permute.xlu1 %7650 }
 0x300   : > { %v4271_v45 = vpop.f32.mrf.mxu1  ;;  %13129 = vmatmul.mubr.msk.f32.gmra.mxu1 %vm632_vm6, %v16437_v63  ;;  %v16455_v59 = vadd.f32 %v4188_v46, %v16265_v26  ;;  %13705 = vmatpush3.msk.msra.mxu0 %vm587_vm2, %v16339_v16  ;;  %v16527_v33 = vsel %vm7652_vm7, %v7649_v61, %v7651_v48 }
 0x301   : > { %v16458_v9 = vadd.f32 %v4271_v45, %v16268_v5  ;;  %7315 = vmatprep.mubr.f32.mxu1 %v18931_v27  ;;  %13153 = vmatprep.subr.msk.mxu0 %vm587_vm2, %v7654_v44  ;;  %v4190_v14 = vpop.f32.mrf.mxu0 }
 0x302   : > { %v4273_v60 = vpop.f32.mrf.mxu1  ;;  %7398 = vmatprep.mubr.f32.mxu0 %v18931_v27  ;;  %v16471_v26 = vadd.f32 %v4190_v14, %v16281_v24  ;;  %v16493_v24 = vld [vmem:[%s18905_s2 + $0x1f8] sm:$0xff] }
 0x303   : > { %v16474_v5 = vadd.f32 %v4273_v60, %v16284_v32  ;;  %v4194_v29 = vpop.f32.mrf.mxu0  ;;  %13135 = vmatmul.mubr.msk.f32.gmra.mxu0 %vm632_vm6, %v16437_v63 }
 0x304   : > { %v4277_v16 = vpop.f32.mrf.mxu1  ;;  %13130 = vmatmul.mubr.msk.f32.gmra.mxu1 %vm632_vm6, %v16466_v23  ;;  %v16483_v25 = vadd.f32 %v4194_v29, %v16293_v51  ;;  %7404 = vmatprep.mubr.f32.mxu0 %v18931_v27 }
 0x305   : > { %v16486_v56 = vadd.f32 %v4277_v16, %v16296_v0  ;;  %7321 = vmatprep.mubr.f32.mxu1 %v18931_v27  ;;  %v4196_v32 = vpop.f32.mrf.mxu0 }
 0x306   : > { %v4279_v8 = vpop.f32.mrf.mxu1  ;;  %v16496_v49 = vadd.f32 %v4196_v32, %v16306_v40 }
 0x307   : > { %v16499_v51 = vadd.f32 %v4279_v8, %v16309_v11  ;;  %v4354_v20 = vpop.f32.mrf.mxu0  ;;  %13136 = vmatmul.mubr.msk.f32.gmra.mxu0 %vm632_vm6, %v16466_v23 }
 0x308   : > { %v4283_v0 = vpop.f32.mrf.mxu1  ;;  %13131 = vmatmul.mubr.msk.f32.gmra.mxu1 %vm632_vm6, %v16493_v24  ;;  %v16509_v30 = vadd.f32 %v4354_v20, %v16321_v62  ;;  %7410 = vmatprep.mubr.f32.mxu0 %v18931_v27 }
 0x309   : > { %v16506_v41 = vadd.f32 %v4283_v0, %v16318_v42  ;;  %7481 = vmatprep.mubr.f32.mxu1 %v18931_v27  ;;  %v4356_v11 = vpop.f32.mrf.mxu0  ;;  %v7655_v42 = vsel %vm7652_vm7, %v16370_v3, %v16408_v55 }
 0x30a   : > { %v4285_v40 = vpop.f32.mrf.mxu1  ;;  %v16517_v28 = vadd.f32 %v4356_v11, %v16329_v39 }
 0x30b   : > { %v16514_v13 = vadd.f32 %v4285_v40, %v16326_v54  ;;  %v4360_v15 = vpop.f32.mrf.mxu0  ;;  %13137 = vmatmul.mubr.msk.f32.gmra.mxu0 %vm632_vm6, %v16493_v24  ;;  %v16529_v54 = vpop.permute.xlu0 %8085 }
 0x30c   : > { %v13652_v62 = vpop.f32.mrf.mxu1  ;;  %13140 = vmatmul.mubr.msk.f32.vlgmr.msra.gmra.mxu1 %vm632_vm6, %v16406_v12  ;;  %v16532_v39 = vadd.f32 %v4360_v15, %v16342_v7  ;;  %13706 = vmatprep.mubr.msk.f32.mxu0 %vm632_vm6, %v16406_v12  ;;  %v7658_v12 = vsel %vm7652_vm7, %v16480_v21, %v7649_v61 }
 0x30d   : > { %v16535_v18 = vadd.f32 %v13652_v62, %v16345_v10  ;;  %13160 = vmatpush1.msk.msra.mxu1 %vm587_vm2, %v7655_v42  ;;  %7487 = vmatprep.mubr.f32.mxu1 %v18931_v27  ;;  %v4362_v3 = vpop.f32.mrf.mxu0  ;;  %v7653_v10 = vsel %vm7652_vm7, %v16353_v38, %v16315_v58 }
 0x30e   : > { %13712 = vmatprep.subr.msk.mxu1 %vm587_vm2, %v16527_v33  ;;  %v4443_v55 = vpop.f32.mrf.mxu1  ;;  %v16544_v22 = vadd.f32 %v4362_v3, %v16356_v31  ;;  %v16558_v31 = vpop.permute.xlu1 %8087 }
 0x30f   : > { %v16547_v7 = vadd.f32 %v4443_v55, %v16359_v2  ;;  %v4366_v19 = vpop.f32.mrf.mxu0  ;;  %13707 = vmatmul.mubr.msk.f32.vlgmr.msra.gmra.mxu0 %vm632_vm6, %v16437_v63  ;;  %v8101_v11 = vsel %vm8099_vm8, %v16529_v54, %v16558_v31 }
 0x310   : > { %v13655_v52 = vpop.f32.mrf.mxu1  ;;  %13141 = vmatmul.mubr.msk.f32.gmra.mxu1 %vm632_vm6, %v16437_v63  ;;  %v16561_v2 = vadd.f32 %v4366_v19, %v16373_v53  ;;  %13154 = vmatpush1.msk.msra.mxu0 %vm587_vm2, %v7653_v10  ;;  %v16571_v63 = vpop.permute.xlu0 %8089 }
 0x311   : > { %v16564_v46 = vadd.f32 %v13655_v52, %v16376_v37  ;;  %7493 = vmatprep.mubr.f32.mxu1 %v18931_v27  ;;  %13165 = vmatprep.subr.msk.mxu0 %vm587_vm2, %v7658_v12  ;;  %v4368_v58 = vpop.f32.mrf.mxu0 }
 0x312   : > { %v4453_v38 = vpop.f32.mrf.mxu1  ;;  %13709 = vmatprep.mubr.msk.f32.mxu0 %vm632_vm6, %v16466_v23  ;;  %v16574_v45 = vadd.f32 %v4368_v58, %v16384_v35  ;;  %v16594_v35 = vld [vmem:[%s18905_s2 + $0x200] sm:$0xff]  ;;  %v16596_v29 = vpop.permute.xlu1 %8091 }
 0x313   : > { %v16577_v53 = vadd.f32 %v4453_v38, %v16387_v4  ;;  %v4372_v37 = vpop.f32.mrf.mxu0  ;;  %13710 = vmatmul.mubr.msk.f32.gmra.mxu0 %vm632_vm6, %v16493_v24 }
 0x314   : > { %v4623_v44 = vpop.f32.mrf.mxu1  ;;  %13142 = vmatmul.mubr.msk.f32.gmra.mxu1 %vm632_vm6, %v16466_v23  ;;  %v16584_v14 = vadd.f32 %v4372_v37, %v16396_v1  ;;  %7750 = vmatprep.mubr.f32.mxu0 %v18931_v27  ;;  %v16614_v61 = vpop.permute.xlu0 %8083 }
 0x315   : > { %v16587_v60 = vadd.f32 %v4623_v44, %v16399_v6  ;;  %7499 = vmatprep.mubr.f32.mxu1 %v18931_v27  ;;  %v4374_v4 = vpop.f32.mrf.mxu0  ;;  %v7657_v6 = vsel %vm7652_vm7, %v16393_v50, %v16480_v21  ;;  %v16627_v21 = vld [vmem:[%s18905_s2 + $0x208] sm:$0xff] }
 0x316   : > { %v4625_v23 = vpop.f32.mrf.mxu1  ;;  %v16599_v16 = vadd.f32 %v4374_v4, %v16411_v47  ;;  %v8103_v47 = vsel %vm8099_vm8, %v16571_v63, %v16596_v29  ;;  %v16670_v55 = vpop.permute.xlu1 %8093 }
 0x317   : > { %v16602_v1 = vadd.f32 %v4625_v23, %v16414_v36  ;;  %v4712_v8 = vpop.f32.mrf.mxu0  ;;  %13155 = vmatmul.mubr.msk.f32.vlgmr.msra.gmra.mxu0 %vm632_vm6, %v16594_v35 }
 0x318   : > { %v4629_v32 = vpop.f32.mrf.mxu1  ;;  %13143 = vmatmul.mubr.msk.f32.gmra.mxu1 %vm632_vm6, %v16493_v24  ;;  %v16620_v50 = vadd.f32 %v4712_v8, %v16430_v57  ;;  %13166 = vmatpush1.msk.msra.mxu0 %vm587_vm2, %v7657_v6 }
 0x319   : > { %v16617_v36 = vadd.f32 %v4629_v32, %v16427_v17  ;;  %7756 = vmatprep.mubr.f32.mxu0 %v18931_v27  ;;  %13186 = vmatprep.subr.msk.mxu0 %vm587_vm2, %v8103_v47  ;;  %v4714_v0 = vpop.f32.mrf.mxu0 }
 0x31a   : > { %v4631_v24 = vpop.f32.mrf.mxu1  ;;  %7839 = vmatprep.mubr.f32.mxu1 %v18931_v27  ;;  %v16635_v57 = vadd.f32 %v4714_v0, %v16445_v43  ;;  %v16656_v43 = vld [vmem:[%s18905_s2 + $0x210] sm:$0xff]  ;;  %v8098_v4 = vpop.permute.xlu1 %8097 }
 0x31b   : > { %v16632_v17 = vadd.f32 %v4631_v24, %v16442_v34  ;;  %v4718_v40 = vpop.f32.mrf.mxu0  ;;  %13156 = vmatmul.mubr.msk.f32.gmra.mxu0 %vm632_vm6, %v16627_v21  ;;  %v8100_v24 = vsel %vm8099_vm8, %v16614_v61, %v16529_v54 }
 0x31c   : > { %v4635_v20 = vpop.f32.mrf.mxu1  ;;  %13161 = vmatmul.mubr.msk.f32.vlgmr.msra.gmra.mxu1 %vm632_vm6, %v16594_v35  ;;  %v16648_v34 = vadd.f32 %v4718_v40, %v16458_v9  ;;  %7762 = vmatprep.mubr.f32.mxu0 %v18931_v27 }
 0x31d   : > { %v16645_v48 = vadd.f32 %v4635_v20, %v16455_v59  ;;  %13713 = vmatpush3.msk.msra.mxu1 %vm587_vm2, %v16527_v33  ;;  %v4720_v15 = vpop.f32.mrf.mxu0  ;;  %7845 = vmatprep.mubr.f32.mxu1 %v18931_v27  ;;  %v8096_v59 = vpop.permute.xlu0 %8095 }
 0x31e   : > { %13180 = vmatprep.subr.msk.mxu1 %vm587_vm2, %v8101_v11  ;;  %v4637_v42 = vpop.f32.mrf.mxu1  ;;  %v16664_v62 = vadd.f32 %v4720_v15, %v16474_v5  ;;  %v16719_v8 = vsel %vm8099_vm8, %v8096_v59, %v8098_v4 }
 0x31f   : > { %v16661_v9 = vadd.f32 %v4637_v42, %v16471_v26  ;;  %v4724_v3 = vpop.f32.mrf.mxu0  ;;  %13157 = vmatmul.mubr.msk.f32.gmra.mxu0 %vm632_vm6, %v16656_v43  ;;  %v16683_v26 = vld [vmem:[%s18905_s2 + $0x218] sm:$0xff] }
 0x320   : > { %v4641_v33 = vpop.f32.mrf.mxu1  ;;  %13162 = vmatmul.mubr.msk.f32.gmra.mxu1 %vm632_vm6, %v16627_v21  ;;  %v16676_v19 = vadd.f32 %v4724_v3, %v16486_v56  ;;  %7768 = vmatprep.mubr.f32.mxu0 %v18931_v27 }
 0x321   : > { %v16673_v10 = vadd.f32 %v4641_v33, %v16483_v25  ;;  %7851 = vmatprep.mubr.f32.mxu1 %v18931_v27  ;;  %v4726_v52 = vpop.f32.mrf.mxu0  ;;  %v16695_v38 = vpop.permute.xlu0 %8531 }
 0x322   : > { %v4643_v5 = vpop.f32.mrf.mxu1  ;;  %v16689_v25 = vadd.f32 %v4726_v52, %v16499_v51 }
 0x323   : > { %v16686_v12 = vadd.f32 %v4643_v5, %v16496_v49  ;;  %v4730_v58 = vpop.f32.mrf.mxu0  ;;  %13158 = vmatmul.mubr.msk.f32.gmra.mxu0 %vm632_vm6, %v16683_v26 }
 0x324   : > { %v4801_v56 = vpop.f32.mrf.mxu1  ;;  %13163 = vmatmul.mubr.msk.f32.gmra.mxu1 %vm632_vm6, %v16656_v43  ;;  %v16698_v37 = vadd.f32 %v4730_v58, %v16506_v41  ;;  %7928 = vmatprep.mubr.f32.mxu0 %v18931_v27  ;;  %v8102_v41 = vsel %vm8099_vm8, %v16558_v31, %v16571_v63 }
 0x325   : > { %v16701_v44 = vadd.f32 %v4801_v56, %v16509_v30  ;;  %7857 = vmatprep.mubr.f32.mxu1 %v18931_v27  ;;  %v4732_v49 = vpop.f32.mrf.mxu0  ;;  %v16733_v47 = vpop.permute.xlu0 %8529 }
 0x326   : > { %v4803_v51 = vpop.f32.mrf.mxu1  ;;  %v16706_v23 = vadd.f32 %v4732_v49, %v16514_v13 }
 0x327   : > { %v16709_v6 = vadd.f32 %v4803_v51, %v16517_v28  ;;  %v13660_v30 = vpop.f32.mrf.mxu0  ;;  %13167 = vmatmul.mubr.msk.f32.vlgmr.msra.gmra.mxu0 %vm632_vm6, %v16594_v35 }
 0x328   : > { %v4807_v32 = vpop.f32.mrf.mxu1  ;;  %13164 = vmatmul.mubr.msk.f32.gmra.mxu1 %vm632_vm6, %v16683_v26  ;;  %v16725_v28 = vadd.f32 %v13660_v30, %v16535_v18  ;;  %13187 = vmatpush1.msk.msra.mxu0 %vm587_vm2, %v8102_v41 }
 0x329   : > { %v16722_v13 = vadd.f32 %v4807_v32, %v16532_v39  ;;  %7934 = vmatprep.mubr.f32.mxu0 %v18931_v27  ;;  %13720 = vmatprep.subr.msk.mxu0 %vm587_vm2, %v16719_v8  ;;  %v4890_v63 = vpop.f32.mrf.mxu0  ;;  %v16773_v42 = vpop.permute.xlu0 %8537 }
 0x32a   : > { %v4809_v31 = vpop.f32.mrf.mxu1  ;;  %13714 = vmatprep.mubr.msk.f32.mxu1 %vm632_vm6, %v16594_v35  ;;  %v16739_v18 = vadd.f32 %v4890_v63, %v16547_v7  ;;  %v8105_v35 = vsel %vm8099_vm8, %v16670_v55, %v8096_v59 }
 0x32b   : > { %v16736_v39 = vadd.f32 %v4809_v31, %v16544_v22  ;;  %v13663_v20 = vpop.f32.mrf.mxu0  ;;  %13168 = vmatmul.mubr.msk.f32.gmra.mxu0 %vm632_vm6, %v16627_v21  ;;  %v16750_v22 = vpop.permute.xlu1 %8533 }
 0x32c   : > { %v4813_v0 = vpop.f32.mrf.mxu1  ;;  %13715 = vmatmul.mubr.msk.f32.vlgmr.msra.gmra.mxu1 %vm632_vm6, %v16627_v21  ;;  %v16756_v40 = vadd.f32 %v13663_v20, %v16564_v46  ;;  %7940 = vmatprep.mubr.f32.mxu0 %v18931_v27  ;;  %v8545_v51 = vsel %vm8543_vm9, %v16695_v38, %v16750_v22 }
 0x32d   : > { %v16753_v7 = vadd.f32 %v4813_v0, %v16561_v2  ;;  %13181 = vmatpush1.msk.msra.mxu1 %vm587_vm2, %v8100_v24  ;;  %v4900_v61 = vpop.f32.mrf.mxu0  ;;  %13717 = vmatprep.mubr.msk.f32.mxu1 %vm632_vm6, %v16656_v43 }
 0x32e   : > { %13192 = vmatprep.subr.msk.mxu1 %vm587_vm2, %v8105_v35  ;;  %v4815_v54 = vpop.f32.mrf.mxu1  ;;  %v16767_v2 = vadd.f32 %v4900_v61, %v16577_v53  ;;  %v16883_v35 = vpop.permute.xlu0 %8541 }
 0x32f   : > { %v16764_v21 = vadd.f32 %v4815_v54, %v16574_v45  ;;  %v5070_v46 = vpop.f32.mrf.mxu0  ;;  %13169 = vmatmul.mubr.msk.f32.gmra.mxu0 %vm632_vm6, %v16656_v43  ;;  %v16786_v45 = vld [vmem:[%s18905_s2 + $0x220] sm:$0xff]  ;;  %v16788_v33 = vpop.permute.xlu1 %8535 }
 0x330   : > { %v4819_v11 = vpop.f32.mrf.mxu1  ;;  %13718 = vmatmul.mubr.msk.f32.gmra.mxu1 %vm632_vm6, %v16683_v26  ;;  %v16779_v59 = vadd.f32 %v5070_v46, %v16587_v60  ;;  %7946 = vmatprep.mubr.f32.mxu0 %v18931_v27  ;;  %v8104_v60 = vsel %vm8099_vm8, %v16596_v29, %v16670_v55  ;;  %v16817_v29 = vld [vmem:[%s18905_s2 + $0x228] sm:$0xff] }
 0x331   : > { %v16776_v15 = vadd.f32 %v4819_v11, %v16584_v14  ;;  %8197 = vmatprep.mubr.f32.mxu1 %v18931_v27  ;;  %v5072_v43 = vpop.f32.mrf.mxu0 }
 0x332   : > { %v4821_v53 = vpop.f32.mrf.mxu1  ;;  %v16794_v14 = vadd.f32 %v5072_v43, %v16602_v1 }
 0x333   : > { %v16791_v3 = vadd.f32 %v4821_v53, %v16599_v16  ;;  %v5076_v5 = vpop.f32.mrf.mxu0  ;;  %13170 = vmatmul.mubr.msk.f32.gmra.mxu0 %vm632_vm6, %v16683_v26  ;;  %v8547_v16 = vsel %vm8543_vm9, %v16788_v33, %v16773_v42  ;;  %v8540_v11 = vpop.permute.xlu1 %8539 }
 0x334   : > { %v5159_v52 = vpop.f32.mrf.mxu1  ;;  %13182 = vmatmul.mubr.msk.f32.vlgmr.msra.gmra.mxu1 %vm632_vm6, %v16786_v45  ;;  %v16807_v1 = vadd.f32 %v5076_v5, %v16617_v36  ;;  %8286 = vmatprep.mubr.f32.mxu0 %v18931_v27  ;;  %v8544_v5 = vsel %vm8543_vm9, %v16733_v47, %v16695_v38  ;;  %v8549_v38 = vsel %vm8543_vm9, %v8540_v11, %v16883_v35 }
 0x335   : > { %v16810_v58 = vadd.f32 %v5159_v52, %v16620_v50  ;;  %13193 = vmatpush1.msk.msra.mxu1 %vm587_vm2, %v8104_v60  ;;  %8203 = vmatprep.mubr.f32.mxu1 %v18931_v27  ;;  %v5078_v55 = vpop.f32.mrf.mxu0 }
 0x336   : > { %13213 = vmatprep.subr.msk.mxu1 %vm587_vm2, %v8547_v16  ;;  %v5161_v26 = vpop.f32.mrf.mxu1  ;;  %v16822_v36 = vadd.f32 %v5078_v55, %v16632_v17 }
 0x337   : > { %v16825_v50 = vadd.f32 %v5161_v26, %v16635_v57  ;;  %v5082_v56 = vpop.f32.mrf.mxu0  ;;  %13188 = vmatmul.mubr.msk.f32.vlgmr.msra.gmra.mxu0 %vm632_vm6, %v16786_v45  ;;  %v16846_v57 = vld [vmem:[%s18905_s2 + $0x230] sm:$0xff] }
 0x338   : > { %v5165_v49 = vpop.f32.mrf.mxu1  ;;  %13183 = vmatmul.mubr.msk.f32.gmra.mxu1 %vm632_vm6, %v16817_v29  ;;  %v16835_v4 = vadd.f32 %v5082_v56, %v16645_v48  ;;  %13721 = vmatpush3.msk.msra.mxu0 %vm587_vm2, %v16719_v8 }
 0x339   : > { %v16838_v17 = vadd.f32 %v5165_v49, %v16648_v34  ;;  %8209 = vmatprep.mubr.f32.mxu1 %v18931_v27  ;;  %13207 = vmatprep.subr.msk.mxu0 %vm587_vm2, %v8545_v51  ;;  %v5084_v41 = vpop.f32.mrf.mxu0 }
 0x33a   : > { %v5167_v32 = vpop.f32.mrf.mxu1  ;;  %8292 = vmatprep.mubr.f32.mxu0 %v18931_v27  ;;  %v16851_v48 = vadd.f32 %v5084_v41, %v16661_v9  ;;  %v16871_v9 = vld [vmem:[%s18905_s2 + $0x238] sm:$0xff] }
 0x33b   : > { %v16854_v34 = vadd.f32 %v5167_v32, %v16664_v62  ;;  %v5088_v30 = vpop.f32.mrf.mxu0  ;;  %13189 = vmatmul.mubr.msk.f32.gmra.mxu0 %vm632_vm6, %v16817_v29 }
 0x33c   : > { %v5171_v8 = vpop.f32.mrf.mxu1  ;;  %13184 = vmatmul.mubr.msk.f32.gmra.mxu1 %vm632_vm6, %v16846_v57  ;;  %v16861_v31 = vadd.f32 %v5088_v30, %v16673_v10  ;;  %8298 = vmatprep.mubr.f32.mxu0 %v18931_v27 }
 0x33d   : > { %v16864_v63 = vadd.f32 %v5171_v8, %v16676_v19  ;;  %8215 = vmatprep.mubr.f32.mxu1 %v18931_v27  ;;  %v5090_v62 = vpop.f32.mrf.mxu0 }
 0x33e   : > { %v5173_v24 = vpop.f32.mrf.mxu1  ;;  %v16874_v0 = vadd.f32 %v5090_v62, %v16686_v12 }
 0x33f   : > { %v16877_v10 = vadd.f32 %v5173_v24, %v16689_v25  ;;  %v5248_v19 = vpop.f32.mrf.mxu0  ;;  %13190 = vmatmul.mubr.msk.f32.gmra.mxu0 %vm632_vm6, %v16846_v57 }
 0x340   : > { %v5177_v20 = vpop.f32.mrf.mxu1  ;;  %13185 = vmatmul.mubr.msk.f32.gmra.mxu1 %vm632_vm6, %v16871_v9  ;;  %v16889_v61 = vadd.f32 %v5248_v19, %v16701_v44  ;;  %8304 = vmatprep.mubr.f32.mxu0 %v18931_v27 }
 0x341   : > { %v16886_v54 = vadd.f32 %v5177_v20, %v16698_v37  ;;  %8375 = vmatprep.mubr.f32.mxu1 %v18931_v27  ;;  %v5250_v25 = vpop.f32.mrf.mxu0  ;;  %v8546_v37 = vsel %vm8543_vm9, %v16750_v22, %v16788_v33  ;;  %v16918_v33 = vpop.permute.xlu0 %8976 }
 0x342   : > { %v5179_v12 = vpop.f32.mrf.mxu1  ;;  %v16897_v53 = vadd.f32 %v5250_v25, %v16709_v6 }
 0x343   : > { %v16894_v46 = vadd.f32 %v5179_v12, %v16706_v23  ;;  %v5254_v43 = vpop.f32.mrf.mxu0  ;;  %13191 = vmatmul.mubr.msk.f32.gmra.mxu0 %vm632_vm6, %v16871_v9 }
 0x344   : > { %v13668_v44 = vpop.f32.mrf.mxu1  ;;  %13194 = vmatmul.mubr.msk.f32.vlgmr.msra.gmra.mxu1 %vm632_vm6, %v16786_v45  ;;  %v16907_v60 = vadd.f32 %v5254_v43, %v16722_v13  ;;  %13722 = vmatprep.mubr.msk.f32.mxu0 %vm632_vm6, %v16786_v45  ;;  %v16933_v45 = vpop.permute.xlu1 %8974 }
 0x345   : > { %v16910_v23 = vadd.f32 %v13668_v44, %v16725_v28  ;;  %13214 = vmatpush1.msk.msra.mxu1 %vm587_vm2, %v8546_v37  ;;  %8381 = vmatprep.mubr.f32.mxu1 %v18931_v27  ;;  %v5256_v6 = vpop.f32.mrf.mxu0  ;;  %v16958_v56 = vpop.permute.xlu0 %8980  ;;  %v8988_v12 = vsel %vm8986_vm10, %v16933_v45, %v16918_v33 }
 0x346   : > { %13728 = vmatprep.subr.msk.mxu1 %vm587_vm2, %v16883_v35  ;;  %v5337_v22 = vpop.f32.mrf.mxu1  ;;  %v16921_v13 = vadd.f32 %v5256_v6, %v16736_v39 }
 0x347   : > { %v16924_v28 = vadd.f32 %v5337_v22, %v16739_v18  ;;  %v5260_v52 = vpop.f32.mrf.mxu0  ;;  %13723 = vmatmul.mubr.msk.f32.vlgmr.msra.gmra.mxu0 %vm632_vm6, %v16817_v29 }
 0x348   : > { %v13671_v16 = vpop.f32.mrf.mxu1  ;;  %13195 = vmatmul.mubr.msk.f32.gmra.mxu1 %vm632_vm6, %v16817_v29  ;;  %v16936_v39 = vadd.f32 %v5260_v52, %v16753_v7  ;;  %13208 = vmatpush1.msk.msra.mxu0 %vm587_vm2, %v8544_v5  ;;  %v16973_v41 = vpop.permute.xlu1 %8978 }
 0x349   : > { %v16939_v18 = vadd.f32 %v13671_v16, %v16756_v40  ;;  %8387 = vmatprep.mubr.f32.mxu1 %v18931_v27  ;;  %13219 = vmatprep.subr.msk.mxu0 %vm587_vm2, %v8549_v38  ;;  %v5262_v47 = vpop.f32.mrf.mxu0 }
 0x34a   : > { %v5347_v55 = vpop.f32.mrf.mxu1  ;;  %13725 = vmatprep.mubr.msk.f32.mxu0 %vm632_vm6, %v16846_v57  ;;  %v16949_v7 = vadd.f32 %v5262_v47, %v16764_v21  ;;  %v16971_v21 = vld [vmem:[%s18905_s2 + $0x240] sm:$0xff] }
 0x34b   : > { %v16952_v40 = vadd.f32 %v5347_v55, %v16767_v2  ;;  %v5266_v29 = vpop.f32.mrf.mxu0  ;;  %13726 = vmatmul.mubr.msk.f32.gmra.mxu0 %vm632_vm6, %v16871_v9 }
 0x34c   : > { %v5517_v26 = vpop.f32.mrf.mxu1  ;;  %13196 = vmatmul.mubr.msk.f32.gmra.mxu1 %vm632_vm6, %v16846_v57  ;;  %v16961_v49 = vadd.f32 %v5266_v29, %v16776_v15  ;;  %8640 = vmatprep.mubr.f32.mxu0 %v18931_v27  ;;  %v8973_v6 = vpop.permute.xlu1 %8972 }
 0x34d   : > { %v16964_v51 = vadd.f32 %v5517_v26, %v16779_v59  ;;  %8393 = vmatprep.mubr.f32.mxu1 %v18931_v27  ;;  %v5268_v2 = vpop.f32.mrf.mxu0  ;;  %v8548_v59 = vsel %vm8543_vm9, %v16773_v42, %v8540_v11  ;;  %v17001_v42 = vld [vmem:[%s18905_s2 + $0x248] sm:$0xff] }
 0x34e   : > { %v5519_v57 = vpop.f32.mrf.mxu1  ;;  %v16976_v32 = vadd.f32 %v5268_v2, %v16791_v3  ;;  %v8990_v3 = vsel %vm8986_vm10, %v16973_v41, %v16958_v56 }
 0x34f   : > { %v16979_v15 = vadd.f32 %v5519_v57, %v16794_v14  ;;  %v5606_v8 = vpop.f32.mrf.mxu0  ;;  %13209 = vmatmul.mubr.msk.f32.vlgmr.msra.gmra.mxu0 %vm632_vm6, %v16971_v21 }
 0x350   : > { %v5523_v30 = vpop.f32.mrf.mxu1  ;;  %13197 = vmatmul.mubr.msk.f32.gmra.mxu1 %vm632_vm6, %v16871_v9  ;;  %v16994_v14 = vadd.f32 %v5606_v8, %v16810_v58  ;;  %13220 = vmatpush1.msk.msra.mxu0 %vm587_vm2, %v8548_v59  ;;  %v17079_v26 = vpop.permute.xlu1 %8984  ;;  %v8987_v8 = vsel %vm8986_vm10, %v8973_v6, %v16933_v45 }
 0x351   : > { %v16991_v62 = vadd.f32 %v5523_v30, %v16807_v1  ;;  %8646 = vmatprep.mubr.f32.mxu0 %v18931_v27  ;;  %13240 = vmatprep.subr.msk.mxu0 %vm587_vm2, %v8990_v3  ;;  %v5608_v24 = vpop.f32.mrf.mxu0 }
 0x352   : > { %v5525_v9 = vpop.f32.mrf.mxu1  ;;  %8729 = vmatprep.mubr.f32.mxu1 %v18931_v27  ;;  %v17009_v58 = vadd.f32 %v5608_v24, %v16825_v50  ;;  %v17030_v50 = vld [vmem:[%s18905_s2 + $0x250] sm:$0xff] }
 0x353   : > { %v17006_v1 = vadd.f32 %v5525_v9, %v16822_v36  ;;  %v5612_v19 = vpop.f32.mrf.mxu0  ;;  %13210 = vmatmul.mubr.msk.f32.gmra.mxu0 %vm632_vm6, %v17001_v42 }
 0x354   : > { %v5529_v20 = vpop.f32.mrf.mxu1  ;;  %13215 = vmatmul.mubr.msk.f32.vlgmr.msra.gmra.mxu1 %vm632_vm6, %v16971_v21  ;;  %v17022_v36 = vadd.f32 %v5612_v19, %v16838_v17  ;;  %8652 = vmatprep.mubr.f32.mxu0 %v18931_v27 }
 0x355   : > { %v17019_v25 = vadd.f32 %v5529_v20, %v16835_v4  ;;  %13729 = vmatpush3.msk.msra.mxu1 %vm587_vm2, %v16883_v35  ;;  %v5614_v37 = vpop.f32.mrf.mxu0  ;;  %8735 = vmatprep.mubr.f32.mxu1 %v18931_v27  ;;  %v17034_v4 = vpop.permute.xlu0 %8982 }
 0x356   : > { %13234 = vmatprep.subr.msk.mxu1 %vm587_vm2, %v8988_v12  ;;  %v5531_v11 = vpop.f32.mrf.mxu1  ;;  %v17040_v35 = vadd.f32 %v5614_v37, %v16854_v34 }
 0x357   : > { %v17037_v17 = vadd.f32 %v5531_v11, %v16851_v48  ;;  %v5618_v44 = vpop.f32.mrf.mxu0  ;;  %13211 = vmatmul.mubr.msk.f32.gmra.mxu0 %vm632_vm6, %v17030_v50  ;;  %v17057_v48 = vld [vmem:[%s18905_s2 + $0x258] sm:$0xff] }
 0x358   : > { %v5535_v43 = vpop.f32.mrf.mxu1  ;;  %13216 = vmatmul.mubr.msk.f32.gmra.mxu1 %vm632_vm6, %v17001_v42  ;;  %v17050_v5 = vadd.f32 %v5618_v44, %v16864_v63  ;;  %8658 = vmatprep.mubr.f32.mxu0 %v18931_v27 }
 0x359   : > { %v17047_v22 = vadd.f32 %v5535_v43, %v16861_v31  ;;  %8741 = vmatprep.mubr.f32.mxu1 %v18931_v27  ;;  %v5620_v52 = vpop.f32.mrf.mxu0  ;;  %v17069_v47 = vpop.permute.xlu0 %9417 }
 0x35a   : > { %v5537_v34 = vpop.f32.mrf.mxu1  ;;  %v17063_v31 = vadd.f32 %v5620_v52, %v16877_v10 }
 0x35b   : > { %v17060_v16 = vadd.f32 %v5537_v34, %v16874_v0  ;;  %v5624_v38 = vpop.f32.mrf.mxu0  ;;  %13212 = vmatmul.mubr.msk.f32.gmra.mxu0 %vm632_vm6, %v17057_v48 }
 0x35c   : > { %v5695_v63 = vpop.f32.mrf.mxu1  ;;  %13217 = vmatmul.mubr.msk.f32.gmra.mxu1 %vm632_vm6, %v17030_v50  ;;  %v17072_v55 = vadd.f32 %v5624_v38, %v16886_v54  ;;  %8818 = vmatprep.mubr.f32.mxu0 %v18931_v27  ;;  %v8989_v54 = vsel %vm8986_vm10, %v16918_v33, %v16973_v41 }
 0x35d   : > { %v17075_v29 = vadd.f32 %v5695_v63, %v16889_v61  ;;  %8747 = vmatprep.mubr.f32.mxu1 %v18931_v27  ;;  %v5626_v0 = vpop.f32.mrf.mxu0  ;;  %v17106_v41 = vpop.permute.xlu0 %9415 }
 0x35e   : > { %v5697_v10 = vpop.f32.mrf.mxu1  ;;  %v17082_v2 = vadd.f32 %v5626_v0, %v16894_v46 }
 0x35f   : > { %v17085_v57 = vadd.f32 %v5697_v10, %v16897_v53  ;;  %v13676_v59 = vpop.f32.mrf.mxu0  ;;  %13221 = vmatmul.mubr.msk.f32.vlgmr.msra.gmra.mxu0 %vm632_vm6, %v16971_v21 }
 0x360   : > { %v5701_v61 = vpop.f32.mrf.mxu1  ;;  %13218 = vmatmul.mubr.msk.f32.gmra.mxu1 %vm632_vm6, %v17057_v48  ;;  %v17098_v46 = vadd.f32 %v13676_v59, %v16910_v23  ;;  %13241 = vmatpush1.msk.msra.mxu0 %vm587_vm2, %v8989_v54 }
 0x361   : > { %v17095_v30 = vadd.f32 %v5701_v61, %v16907_v60  ;;  %8824 = vmatprep.mubr.f32.mxu0 %v18931_v27  ;;  %13736 = vmatprep.subr.msk.mxu0 %vm587_vm2, %v17079_v26  ;;  %v5784_v33 = vpop.f32.mrf.mxu0  ;;  %v17146_v12 = vpop.permute.xlu0 %9423 }
 0x362   : > { %v5703_v53 = vpop.f32.mrf.mxu1  ;;  %13730 = vmatprep.mubr.msk.f32.mxu1 %vm632_vm6, %v16971_v21  ;;  %v17112_v23 = vadd.f32 %v5784_v33, %v16924_v28  ;;  %v8992_v21 = vsel %vm8986_vm10, %v17034_v4, %v17079_v26 }
 0x363   : > { %v17109_v60 = vadd.f32 %v5703_v53, %v16921_v13  ;;  %v13679_v9 = vpop.f32.mrf.mxu0  ;;  %13222 = vmatmul.mubr.msk.f32.gmra.mxu0 %vm632_vm6, %v17001_v42  ;;  %v17123_v13 = vpop.permute.xlu1 %9419 }
 0x364   : > { %v5707_v3 = vpop.f32.mrf.mxu1  ;;  %13731 = vmatmul.mubr.msk.f32.vlgmr.msra.gmra.mxu1 %vm632_vm6, %v17001_v42  ;;  %v17129_v24 = vadd.f32 %v13679_v9, %v16939_v18  ;;  %8830 = vmatprep.mubr.f32.mxu0 %v18931_v27  ;;  %v9431_v0 = vsel %vm9429_vm11, %v17069_v47, %v17123_v13 }
 0x365   : > { %v17126_v28 = vadd.f32 %v5707_v3, %v16936_v39  ;;  %13235 = vmatpush1.msk.msra.mxu1 %vm587_vm2, %v8987_v8  ;;  %v5794_v42 = vpop.f32.mrf.mxu0  ;;  %13733 = vmatprep.mubr.msk.f32.mxu1 %vm632_vm6, %v17030_v50 }
 0x366   : > { %13246 = vmatprep.subr.msk.mxu1 %vm587_vm2, %v8992_v21  ;;  %v5709_v45 = vpop.f32.mrf.mxu1  ;;  %v17140_v39 = vadd.f32 %v5794_v42, %v16952_v40  ;;  %v17256_v21 = vpop.permute.xlu0 %9427 }
 0x367   : > { %v17137_v20 = vadd.f32 %v5709_v45, %v16949_v7  ;;  %v5964_v18 = vpop.f32.mrf.mxu0  ;;  %13223 = vmatmul.mubr.msk.f32.gmra.mxu0 %vm632_vm6, %v17030_v50  ;;  %v17159_v7 = vld [vmem:[%s18905_s2 + $0x260] sm:$0xff]  ;;  %v17161_v43 = vpop.permute.xlu1 %9421 }
 0x368   : > { %v5713_v19 = vpop.f32.mrf.mxu1  ;;  %13734 = vmatmul.mubr.msk.f32.gmra.mxu1 %vm632_vm6, %v17057_v48  ;;  %v17152_v37 = vadd.f32 %v5964_v18, %v16964_v51  ;;  %8836 = vmatprep.mubr.f32.mxu0 %v18931_v27  ;;  %v8991_v51 = vsel %vm8986_vm10, %v16958_v56, %v17034_v4  ;;  %v17190_v56 = vld [vmem:[%s18905_s2 + $0x268] sm:$0xff] }
 0x369   : > { %v17149_v11 = vadd.f32 %v5713_v19, %v16961_v49  ;;  %9083 = vmatprep.mubr.f32.mxu1 %v18931_v27  ;;  %v5966_v50 = vpop.f32.mrf.mxu0 }
 0x36a   : > { %v5715_v40 = vpop.f32.mrf.mxu1  ;;  %v17167_v49 = vadd.f32 %v5966_v50, %v16979_v15 }
 0x36b   : > { %v17164_v44 = vadd.f32 %v5715_v40, %v16976_v32  ;;  %v5970_v6 = vpop.f32.mrf.mxu0  ;;  %13224 = vmatmul.mubr.msk.f32.gmra.mxu0 %vm632_vm6, %v17057_v48  ;;  %v9433_v32 = vsel %vm9429_vm11, %v17161_v43, %v17146_v12  ;;  %v9426_v19 = vpop.permute.xlu1 %9425 }
 0x36c   : > { %v6053_v34 = vpop.f32.mrf.mxu1  ;;  %13236 = vmatmul.mubr.msk.f32.vlgmr.msra.gmra.mxu1 %vm632_vm6, %v17159_v7  ;;  %v17180_v15 = vadd.f32 %v5970_v6, %v16991_v62  ;;  %9172 = vmatprep.mubr.f32.mxu0 %v18931_v27  ;;  %v9430_v6 = vsel %vm9429_vm11, %v17106_v41, %v17069_v47  ;;  %v9435_v47 = vsel %vm9429_vm11, %v9426_v19, %v17256_v21 }
 0x36d   : > { %v17183_v52 = vadd.f32 %v6053_v34, %v16994_v14  ;;  %13247 = vmatpush1.msk.msra.mxu1 %vm587_vm2, %v8991_v51  ;;  %9089 = vmatprep.mubr.f32.mxu1 %v18931_v27  ;;  %v5972_v4 = vpop.f32.mrf.mxu0 }
 0x36e   : > { %13267 = vmatprep.subr.msk.mxu1 %vm587_vm2, %v9433_v32  ;;  %v6055_v48 = vpop.f32.mrf.mxu1  ;;  %v17195_v62 = vadd.f32 %v5972_v4, %v17006_v1 }
 0x36f   : > { %v17198_v14 = vadd.f32 %v6055_v48, %v17009_v58  ;;  %v5976_v38 = vpop.f32.mrf.mxu0  ;;  %13242 = vmatmul.mubr.msk.f32.vlgmr.msra.gmra.mxu0 %vm632_vm6, %v17159_v7  ;;  %v17219_v58 = vld [vmem:[%s18905_s2 + $0x270] sm:$0xff] }
 0x370   : > { %v6059_v63 = vpop.f32.mrf.mxu1  ;;  %13237 = vmatmul.mubr.msk.f32.gmra.mxu1 %vm632_vm6, %v17190_v56  ;;  %v17208_v10 = vadd.f32 %v5976_v38, %v17019_v25  ;;  %13737 = vmatpush3.msk.msra.mxu0 %vm587_vm2, %v17079_v26 }
 0x371   : > { %v17211_v1 = vadd.f32 %v6059_v63, %v17022_v36  ;;  %9095 = vmatprep.mubr.f32.mxu1 %v18931_v27  ;;  %13261 = vmatprep.subr.msk.mxu0 %vm587_vm2, %v9431_v0  ;;  %v5978_v54 = vpop.f32.mrf.mxu0 }
 0x372   : > { %v6061_v61 = vpop.f32.mrf.mxu1  ;;  %9178 = vmatprep.mubr.f32.mxu0 %v18931_v27  ;;  %v17224_v25 = vadd.f32 %v5978_v54, %v17037_v17  ;;  %v17244_v17 = vld [vmem:[%s18905_s2 + $0x278] sm:$0xff] }
 0x373   : > { %v17227_v36 = vadd.f32 %v6061_v61, %v17040_v35  ;;  %v5982_v26 = vpop.f32.mrf.mxu0  ;;  %13243 = vmatmul.mubr.msk.f32.gmra.mxu0 %vm632_vm6, %v17190_v56 }
 0x374   : > { %v6065_v59 = vpop.f32.mrf.mxu1  ;;  %13238 = vmatmul.mubr.msk.f32.gmra.mxu1 %vm632_vm6, %v17219_v58  ;;  %v17234_v53 = vadd.f32 %v5982_v26, %v17047_v22  ;;  %9184 = vmatprep.mubr.f32.mxu0 %v18931_v27 }
 0x375   : > { %v17237_v33 = vadd.f32 %v6065_v59, %v17050_v5  ;;  %9101 = vmatprep.mubr.f32.mxu1 %v18931_v27  ;;  %v5984_v35 = vpop.f32.mrf.mxu0 }
 0x376   : > { %v6067_v8 = vpop.f32.mrf.mxu1  ;;  %v17247_v3 = vadd.f32 %v5984_v35, %v17060_v16 }
 0x377   : > { %v17250_v22 = vadd.f32 %v6067_v8, %v17063_v31  ;;  %v6142_v5 = vpop.f32.mrf.mxu0  ;;  %13244 = vmatmul.mubr.msk.f32.gmra.mxu0 %vm632_vm6, %v17219_v58 }
 0x378   : > { %v6071_v9 = vpop.f32.mrf.mxu1  ;;  %13239 = vmatmul.mubr.msk.f32.gmra.mxu1 %vm632_vm6, %v17244_v17  ;;  %v17262_v42 = vadd.f32 %v6142_v5, %v17075_v29  ;;  %9190 = vmatprep.mubr.f32.mxu0 %v18931_v27 }
 0x379   : > { %v17259_v45 = vadd.f32 %v6071_v9, %v17072_v55  ;;  %9261 = vmatprep.mubr.f32.mxu1 %v18931_v27  ;;  %v6144_v31 = vpop.f32.mrf.mxu0  ;;  %v9432_v55 = vsel %vm9429_vm11, %v17123_v13, %v17161_v43  ;;  %v17291_v43 = vpop.permute.xlu0 %9862 }
 0x37a   : > { %v6073_v16 = vpop.f32.mrf.mxu1  ;;  %v17270_v40 = vadd.f32 %v6144_v31, %v17085_v57 }
 0x37b   : > { %v17267_v18 = vadd.f32 %v6073_v16, %v17082_v2  ;;  %v6148_v50 = vpop.f32.mrf.mxu0  ;;  %13245 = vmatmul.mubr.msk.f32.gmra.mxu0 %vm632_vm6, %v17244_v17 }
 0x37c   : > { %v13684_v29 = vpop.f32.mrf.mxu1  ;;  %13248 = vmatmul.mubr.msk.f32.vlgmr.msra.gmra.mxu1 %vm632_vm6, %v17159_v7  ;;  %v17280_v51 = vadd.f32 %v6148_v50, %v17095_v30  ;;  %13738 = vmatprep.mubr.msk.f32.mxu0 %vm632_vm6, %v17159_v7  ;;  %v17306_v7 = vpop.permute.xlu1 %9860 }
 0x37d   : > { %v17283_v2 = vadd.f32 %v13684_v29, %v17098_v46  ;;  %13268 = vmatpush1.msk.msra.mxu1 %vm587_vm2, %v9432_v55  ;;  %9267 = vmatprep.mubr.f32.mxu1 %v18931_v27  ;;  %v6150_v57 = vpop.f32.mrf.mxu0  ;;  %v17331_v38 = vpop.permute.xlu0 %9866  ;;  %v9874_v16 = vsel %vm9872_vm12, %v17306_v7, %v17291_v43 }
 0x37e   : > { %13744 = vmatprep.subr.msk.mxu1 %vm587_vm2, %v17256_v21  ;;  %v6231_v13 = vpop.f32.mrf.mxu1  ;;  %v17294_v30 = vadd.f32 %v6150_v57, %v17109_v60 }
 0x37f   : > { %v17297_v46 = vadd.f32 %v6231_v13, %v17112_v23  ;;  %v6154_v34 = vpop.f32.mrf.mxu0  ;;  %13739 = vmatmul.mubr.msk.f32.vlgmr.msra.gmra.mxu0 %vm632_vm6, %v17190_v56 }
 0x380   : > { %v13687_v32 = vpop.f32.mrf.mxu1  ;;  %13249 = vmatmul.mubr.msk.f32.gmra.mxu1 %vm632_vm6, %v17190_v56  ;;  %v17309_v60 = vadd.f32 %v6154_v34, %v17126_v28  ;;  %13262 = vmatpush1.msk.msra.mxu0 %vm587_vm2, %v9430_v6  ;;  %v17346_v54 = vpop.permute.xlu1 %9864 }
 0x381   : > { %v17312_v23 = vadd.f32 %v13687_v32, %v17129_v24  ;;  %9273 = vmatprep.mubr.f32.mxu1 %v18931_v27  ;;  %13273 = vmatprep.subr.msk.mxu0 %vm587_vm2, %v9435_v47  ;;  %v6156_v41 = vpop.f32.mrf.mxu0 }
 0x382   : > { %v6241_v4 = vpop.f32.mrf.mxu1  ;;  %13741 = vmatprep.mubr.msk.f32.mxu0 %vm632_vm6, %v17219_v58  ;;  %v17322_v28 = vadd.f32 %v6156_v41, %v17137_v20  ;;  %v17344_v20 = vld [vmem:[%s18905_s2 + $0x280] sm:$0xff] }
 0x383   : > { %v17325_v24 = vadd.f32 %v6241_v4, %v17140_v39  ;;  %v6160_v56 = vpop.f32.mrf.mxu0  ;;  %13742 = vmatmul.mubr.msk.f32.gmra.mxu0 %vm632_vm6, %v17244_v17 }
 0x384   : > { %v6411_v48 = vpop.f32.mrf.mxu1  ;;  %13250 = vmatmul.mubr.msk.f32.gmra.mxu1 %vm632_vm6, %v17219_v58  ;;  %v17334_v63 = vadd.f32 %v6160_v56, %v17149_v11  ;;  %9526 = vmatprep.mubr.f32.mxu0 %v18931_v27  ;;  %v9859_v57 = vpop.permute.xlu1 %9858 }
 0x385   : > { %v17337_v0 = vadd.f32 %v6411_v48, %v17152_v37  ;;  %9279 = vmatprep.mubr.f32.mxu1 %v18931_v27  ;;  %v6162_v39 = vpop.f32.mrf.mxu0  ;;  %v9434_v37 = vsel %vm9429_vm11, %v17146_v12, %v9426_v19  ;;  %v17374_v12 = vld [vmem:[%s18905_s2 + $0x288] sm:$0xff] }
 0x386   : > { %v6413_v58 = vpop.f32.mrf.mxu1  ;;  %v17349_v61 = vadd.f32 %v6162_v39, %v17164_v44  ;;  %v9876_v44 = vsel %vm9872_vm12, %v17346_v54, %v17331_v38 }
 0x387   : > { %v17352_v11 = vadd.f32 %v6413_v58, %v17167_v49  ;;  %v6500_v59 = vpop.f32.mrf.mxu0  ;;  %13263 = vmatmul.mubr.msk.f32.vlgmr.msra.gmra.mxu0 %vm632_vm6, %v17344_v20 }
 0x388   : > { %v6417_v26 = vpop.f32.mrf.mxu1  ;;  %13251 = vmatmul.mubr.msk.f32.gmra.mxu1 %vm632_vm6, %v17244_v17  ;;  %v17367_v49 = vadd.f32 %v6500_v59, %v17183_v52  ;;  %13274 = vmatpush1.msk.msra.mxu0 %vm587_vm2, %v9434_v37  ;;  %v17452_v48 = vpop.permute.xlu1 %9870  ;;  %v9873_v59 = vsel %vm9872_vm12, %v9859_v57, %v17306_v7 }
 0x389   : > { %v17364_v35 = vadd.f32 %v6417_v26, %v17180_v15  ;;  %9532 = vmatprep.mubr.f32.mxu0 %v18931_v27  ;;  %13294 = vmatprep.subr.msk.mxu0 %vm587_vm2, %v9876_v44  ;;  %v6502_v8 = vpop.f32.mrf.mxu0 }
 0x38a   : > { %v6419_v17 = vpop.f32.mrf.mxu1  ;;  %9615 = vmatprep.mubr.f32.mxu1 %v18931_v27  ;;  %v17382_v52 = vadd.f32 %v6502_v8, %v17198_v14  ;;  %v17403_v14 = vld [vmem:[%s18905_s2 + $0x290] sm:$0xff] }
 0x38b   : > { %v17379_v15 = vadd.f32 %v6419_v17, %v17195_v62  ;;  %v6506_v5 = vpop.f32.mrf.mxu0  ;;  %13264 = vmatmul.mubr.msk.f32.gmra.mxu0 %vm632_vm6, %v17374_v12 }
 0x38c   : > { %v6423_v9 = vpop.f32.mrf.mxu1  ;;  %13269 = vmatmul.mubr.msk.f32.vlgmr.msra.gmra.mxu1 %vm632_vm6, %v17344_v20  ;;  %v17395_v62 = vadd.f32 %v6506_v5, %v17211_v1  ;;  %9538 = vmatprep.mubr.f32.mxu0 %v18931_v27 }
 0x38d   : > { %v17392_v31 = vadd.f32 %v6423_v9, %v17208_v10  ;;  %13745 = vmatpush3.msk.msra.mxu1 %vm587_vm2, %v17256_v21  ;;  %v6508_v55 = vpop.f32.mrf.mxu0  ;;  %9621 = vmatprep.mubr.f32.mxu1 %v18931_v27  ;;  %v17407_v10 = vpop.permute.xlu0 %9868 }
 0x38e   : > { %13288 = vmatprep.subr.msk.mxu1 %vm587_vm2, %v9874_v16  ;;  %v6425_v19 = vpop.f32.mrf.mxu1  ;;  %v17413_v21 = vadd.f32 %v6508_v55, %v17227_v36 }
 0x38f   : > { %v17410_v1 = vadd.f32 %v6425_v19, %v17224_v25  ;;  %v6512_v29 = vpop.f32.mrf.mxu0  ;;  %13265 = vmatmul.mubr.msk.f32.gmra.mxu0 %vm632_vm6, %v17403_v14  ;;  %v17430_v25 = vld [vmem:[%s18905_s2 + $0x298] sm:$0xff] }
 0x390   : > { %v6429_v50 = vpop.f32.mrf.mxu1  ;;  %13270 = vmatmul.mubr.msk.f32.gmra.mxu1 %vm632_vm6, %v17374_v12  ;;  %v17423_v6 = vadd.f32 %v6512_v29, %v17237_v33  ;;  %9544 = vmatprep.mubr.f32.mxu0 %v18931_v27 }
 0x391   : > { %v17420_v13 = vadd.f32 %v6429_v50, %v17234_v53  ;;  %9627 = vmatprep.mubr.f32.mxu1 %v18931_v27  ;;  %v6514_v34 = vpop.f32.mrf.mxu0  ;;  %v17442_v41 = vpop.permute.xlu0 %10303 }
 0x392   : > { %v6431_v36 = vpop.f32.mrf.mxu1  ;;  %v17436_v53 = vadd.f32 %v6514_v34, %v17250_v22 }
 0x393   : > { %v17433_v32 = vadd.f32 %v6431_v36, %v17247_v3  ;;  %v6518_v47 = vpop.f32.mrf.mxu0  ;;  %13266 = vmatmul.mubr.msk.f32.gmra.mxu0 %vm632_vm6, %v17430_v25 }
 0x394   : > { %v6589_v33 = vpop.f32.mrf.mxu1  ;;  %13271 = vmatmul.mubr.msk.f32.gmra.mxu1 %vm632_vm6, %v17403_v14  ;;  %v17445_v4 = vadd.f32 %v6518_v47, %v17259_v45  ;;  %9704 = vmatprep.mubr.f32.mxu0 %v18931_v27  ;;  %v9875_v45 = vsel %vm9872_vm12, %v17291_v43, %v17346_v54 }
 0x395   : > { %v17448_v56 = vadd.f32 %v6589_v33, %v17262_v42  ;;  %9633 = vmatprep.mubr.f32.mxu1 %v18931_v27  ;;  %v6520_v3 = vpop.f32.mrf.mxu0  ;;  %v17479_v54 = vpop.permute.xlu0 %10301 }
 0x396   : > { %v6591_v22 = vpop.f32.mrf.mxu1  ;;  %v17455_v39 = vadd.f32 %v6520_v3, %v17267_v18 }
 0x397   : > { %v17458_v58 = vadd.f32 %v6591_v22, %v17270_v40  ;;  %v13692_v37 = vpop.f32.mrf.mxu0  ;;  %13275 = vmatmul.mubr.msk.f32.vlgmr.msra.gmra.mxu0 %vm632_vm6, %v17344_v20 }
 0x398   : > { %v6595_v42 = vpop.f32.mrf.mxu1  ;;  %13272 = vmatmul.mubr.msk.f32.gmra.mxu1 %vm632_vm6, %v17430_v25  ;;  %v17471_v18 = vadd.f32 %v13692_v37, %v17283_v2  ;;  %13295 = vmatpush1.msk.msra.mxu0 %vm587_vm2, %v9875_v45 }
 0x399   : > { %v17468_v26 = vadd.f32 %v6595_v42, %v17280_v51  ;;  %9710 = vmatprep.mubr.f32.mxu0 %v18931_v27  ;;  %13752 = vmatprep.subr.msk.mxu0 %vm587_vm2, %v17452_v48  ;;  %v6678_v43 = vpop.f32.mrf.mxu0  ;;  %v17519_v16 = vpop.permute.xlu0 %10309 }
 0x39a   : > { %v6597_v40 = vpop.f32.mrf.mxu1  ;;  %13746 = vmatprep.mubr.msk.f32.mxu1 %vm632_vm6, %v17344_v20  ;;  %v17485_v2 = vadd.f32 %v6678_v43, %v17297_v46  ;;  %v9878_v20 = vsel %vm9872_vm12, %v17407_v10, %v17452_v48 }
 0x39b   : > { %v17482_v51 = vadd.f32 %v6597_v40, %v17294_v30  ;;  %v13695_v17 = vpop.f32.mrf.mxu0  ;;  %13276 = vmatmul.mubr.msk.f32.gmra.mxu0 %vm632_vm6, %v17374_v12  ;;  %v17496_v30 = vpop.permute.xlu1 %10305 }
 0x39c   : > { %v6601_v44 = vpop.f32.mrf.mxu1  ;;  %13747 = vmatmul.mubr.msk.f32.vlgmr.msra.gmra.mxu1 %vm632_vm6, %v17374_v12  ;;  %v17502_v8 = vadd.f32 %v13695_v17, %v17312_v23  ;;  %9716 = vmatprep.mubr.f32.mxu0 %v18931_v27  ;;  %v10317_v3 = vsel %vm10315_vm13, %v17442_v41, %v17496_v30 }
 0x39d   : > { %v17499_v46 = vadd.f32 %v6601_v44, %v17309_v60  ;;  %13289 = vmatpush1.msk.msra.mxu1 %vm587_vm2, %v9873_v59  ;;  %v6688_v12 = vpop.f32.mrf.mxu0  ;;  %13749 = vmatprep.mubr.msk.f32.mxu1 %vm632_vm6, %v17403_v14 }
 0x39e   : > { %13300 = vmatprep.subr.msk.mxu1 %vm587_vm2, %v9878_v20  ;;  %v6603_v7 = vpop.f32.mrf.mxu1  ;;  %v17513_v60 = vadd.f32 %v6688_v12, %v17325_v24  ;;  %v17629_v20 = vpop.permute.xlu0 %10313 }
 0x39f   : > { %v17510_v9 = vadd.f32 %v6603_v7, %v17322_v28  ;;  %v6858_v23 = vpop.f32.mrf.mxu0  ;;  %13277 = vmatmul.mubr.msk.f32.gmra.mxu0 %vm632_vm6, %v17403_v14  ;;  %v17532_v28 = vld [vmem:[%s18905_s2 + $0x2a0] sm:$0xff]  ;;  %v17534_v50 = vpop.permute.xlu1 %10307 }
 0x3a0   : > { %v6607_v5 = vpop.f32.mrf.mxu1  ;;  %13750 = vmatmul.mubr.msk.f32.gmra.mxu1 %vm632_vm6, %v17430_v25  ;;  %v17525_v55 = vadd.f32 %v6858_v23, %v17337_v0  ;;  %9722 = vmatprep.mubr.f32.mxu0 %v18931_v27  ;;  %v9877_v0 = vsel %vm9872_vm12, %v17331_v38, %v17407_v10  ;;  %v17563_v38 = vld [vmem:[%s18905_s2 + $0x2a8] sm:$0xff] }
 0x3a1   : > { %v17522_v19 = vadd.f32 %v6607_v5, %v17334_v63  ;;  %9969 = vmatprep.mubr.f32.mxu1 %v18931_v27  ;;  %v6860_v14 = vpop.f32.mrf.mxu0 }
 0x3a2   : > { %v6609_v24 = vpop.f32.mrf.mxu1  ;;  %v17540_v63 = vadd.f32 %v6860_v14, %v17352_v11 }
 0x3a3   : > { %v17537_v29 = vadd.f32 %v6609_v24, %v17349_v61  ;;  %v6864_v57 = vpop.f32.mrf.mxu0  ;;  %13278 = vmatmul.mubr.msk.f32.gmra.mxu0 %vm632_vm6, %v17430_v25  ;;  %v10319_v61 = vsel %vm10315_vm13, %v17534_v50, %v17519_v16  ;;  %v10312_v5 = vpop.permute.xlu1 %10311 }
 0x3a4   : > { %v6947_v36 = vpop.f32.mrf.mxu1  ;;  %13290 = vmatmul.mubr.msk.f32.vlgmr.msra.gmra.mxu1 %vm632_vm6, %v17532_v28  ;;  %v17553_v11 = vadd.f32 %v6864_v57, %v17364_v35  ;;  %10058 = vmatprep.mubr.f32.mxu0 %v18931_v27  ;;  %v10316_v57 = vsel %vm10315_vm13, %v17479_v54, %v17442_v41  ;;  %v10321_v41 = vsel %vm10315_vm13, %v10312_v5, %v17629_v20 }
 0x3a5   : > { %v17556_v34 = vadd.f32 %v6947_v36, %v17367_v49  ;;  %13301 = vmatpush1.msk.msra.mxu1 %vm587_vm2, %v9877_v0  ;;  %9975 = vmatprep.mubr.f32.mxu1 %v18931_v27  ;;  %v6866_v10 = vpop.f32.mrf.mxu0 }
 0x3a6   : > { %13321 = vmatprep.subr.msk.mxu1 %vm587_vm2, %v10319_v61  ;;  %v6949_v25 = vpop.f32.mrf.mxu1  ;;  %v17568_v35 = vadd.f32 %v6866_v10, %v17379_v15 }
 0x3a7   : > { %v17571_v49 = vadd.f32 %v6949_v25, %v17382_v52  ;;  %v6870_v47 = vpop.f32.mrf.mxu0  ;;  %13296 = vmatmul.mubr.msk.f32.vlgmr.msra.gmra.mxu0 %vm632_vm6, %v17532_v28  ;;  %v17592_v52 = vld [vmem:[%s18905_s2 + $0x2b0] sm:$0xff] }
 0x3a8   : > { %v6953_v33 = vpop.f32.mrf.mxu1  ;;  %13291 = vmatmul.mubr.msk.f32.gmra.mxu1 %vm632_vm6, %v17563_v38  ;;  %v17581_v22 = vadd.f32 %v6870_v47, %v17392_v31  ;;  %13753 = vmatpush3.msk.msra.mxu0 %vm587_vm2, %v17452_v48 }
 0x3a9   : > { %v17584_v15 = vadd.f32 %v6953_v33, %v17395_v62  ;;  %9981 = vmatprep.mubr.f32.mxu1 %v18931_v27  ;;  %13315 = vmatprep.subr.msk.mxu0 %vm587_vm2, %v10317_v3  ;;  %v6872_v45 = vpop.f32.mrf.mxu0 }
 0x3aa   : > { %v6955_v42 = vpop.f32.mrf.mxu1  ;;  %10064 = vmatprep.mubr.f32.mxu0 %v18931_v27  ;;  %v17597_v31 = vadd.f32 %v6872_v45, %v17410_v1  ;;  %v17617_v1 = vld [vmem:[%s18905_s2 + $0x2b8] sm:$0xff] }
 0x3ab   : > { %v17600_v62 = vadd.f32 %v6955_v42, %v17413_v21  ;;  %v6876_v48 = vpop.f32.mrf.mxu0  ;;  %13297 = vmatmul.mubr.msk.f32.gmra.mxu0 %vm632_vm6, %v17563_v38 }
 0x3ac   : > { %v6959_v37 = vpop.f32.mrf.mxu1  ;;  %13292 = vmatmul.mubr.msk.f32.gmra.mxu1 %vm632_vm6, %v17592_v52  ;;  %v17607_v40 = vadd.f32 %v6876_v48, %v17420_v13  ;;  %10070 = vmatprep.mubr.f32.mxu0 %v18931_v27 }
 0x3ad   : > { %v17610_v43 = vadd.f32 %v6959_v37, %v17423_v6  ;;  %9987 = vmatprep.mubr.f32.mxu1 %v18931_v27  ;;  %v6878_v21 = vpop.f32.mrf.mxu0 }
 0x3ae   : > { %v6961_v59 = vpop.f32.mrf.mxu1  ;;  %v17620_v44 = vadd.f32 %v6878_v21, %v17433_v32 }
 0x3af   : > { %v17623_v13 = vadd.f32 %v6961_v59, %v17436_v53  ;;  %v7036_v6 = vpop.f32.mrf.mxu0  ;;  %13298 = vmatmul.mubr.msk.f32.gmra.mxu0 %vm632_vm6, %v17592_v52 }
 0x3b0   : > { %v6965_v17 = vpop.f32.mrf.mxu1  ;;  %13293 = vmatmul.mubr.msk.f32.gmra.mxu1 %vm632_vm6, %v17617_v1  ;;  %v17635_v12 = vadd.f32 %v7036_v6, %v17448_v56  ;;  %10076 = vmatprep.mubr.f32.mxu0 %v18931_v27 }
 0x3b1   : > { %v17632_v7 = vadd.f32 %v6965_v17, %v17445_v4  ;;  %10147 = vmatprep.mubr.f32.mxu1 %v18931_v27  ;;  %v7038_v53 = vpop.f32.mrf.mxu0  ;;  %v10318_v4 = vsel %vm10315_vm13, %v17496_v30, %v17534_v50  ;;  %v17664_v50 = vpop.permute.xlu0 %10748 }
 0x3b2   : > { %v6967_v32 = vpop.f32.mrf.mxu1  ;;  %v17643_v24 = vadd.f32 %v7038_v53, %v17458_v58 }
 0x3b3   : > { %v17640_v23 = vadd.f32 %v6967_v32, %v17455_v39  ;;  %v7042_v14 = vpop.f32.mrf.mxu0  ;;  %13299 = vmatmul.mubr.msk.f32.gmra.mxu0 %vm632_vm6, %v17617_v1 }
 0x3b4   : > { %v13700_v56 = vpop.f32.mrf.mxu1  ;;  %13302 = vmatmul.mubr.msk.f32.vlgmr.msra.gmra.mxu1 %vm632_vm6, %v17532_v28  ;;  %v17653_v0 = vadd.f32 %v7042_v14, %v17468_v26  ;;  %13754 = vmatprep.mubr.msk.f32.mxu0 %vm632_vm6, %v17532_v28  ;;  %v17679_v28 = vpop.permute.xlu1 %10746 }
 0x3b5   : > { %v17656_v39 = vadd.f32 %v13700_v56, %v17471_v18  ;;  %13322 = vmatpush1.msk.msra.mxu1 %vm587_vm2, %v10318_v4  ;;  %10153 = vmatprep.mubr.f32.mxu1 %v18931_v27  ;;  %v7044_v58 = vpop.f32.mrf.mxu0  ;;  %v17704_v47 = vpop.permute.xlu0 %10752  ;;  %v10760_v32 = vsel %vm10758_vm14, %v17679_v28, %v17664_v50 }
 0x3b6   : > { %13760 = vmatprep.subr.msk.mxu1 %vm587_vm2, %v17629_v20  ;;  %v7125_v30 = vpop.f32.mrf.mxu1  ;;  %v17667_v26 = vadd.f32 %v7044_v58, %v17482_v51 }
 0x3b7   : > { %v17670_v18 = vadd.f32 %v7125_v30, %v17485_v2  ;;  %v7048_v36 = vpop.f32.mrf.mxu0  ;;  %13755 = vmatmul.mubr.msk.f32.vlgmr.msra.gmra.mxu0 %vm632_vm6, %v17563_v38 }
 0x3b8   : > { %v13703_v61 = vpop.f32.mrf.mxu1  ;;  %13303 = vmatmul.mubr.msk.f32.gmra.mxu1 %vm632_vm6, %v17563_v38  ;;  %v17682_v51 = vadd.f32 %v7048_v36, %v17499_v46  ;;  %13316 = vmatpush1.msk.msra.mxu0 %vm587_vm2, %v10316_v57  ;;  %v17719_v45 = vpop.permute.xlu1 %10750 }
 0x3b9   : > { %v17685_v2 = vadd.f32 %v13703_v61, %v17502_v8  ;;  %10159 = vmatprep.mubr.f32.mxu1 %v18931_v27  ;;  %13327 = vmatprep.subr.msk.mxu0 %vm587_vm2, %v10321_v41  ;;  %v7050_v54 = vpop.f32.mrf.mxu0 }
 0x3ba   : > { %v7135_v10 = vpop.f32.mrf.mxu1  ;;  %13757 = vmatprep.mubr.msk.f32.mxu0 %vm632_vm6, %v17592_v52  ;;  %v17695_v46 = vadd.f32 %v7050_v54, %v17510_v9  ;;  %v17717_v9 = vld [vmem:[%s18905_s2 + $0x2c0] sm:$0xff] }
 0x3bb   : > { %v17698_v8 = vadd.f32 %v7135_v10, %v17513_v60  ;;  %v7054_v38 = vpop.f32.mrf.mxu0  ;;  %13758 = vmatmul.mubr.msk.f32.gmra.mxu0 %vm632_vm6, %v17617_v1 }
 0x3bc   : > { %v7305_v25 = vpop.f32.mrf.mxu1  ;;  %13304 = vmatmul.mubr.msk.f32.gmra.mxu1 %vm632_vm6, %v17592_v52  ;;  %v17707_v33 = vadd.f32 %v7054_v38, %v17522_v19  ;;  %10412 = vmatprep.mubr.f32.mxu0 %v18931_v27  ;;  %v10745_v58 = vpop.permute.xlu1 %10744 }
 0x3bd   : > { %v17710_v3 = vadd.f32 %v7305_v25, %v17525_v55  ;;  %10165 = vmatprep.mubr.f32.mxu1 %v18931_v27  ;;  %v7056_v60 = vpop.f32.mrf.mxu0  ;;  %v10320_v55 = vsel %vm10315_vm13, %v17519_v16, %v10312_v5  ;;  %v17747_v16 = vld [vmem:[%s18905_s2 + $0x2c8] sm:$0xff] }
 0x3be   : > { %v7307_v52 = vpop.f32.mrf.mxu1  ;;  %v17722_v42 = vadd.f32 %v7056_v60, %v17537_v29  ;;  %v10762_v29 = vsel %vm10758_vm14, %v17719_v45, %v17704_v47 }
 0x3bf   : > { %v17725_v19 = vadd.f32 %v7307_v52, %v17540_v63  ;;  %v7394_v37 = vpop.f32.mrf.mxu0  ;;  %13317 = vmatmul.mubr.msk.f32.vlgmr.msra.gmra.mxu0 %vm632_vm6, %v17717_v9 }
 0x3c0   : > { %v7311_v48 = vpop.f32.mrf.mxu1  ;;  %13305 = vmatmul.mubr.msk.f32.gmra.mxu1 %vm632_vm6, %v17617_v1  ;;  %v17740_v63 = vadd.f32 %v7394_v37, %v17556_v34  ;;  %13328 = vmatpush1.msk.msra.mxu0 %vm587_vm2, %v10320_v55  ;;  %v17825_v25 = vpop.permute.xlu1 %10756  ;;  %v10759_v37 = vsel %vm10758_vm14, %v10745_v58, %v17679_v28 }
 0x3c1   : > { %v17737_v21 = vadd.f32 %v7311_v48, %v17553_v11  ;;  %10418 = vmatprep.mubr.f32.mxu0 %v18931_v27  ;;  %13348 = vmatprep.subr.msk.mxu0 %vm587_vm2, %v10762_v29  ;;  %v7396_v59 = vpop.f32.mrf.mxu0 }
 0x3c2   : > { %v7313_v1 = vpop.f32.mrf.mxu1  ;;  %10501 = vmatprep.mubr.f32.mxu1 %v18931_v27  ;;  %v17755_v34 = vadd.f32 %v7396_v59, %v17571_v49  ;;  %v17776_v49 = vld [vmem:[%s18905_s2 + $0x2d0] sm:$0xff] }
 0x3c3   : > { %v17752_v11 = vadd.f32 %v7313_v1, %v17568_v35  ;;  %v7400_v6 = vpop.f32.mrf.mxu0  ;;  %13318 = vmatmul.mubr.msk.f32.gmra.mxu0 %vm632_vm6, %v17747_v16 }
 0x3c4   : > { %v7317_v17 = vpop.f32.mrf.mxu1  ;;  %13323 = vmatmul.mubr.msk.f32.vlgmr.msra.gmra.mxu1 %vm632_vm6, %v17717_v9  ;;  %v17768_v35 = vadd.f32 %v7400_v6, %v17584_v15  ;;  %10424 = vmatprep.mubr.f32.mxu0 %v18931_v27 }
 0x3c5   : > { %v17765_v53 = vadd.f32 %v7317_v17, %v17581_v22  ;;  %13761 = vmatpush3.msk.msra.mxu1 %vm587_vm2, %v17629_v20  ;;  %v7402_v4 = vpop.f32.mrf.mxu0  ;;  %10507 = vmatprep.mubr.f32.mxu1 %v18931_v27  ;;  %v17780_v22 = vpop.permute.xlu0 %10754 }
 0x3c6   : > { %13342 = vmatprep.subr.msk.mxu1 %vm587_vm2, %v10760_v32  ;;  %v7319_v5 = vpop.f32.mrf.mxu1  ;;  %v17786_v20 = vadd.f32 %v7402_v4, %v17600_v62 }
 0x3c7   : > { %v17783_v15 = vadd.f32 %v7319_v5, %v17597_v31  ;;  %v7406_v56 = vpop.f32.mrf.mxu0  ;;  %13319 = vmatmul.mubr.msk.f32.gmra.mxu0 %vm632_vm6, %v17776_v49  ;;  %v17803_v31 = vld [vmem:[%s18905_s2 + $0x2d8] sm:$0xff] }
 0x3c8   : > { %v7323_v14 = vpop.f32.mrf.mxu1  ;;  %13324 = vmatmul.mubr.msk.f32.gmra.mxu1 %vm632_vm6, %v17747_v16  ;;  %v17796_v57 = vadd.f32 %v7406_v56, %v17610_v43  ;;  %10430 = vmatprep.mubr.f32.mxu0 %v18931_v27 }
 0x3c9   : > { %v17793_v30 = vadd.f32 %v7323_v14, %v17607_v40  ;;  %10513 = vmatprep.mubr.f32.mxu1 %v18931_v27  ;;  %v7408_v36 = vpop.f32.mrf.mxu0  ;;  %v17815_v54 = vpop.permute.xlu0 %11189 }
 0x3ca   : > { %v7325_v62 = vpop.f32.mrf.mxu1  ;;  %v17809_v40 = vadd.f32 %v7408_v36, %v17623_v13 }
 0x3cb   : > { %v17806_v61 = vadd.f32 %v7325_v62, %v17620_v44  ;;  %v7412_v41 = vpop.f32.mrf.mxu0  ;;  %13320 = vmatmul.mubr.msk.f32.gmra.mxu0 %vm632_vm6, %v17803_v31 }
 0x3cc   : > { %v7483_v43 = vpop.f32.mrf.mxu1  ;;  %13325 = vmatmul.mubr.msk.f32.gmra.mxu1 %vm632_vm6, %v17776_v49  ;;  %v17818_v10 = vadd.f32 %v7412_v41, %v17632_v7  ;;  %10590 = vmatprep.mubr.f32.mxu0 %v18931_v27  ;;  %v10761_v7 = vsel %vm10758_vm14, %v17664_v50, %v17719_v45 }
 0x3cd   : > { %v17821_v38 = vadd.f32 %v7483_v43, %v17635_v12  ;;  %10519 = vmatprep.mubr.f32.mxu1 %v18931_v27  ;;  %v7414_v44 = vpop.f32.mrf.mxu0  ;;  %v17852_v45 = vpop.permute.xlu0 %11187 }
 0x3ce   : > { %v7485_v13 = vpop.f32.mrf.mxu1  ;;  %v17828_v60 = vadd.f32 %v7414_v44, %v17640_v23 }
 0x3cf   : > { %v17831_v52 = vadd.f32 %v7485_v13, %v17643_v24  ;;  %v13708_v55 = vpop.f32.mrf.mxu0  ;;  %13329 = vmatmul.mubr.msk.f32.vlgmr.msra.gmra.mxu0 %vm632_vm6, %v17717_v9 }
 0x3d0   : > { %v7489_v12 = vpop.f32.mrf.mxu1  ;;  %13326 = vmatmul.mubr.msk.f32.gmra.mxu1 %vm632_vm6, %v17803_v31  ;;  %v17844_v23 = vadd.f32 %v13708_v55, %v17656_v39  ;;  %13349 = vmatpush1.msk.msra.mxu0 %vm587_vm2, %v10761_v7 }
 0x3d1   : > { %v17841_v48 = vadd.f32 %v7489_v12, %v17653_v0  ;;  %10596 = vmatprep.mubr.f32.mxu0 %v18931_v27  ;;  %13768 = vmatprep.subr.msk.mxu0 %vm587_vm2, %v17825_v25  ;;  %v7572_v50 = vpop.f32.mrf.mxu0  ;;  %v17892_v32 = vpop.permute.xlu0 %11195 }
 0x3d2   : > { %v7491_v24 = vpop.f32.mrf.mxu1  ;;  %13762 = vmatprep.mubr.msk.f32.mxu1 %vm632_vm6, %v17717_v9  ;;  %v17858_v39 = vadd.f32 %v7572_v50, %v17670_v18  ;;  %v10764_v9 = vsel %vm10758_vm14, %v17780_v22, %v17825_v25 }
 0x3d3   : > { %v17855_v0 = vadd.f32 %v7491_v24, %v17667_v26  ;;  %v13711_v1 = vpop.f32.mrf.mxu0  ;;  %13330 = vmatmul.mubr.msk.f32.gmra.mxu0 %vm632_vm6, %v17747_v16  ;;  %v17869_v26 = vpop.permute.xlu1 %11191 }
 0x3d4   : > { %v7495_v29 = vpop.f32.mrf.mxu1  ;;  %13763 = vmatmul.mubr.msk.f32.vlgmr.msra.gmra.mxu1 %vm632_vm6, %v17747_v16  ;;  %v17875_v59 = vadd.f32 %v13711_v1, %v17685_v2  ;;  %10602 = vmatprep.mubr.f32.mxu0 %v18931_v27  ;;  %v11203_v44 = vsel %vm11201_vm15, %v17815_v54, %v17869_v26 }
 0x3d5   : > { %v17872_v18 = vadd.f32 %v7495_v29, %v17682_v51  ;;  %13343 = vmatpush1.msk.msra.mxu1 %vm587_vm2, %v10759_v37  ;;  %v7582_v16 = vpop.f32.mrf.mxu0  ;;  %13765 = vmatprep.mubr.msk.f32.mxu1 %vm632_vm6, %v17776_v49 }
 0x3d6   : > { %13354 = vmatprep.subr.msk.mxu1 %vm587_vm2, %v10764_v9  ;;  %v7497_v28 = vpop.f32.mrf.mxu1  ;;  %v17886_v51 = vadd.f32 %v7582_v16, %v17698_v8  ;;  %v18002_v9 = vpop.permute.xlu0 %11199 }
 0x3d7   : > { %v17883_v17 = vadd.f32 %v7497_v28, %v17695_v46  ;;  %v7752_v2 = vpop.f32.mrf.mxu0  ;;  %13331 = vmatmul.mubr.msk.f32.gmra.mxu0 %vm632_vm6, %v17776_v49  ;;  %v17905_v46 = vld [vmem:[%s18905_s2 + $0x2e0] sm:$0xff]  ;;  %v17907_v14 = vpop.permute.xlu1 %11193 }
 0x3d8   : > { %v7501_v6 = vpop.f32.mrf.mxu1  ;;  %13766 = vmatmul.mubr.msk.f32.gmra.mxu1 %vm632_vm6, %v17803_v31  ;;  %v17898_v4 = vadd.f32 %v7752_v2, %v17710_v3  ;;  %10608 = vmatprep.mubr.f32.mxu0 %v18931_v27  ;;  %v10763_v3 = vsel %vm10758_vm14, %v17704_v47, %v17780_v22  ;;  %v17936_v47 = vld [vmem:[%s18905_s2 + $0x2e8] sm:$0xff] }
 0x3d9   : > { %v17895_v5 = vadd.f32 %v7501_v6, %v17707_v33  ;;  %10855 = vmatprep.mubr.f32.mxu1 %v18931_v27  ;;  %v7754_v49 = vpop.f32.mrf.mxu0 }
 0x3da   : > { %v7503_v8 = vpop.f32.mrf.mxu1  ;;  %v17913_v33 = vadd.f32 %v7754_v49, %v17725_v19 }
 0x3db   : > { %v17910_v56 = vadd.f32 %v7503_v8, %v17722_v42  ;;  %v7758_v58 = vpop.f32.mrf.mxu0  ;;  %13332 = vmatmul.mubr.msk.f32.gmra.mxu0 %vm632_vm6, %v17803_v31  ;;  %v11205_v42 = vsel %vm11201_vm15, %v17907_v14, %v17892_v32  ;;  %v11198_v6 = vpop.permute.xlu1 %11197 }
 0x3dc   : > { %v7841_v62 = vpop.f32.mrf.mxu1  ;;  %13344 = vmatmul.mubr.msk.f32.vlgmr.msra.gmra.mxu1 %vm632_vm6, %v17905_v46  ;;  %v17926_v19 = vadd.f32 %v7758_v58, %v17737_v21  ;;  %10944 = vmatprep.mubr.f32.mxu0 %v18931_v27  ;;  %v11202_v58 = vsel %vm11201_vm15, %v17852_v45, %v17815_v54  ;;  %v11207_v54 = vsel %vm11201_vm15, %v11198_v6, %v18002_v9 }
 0x3dd   : > { %v17929_v36 = vadd.f32 %v7841_v62, %v17740_v63  ;;  %13355 = vmatpush1.msk.msra.mxu1 %vm587_vm2, %v10763_v3  ;;  %10861 = vmatprep.mubr.f32.mxu1 %v18931_v27  ;;  %v7760_v22 = vpop.f32.mrf.mxu0 }
 0x3de   : > { %13375 = vmatprep.subr.msk.mxu1 %vm587_vm2, %v11205_v42  ;;  %v7843_v31 = vpop.f32.mrf.mxu1  ;;  %v17941_v21 = vadd.f32 %v7760_v22, %v17752_v11 }
 0x3df   : > { %v17944_v63 = vadd.f32 %v7843_v31, %v17755_v34  ;;  %v7764_v41 = vpop.f32.mrf.mxu0  ;;  %13350 = vmatmul.mubr.msk.f32.vlgmr.msra.gmra.mxu0 %vm632_vm6, %v17905_v46  ;;  %v17965_v34 = vld [vmem:[%s18905_s2 + $0x2f0] sm:$0xff] }
 0x3e0   : > { %v7847_v43 = vpop.f32.mrf.mxu1  ;;  %13345 = vmatmul.mubr.msk.f32.gmra.mxu1 %vm632_vm6, %v17936_v47  ;;  %v17954_v13 = vadd.f32 %v7764_v41, %v17765_v53  ;;  %13769 = vmatpush3.msk.msra.mxu0 %vm587_vm2, %v17825_v25 }
 0x3e1   : > { %v17957_v11 = vadd.f32 %v7847_v43, %v17768_v35  ;;  %10867 = vmatprep.mubr.f32.mxu1 %v18931_v27  ;;  %13369 = vmatprep.subr.msk.mxu0 %vm587_vm2, %v11203_v44  ;;  %v7766_v7 = vpop.f32.mrf.mxu0 }
 0x3e2   : > { %v7849_v12 = vpop.f32.mrf.mxu1  ;;  %10950 = vmatprep.mubr.f32.mxu0 %v18931_v27  ;;  %v17970_v53 = vadd.f32 %v7766_v7, %v17783_v15  ;;  %v17990_v15 = vld [vmem:[%s18905_s2 + $0x2f8] sm:$0xff]  ;;  %v13916_v7 = vmov 0  }
 0x3e3   : > { %v17973_v35 = vadd.f32 %v7849_v12, %v17786_v20  ;;  %v7770_v25 = vpop.f32.mrf.mxu0  ;;  %13351 = vmatmul.mubr.msk.f32.gmra.mxu0 %vm632_vm6, %v17936_v47  ;;  %13853 = vset.pattern.permute.xlu1 %v13916_v7 }
 0x3e4   : > { %v7853_v55 = vpop.f32.mrf.mxu1  ;;  %13346 = vmatmul.mubr.msk.f32.gmra.mxu1 %vm632_vm6, %v17965_v34  ;;  %v17980_v24 = vadd.f32 %v7770_v25, %v17793_v30  ;;  %10956 = vmatprep.mubr.f32.mxu0 %v18931_v27  ;;  %v11206_v25 = vsel %vm11201_vm15, %v17892_v32, %v11198_v6  ;;  %v12501_v6 = vld [vmem:[%s18906_s3 + $0x8] sm:$0xff] }
 0x3e5   : > { %v17983_v50 = vadd.f32 %v7853_v55, %v17796_v57  ;;  %10873 = vmatprep.mubr.f32.mxu1 %v18931_v27  ;;  %v7772_v20 = vpop.f32.mrf.mxu0  ;;  %13854 = vset.pattern.permute.xlu0 %v13916_v7 }
 0x3e6   : > { %v7855_v37 = vpop.f32.mrf.mxu1  ;;  %v17993_v29 = vadd.f32 %v7772_v20, %v17806_v61  ;;  %12511 = vperm.xlu0 %13854, %v12501_v6  }
 0x3e7   : > { %v17996_v30 = vadd.f32 %v7855_v37, %v17809_v40  ;;  %v7930_v57 = vpop.f32.mrf.mxu0  ;;  %13352 = vmatmul.mubr.msk.f32.gmra.mxu0 %vm632_vm6, %v17965_v34 }
 0x3e8   : > { %v7859_v1 = vpop.f32.mrf.mxu1  ;;  %13347 = vmatmul.mubr.msk.f32.gmra.mxu1 %vm632_vm6, %v17990_v15  ;;  %v18008_v16 = vadd.f32 %v7930_v57, %v17821_v38  ;;  %10962 = vmatprep.mubr.f32.mxu0 %v18931_v27 }
 0x3e9   : > { %v18005_v28 = vadd.f32 %v7859_v1, %v17818_v10  ;;  %11033 = vmatprep.mubr.f32.mxu1 %v18931_v27  ;;  %v7932_v40 = vpop.f32.mrf.mxu0  ;;  %v11204_v10 = vsel %vm11201_vm15, %v17869_v26, %v17907_v14  ;;  %v18037_v14 = vpop.permute.xlu0 %11634 }
 0x3ea   : > { %v7861_v61 = vpop.f32.mrf.mxu1  ;;  %v18016_v8 = vadd.f32 %v7932_v40, %v17831_v52 }
 0x3eb   : > { %v18013_v2 = vadd.f32 %v7861_v61, %v17828_v60  ;;  %v7936_v49 = vpop.f32.mrf.mxu0  ;;  %13353 = vmatmul.mubr.msk.f32.gmra.mxu0 %vm632_vm6, %v17990_v15 }
 0x3ec   : > { %v13716_v38 = vpop.f32.mrf.mxu1  ;;  %13356 = vmatmul.mubr.msk.f32.vlgmr.msra.gmra.mxu1 %vm632_vm6, %v17905_v46  ;;  %v18026_v3 = vadd.f32 %v7936_v49, %v17841_v48  ;;  %13770 = vmatprep.mubr.msk.f32.mxu0 %vm632_vm6, %v17905_v46  ;;  %v18052_v46 = vpop.permute.xlu1 %11632  ;;  %v18155_v49 = vld [vmem:[%s18905_s2 + $0x310] sm:$0xff] }
 0x3ed   : > { %v18029_v60 = vadd.f32 %v13716_v38, %v17844_v23  ;;  %13376 = vmatpush1.msk.msra.mxu1 %vm587_vm2, %v11204_v10  ;;  %11039 = vmatprep.mubr.f32.mxu1 %v18931_v27  ;;  %v7938_v52 = vpop.f32.mrf.mxu0  ;;  %v18077_v41 = vpop.permute.xlu0 %11638 }
 0x3ee   : > { %13776 = vmatprep.subr.msk.mxu1 %vm587_vm2, %v18002_v9  ;;  %v8019_v26 = vpop.f32.mrf.mxu1  ;;  %v18040_v48 = vadd.f32 %v7938_v52, %v17855_v0 }
 0x3ef   : > { %v18043_v23 = vadd.f32 %v8019_v26, %v17858_v39  ;;  %v7942_v62 = vpop.f32.mrf.mxu0  ;;  %13771 = vmatmul.mubr.msk.f32.vlgmr.msra.gmra.mxu0 %vm632_vm6, %v17936_v47  ;;  %v12502_v26 = vld [vmem:[%s18906_s3 + $0x10] sm:$0xff] }
 0x3f0   : > { %v13719_v42 = vpop.f32.mrf.mxu1  ;;  %13357 = vmatmul.mubr.msk.f32.gmra.mxu1 %vm632_vm6, %v17936_v47  ;;  %v18055_v0 = vadd.f32 %v7942_v62, %v17872_v18  ;;  %13370 = vmatpush1.msk.msra.mxu0 %vm587_vm2, %v11202_v58  ;;  %v18092_v12 = vpop.permute.xlu1 %11636 }
 0x3f1   : > { %v18058_v39 = vadd.f32 %v13719_v42, %v17875_v59  ;;  %11045 = vmatprep.mubr.f32.mxu1 %v18931_v27  ;;  %13381 = vmatprep.subr.msk.mxu0 %vm587_vm2, %v11207_v54  ;;  %v7944_v45 = vpop.f32.mrf.mxu0  ;;  %v18185_v54 = vld [vmem:[%s18905_s2 + $0x318] sm:$0xff] }
 0x3f2   : > { %v8029_v22 = vpop.f32.mrf.mxu1  ;;  %13773 = vmatprep.mubr.msk.f32.mxu0 %vm632_vm6, %v17965_v34  ;;  %v18068_v18 = vadd.f32 %v7944_v45, %v17883_v17  ;;  %v18090_v17 = vld [vmem:[%s18905_s2 + $0x300] sm:$0xff] }
 0x3f3   : > { %v18071_v59 = vadd.f32 %v8029_v22, %v17886_v51  ;;  %v7948_v47 = vpop.f32.mrf.mxu0  ;;  %13774 = vmatmul.mubr.msk.f32.gmra.mxu0 %vm632_vm6, %v17990_v15 }
 0x3f4   : > { %v8199_v31 = vpop.f32.mrf.mxu1  ;;  %13358 = vmatmul.mubr.msk.f32.gmra.mxu1 %vm632_vm6, %v17965_v34  ;;  %v18080_v43 = vadd.f32 %v7948_v47, %v17895_v5  ;;  %11298 = vmatprep.mubr.f32.mxu0 %v18931_v27  ;;  %v11631_v42 = vpop.permute.xlu1 %11630 }
 0x3f5   : > { %v18083_v44 = vadd.f32 %v8199_v31, %v17898_v4  ;;  %11051 = vmatprep.mubr.f32.mxu1 %v18931_v27  ;;  %v7950_v51 = vpop.f32.mrf.mxu0 }
 0x3f6   : > { %v8201_v34 = vpop.f32.mrf.mxu1  ;;  %v18095_v5 = vadd.f32 %v7950_v51, %v17910_v56  ;;  %v12500_v56 = vld [vmem:[%s18906_s3] sm:$0xff] }
 0x3f7   : > { %v18098_v4 = vadd.f32 %v8201_v34, %v17913_v33  ;;  %v8288_v20 = vpop.f32.mrf.mxu0  ;;  %13371 = vmatmul.mubr.msk.f32.vlgmr.msra.gmra.mxu0 %vm632_vm6, %v18090_v17  ;;  %v11648_v33 = vsel %vm11644_vm0, %v18092_v12, %v18077_v41  ;;  %12506 = vperm.xlu1 %13853, %v12500_v56  }
 0x3f8   : > { %v8205_v55 = vpop.f32.mrf.mxu1  ;;  %13359 = vmatmul.mubr.msk.f32.gmra.mxu1 %vm632_vm6, %v17990_v15  ;;  %v18116_v32 = vadd.f32 %v8288_v20, %v17929_v36  ;;  %13382 = vmatpush1.msk.msra.mxu0 %vm587_vm2, %v11206_v25  ;;  %v18123_v15 = vld [vmem:[%s18905_s2 + $0x308] sm:$0xff] }
 0x3f9   : > { %v18113_v37 = vadd.f32 %v8205_v55, %v17926_v19  ;;  %11304 = vmatprep.mubr.f32.mxu0 %v18931_v27  ;;  %13402 = vmatprep.subr.msk.mxu0 %vm587_vm2, %v11648_v33  ;;  %v8290_v57 = vpop.f32.mrf.mxu0  ;;  %v18210_v55 = vpop.permute.xlu1 %11642 }
 0x3fa   : > { %v8207_v1 = vpop.f32.mrf.mxu1  ;;  %11387 = vmatprep.mubr.f32.mxu1 %v18931_v27  ;;  %v18131_v36 = vadd.f32 %v8290_v57, %v17944_v63  ;;  %v11645_v57 = vsel %vm11644_vm0, %v11631_v42, %v18052_v46 }
 0x3fb   : > { %v18128_v19 = vadd.f32 %v8207_v1, %v17941_v21  ;;  %v8294_v40 = vpop.f32.mrf.mxu0  ;;  %13372 = vmatmul.mubr.msk.f32.gmra.mxu0 %vm632_vm6, %v18123_v15  ;;  %v11646_v21 = vsel %vm11644_vm0, %v18052_v46, %v18037_v14  ;;  %12516 = vperm.xlu1 %13853, %v12502_v26  }
 0x3fc   : > { %v8211_v61 = vpop.f32.mrf.mxu1  ;;  %13377 = vmatmul.mubr.msk.f32.vlgmr.msra.gmra.mxu1 %vm632_vm6, %v18090_v17  ;;  %v18147_v10 = vadd.f32 %v8294_v40, %v17957_v11  ;;  %11310 = vmatprep.mubr.f32.mxu0 %v18931_v27 }
 0x3fd   : > { %v18144_v63 = vadd.f32 %v8211_v61, %v17954_v13  ;;  %13777 = vmatpush3.msk.msra.mxu1 %vm587_vm2, %v18002_v9  ;;  %v8296_v52 = vpop.f32.mrf.mxu0  ;;  %11393 = vmatprep.mubr.f32.mxu1 %v18931_v27  ;;  %v18159_v13 = vpop.permute.xlu0 %11640 }
 0x3fe   : > { %13396 = vmatprep.subr.msk.mxu1 %vm587_vm2, %v11646_v21  ;;  %v8213_v38 = vpop.f32.mrf.mxu1  ;;  %v18165_v9 = vadd.f32 %v8296_v52, %v17973_v35 }
 0x3ff   : > { %v18162_v11 = vadd.f32 %v8213_v38, %v17970_v53  ;;  %v8300_v62 = vpop.f32.mrf.mxu0  ;;  %13373 = vmatmul.mubr.msk.f32.gmra.mxu0 %vm632_vm6, %v18155_v49 }
 0x400   : > { %v8217_v58 = vpop.f32.mrf.mxu1  ;;  %13378 = vmatmul.mubr.msk.f32.gmra.mxu1 %vm632_vm6, %v18123_v15  ;;  %v18178_v35 = vadd.f32 %v8300_v62, %v17983_v50  ;;  %11316 = vmatprep.mubr.f32.mxu0 %v18931_v27  ;;  %v12503_v50 = vld [vmem:[%s18906_s3 + $0x18] sm:$0xff] }
 0x401   : > { %v18175_v53 = vadd.f32 %v8217_v58, %v17980_v24  ;;  %11399 = vmatprep.mubr.f32.mxu1 %v18931_v27  ;;  %v8302_v22 = vpop.f32.mrf.mxu0  ;;  %v18200_v34 = vpop.permute.xlu0 %12075  ;;  %12521 = vperm.xlu1 %13853, %v12503_v50  }
 0x402   : > { %v8219_v45 = vpop.f32.mrf.mxu1  ;;  %v18191_v24 = vadd.f32 %v8302_v22, %v17996_v30 }
 0x403   : > { %v18188_v47 = vadd.f32 %v8219_v45, %v17993_v29  ;;  %v8306_v31 = vpop.f32.mrf.mxu0  ;;  %13374 = vmatmul.mubr.msk.f32.gmra.mxu0 %vm632_vm6, %v18185_v54 }
 0x404   : > { %v8377_v51 = vpop.f32.mrf.mxu1  ;;  %13379 = vmatmul.mubr.msk.f32.gmra.mxu1 %vm632_vm6, %v18155_v49  ;;  %v18203_v29 = vadd.f32 %v8306_v31, %v18005_v28  ;;  %11476 = vmatprep.mubr.f32.mxu0 %v18931_v27  ;;  %v11647_v28 = vsel %vm11644_vm0, %v18037_v14, %v18092_v12 }
 0x405   : > { %v18206_v30 = vadd.f32 %v8377_v51, %v18008_v16  ;;  %11405 = vmatprep.mubr.f32.mxu1 %v18931_v27  ;;  %v8308_v7 = vpop.f32.mrf.mxu0  ;;  %v18237_v12 = vpop.permute.xlu0 %12073 }
 0x406   : > { %v8379_v25 = vpop.f32.mrf.mxu1  ;;  %v18213_v20 = vadd.f32 %v8308_v7, %v18013_v2 }
 0x407   : > { %v18216_v56 = vadd.f32 %v8379_v25, %v18016_v8  ;;  %v13724_v33 = vpop.f32.mrf.mxu0  ;;  %13383 = vmatmul.mubr.msk.f32.vlgmr.msra.gmra.mxu0 %vm632_vm6, %v18090_v17 }
 0x408   : > { %v8383_v16 = vpop.f32.mrf.mxu1  ;;  %13380 = vmatmul.mubr.msk.f32.gmra.mxu1 %vm632_vm6, %v18185_v54  ;;  %v18229_v2 = vadd.f32 %v13724_v33, %v18029_v60  ;;  %13403 = vmatpush1.msk.msra.mxu0 %vm587_vm2, %v11647_v28 }
 0x409   : > { %v18226_v1 = vadd.f32 %v8383_v16, %v18026_v3  ;;  %11482 = vmatprep.mubr.f32.mxu0 %v18931_v27  ;;  %13784 = vmatprep.subr.msk.mxu0 %vm587_vm2, %v18210_v55  ;;  %v8466_v14 = vpop.f32.mrf.mxu0  ;;  %v18277_v52 = vpop.permute.xlu0 %12081 }
 0x40a   : > { %v8385_v8 = vpop.f32.mrf.mxu1  ;;  %13778 = vmatprep.mubr.msk.f32.mxu1 %vm632_vm6, %v18090_v17  ;;  %v18243_v60 = vadd.f32 %v8466_v14, %v18043_v23  ;;  %v11650_v17 = vsel %vm11644_vm0, %v18159_v13, %v18210_v55 }
 0x40b   : > { %v18240_v3 = vadd.f32 %v8385_v8, %v18040_v48  ;;  %v13727_v40 = vpop.f32.mrf.mxu0  ;;  %13384 = vmatmul.mubr.msk.f32.gmra.mxu0 %vm632_vm6, %v18123_v15  ;;  %v18254_v48 = vpop.permute.xlu1 %12077 }
 0x40c   : > { %v8389_v61 = vpop.f32.mrf.mxu1  ;;  %13779 = vmatmul.mubr.msk.f32.vlgmr.msra.gmra.mxu1 %vm632_vm6, %v18123_v15  ;;  %v18260_v6 = vadd.f32 %v13727_v40, %v18058_v39  ;;  %11488 = vmatprep.mubr.f32.mxu0 %v18931_v27  ;;  %v12089_v7 = vsel %vm12087_vm1, %v18200_v34, %v18254_v48 }
 0x40d   : > { %v18257_v23 = vadd.f32 %v8389_v61, %v18055_v0  ;;  %13397 = vmatpush1.msk.msra.mxu1 %vm587_vm2, %v11645_v57  ;;  %v8476_v15 = vpop.f32.mrf.mxu0  ;;  %13781 = vmatprep.mubr.msk.f32.mxu1 %vm632_vm6, %v18155_v49 }
 0x40e   : > { %13408 = vmatprep.subr.msk.mxu1 %vm587_vm2, %v11650_v17  ;;  %v8391_v46 = vpop.f32.mrf.mxu1  ;;  %v18271_v0 = vadd.f32 %v8476_v15, %v18071_v59 }
 0x40f   : > { %v18268_v21 = vadd.f32 %v8391_v46, %v18068_v18  ;;  %v8642_v39 = vpop.f32.mrf.mxu0  ;;  %13385 = vmatmul.mubr.msk.f32.gmra.mxu0 %vm632_vm6, %v18155_v49  ;;  %v18290_v18 = vld [vmem:[%s18905_s2 + $0x320] sm:$0xff]  ;;  %v18292_v62 = vpop.permute.xlu1 %12079 }
 0x410   : > { %v8395_v38 = vpop.f32.mrf.mxu1  ;;  %13782 = vmatmul.mubr.msk.f32.gmra.mxu1 %vm632_vm6, %v18185_v54  ;;  %v18283_v58 = vadd.f32 %v8642_v39, %v18083_v44  ;;  %11494 = vmatprep.mubr.f32.mxu0 %v18931_v27  ;;  %v11649_v44 = vsel %vm11644_vm0, %v18077_v41, %v18159_v13  ;;  %v18321_v41 = vld [vmem:[%s18905_s2 + $0x328] sm:$0xff] }
 0x411   : > { %v18280_v26 = vadd.f32 %v8395_v38, %v18080_v43  ;;  %11741 = vmatprep.mubr.f32.mxu1 %v18931_v27  ;;  %v8644_v49 = vpop.f32.mrf.mxu0 }
 0x412   : > { %v8397_v59 = vpop.f32.mrf.mxu1  ;;  %v18298_v43 = vadd.f32 %v8644_v49, %v18098_v4 }
 0x413   : > { %v18295_v42 = vadd.f32 %v8397_v59, %v18095_v5  ;;  %v8648_v45 = vpop.f32.mrf.mxu0  ;;  %13386 = vmatmul.mubr.msk.f32.gmra.mxu0 %vm632_vm6, %v18185_v54  ;;  %v12091_v5 = vsel %vm12087_vm1, %v18292_v62, %v18277_v52 }
 0x414   : > { %v8731_v22 = vpop.f32.mrf.mxu1  ;;  %13398 = vmatmul.mubr.msk.f32.vlgmr.msra.gmra.mxu1 %vm632_vm6, %v18290_v18  ;;  %v18311_v4 = vadd.f32 %v8648_v45, %v18113_v37  ;;  %11830 = vmatprep.mubr.f32.mxu0 %v18931_v27 }
 0x415   : > { %v18314_v50 = vadd.f32 %v8731_v22, %v18116_v32  ;;  %13409 = vmatpush1.msk.msra.mxu1 %vm587_vm2, %v11649_v44  ;;  %11747 = vmatprep.mubr.f32.mxu1 %v18931_v27  ;;  %v8650_v13 = vpop.f32.mrf.mxu0 }
 0x416   : > { %13429 = vmatprep.subr.msk.mxu1 %vm587_vm2, %v12091_v5  ;;  %v8733_v54 = vpop.f32.mrf.mxu1  ;;  %v18326_v37 = vadd.f32 %v8650_v13, %v18128_v19 }
 0x417   : > { %v18329_v32 = vadd.f32 %v8733_v54, %v18131_v36  ;;  %v8654_v31 = vpop.f32.mrf.mxu0  ;;  %13404 = vmatmul.mubr.msk.f32.vlgmr.msra.gmra.mxu0 %vm632_vm6, %v18290_v18  ;;  %v18350_v36 = vld [vmem:[%s18905_s2 + $0x330] sm:$0xff] }
 0x418   : > { %v8737_v51 = vpop.f32.mrf.mxu1  ;;  %13399 = vmatmul.mubr.msk.f32.gmra.mxu1 %vm632_vm6, %v18321_v41  ;;  %v18339_v25 = vadd.f32 %v8654_v31, %v18144_v63  ;;  %13785 = vmatpush3.msk.msra.mxu0 %vm587_vm2, %v18210_v55 }
 0x419   : > { %v18342_v19 = vadd.f32 %v8737_v51, %v18147_v10  ;;  %11753 = vmatprep.mubr.f32.mxu1 %v18931_v27  ;;  %13423 = vmatprep.subr.msk.mxu0 %vm587_vm2, %v12089_v7  ;;  %v8656_v28 = vpop.f32.mrf.mxu0 }
 0x41a   : > { %v8739_v16 = vpop.f32.mrf.mxu1  ;;  %11836 = vmatprep.mubr.f32.mxu0 %v18931_v27  ;;  %v18355_v63 = vadd.f32 %v8656_v28, %v18162_v11  ;;  %v18375_v11 = vld [vmem:[%s18905_s2 + $0x338] sm:$0xff] }
 0x41b   : > { %v18358_v10 = vadd.f32 %v8739_v16, %v18165_v9  ;;  %v8660_v55 = vpop.f32.mrf.mxu0  ;;  %13405 = vmatmul.mubr.msk.f32.gmra.mxu0 %vm632_vm6, %v18321_v41 }
 0x41c   : > { %v8743_v33 = vpop.f32.mrf.mxu1  ;;  %13400 = vmatmul.mubr.msk.f32.gmra.mxu1 %vm632_vm6, %v18350_v36  ;;  %v18365_v8 = vadd.f32 %v8660_v55, %v18175_v53  ;;  %11842 = vmatprep.mubr.f32.mxu0 %v18931_v27 }
 0x41d   : > { %v18368_v14 = vadd.f32 %v8743_v33, %v18178_v35  ;;  %11759 = vmatprep.mubr.f32.mxu1 %v18931_v27  ;;  %v8662_v9 = vpop.f32.mrf.mxu0 }
 0x41e   : > { %v8745_v57 = vpop.f32.mrf.mxu1  ;;  %v18378_v61 = vadd.f32 %v8662_v9, %v18188_v47 }
 0x41f   : > { %v18381_v53 = vadd.f32 %v8745_v57, %v18191_v24  ;;  %v8820_v35 = vpop.f32.mrf.mxu0  ;;  %13406 = vmatmul.mubr.msk.f32.gmra.mxu0 %vm632_vm6, %v18350_v36 }
 0x420   : > { %v8749_v40 = vpop.f32.mrf.mxu1  ;;  %13401 = vmatmul.mubr.msk.f32.gmra.mxu1 %vm632_vm6, %v18375_v11  ;;  %v18391_v46 = vadd.f32 %v8820_v35, %v18206_v30  ;;  %11848 = vmatprep.mubr.f32.mxu0 %v18931_v27  ;;  %v12086_v30 = vpop.permute.xlu0 %12085 }
 0x421   : > { %v18388_v17 = vadd.f32 %v8749_v40, %v18203_v29  ;;  %11919 = vmatprep.mubr.f32.mxu1 %v18931_v27  ;;  %v8822_v24 = vpop.f32.mrf.mxu0  ;;  %v12090_v29 = vsel %vm12087_vm1, %v18254_v48, %v18292_v62  ;;  %v12084_v62 = vpop.permute.xlu1 %12083 }
 0x422   : > { %v8751_v47 = vpop.f32.mrf.mxu1  ;;  %v18399_v38 = vadd.f32 %v8822_v24, %v18216_v56 }
 0x423   : > { %v18396_v15 = vadd.f32 %v8751_v47, %v18213_v20  ;;  %v8826_v39 = vpop.f32.mrf.mxu0  ;;  %13407 = vmatmul.mubr.msk.f32.gmra.mxu0 %vm632_vm6, %v18375_v11 }
 0x424   : > { %v13732_v59 = vpop.f32.mrf.mxu1  ;;  %13410 = vmatmul.mubr.msk.f32.vlgmr.msra.gmra.mxu1 %vm632_vm6, %v18290_v18  ;;  %v18409_v49 = vadd.f32 %v8826_v39, %v18226_v1  ;;  %13786 = vmatprep.mubr.msk.f32.mxu0 %vm632_vm6, %v18290_v18 }
 0x425   : > { %v18412_v20 = vadd.f32 %v13732_v59, %v18229_v2  ;;  %13430 = vmatpush1.msk.msra.mxu1 %vm587_vm2, %v12090_v29  ;;  %11925 = vmatprep.mubr.f32.mxu1 %v18931_v27  ;;  %v8828_v56 = vpop.f32.mrf.mxu0  ;;  %v12088_v2 = vsel %vm12087_vm1, %v18237_v12, %v18200_v34 }
 0x426   : > { %13792 = vmatprep.subr.msk.mxu1 %vm587_vm2, %v12086_v30  ;;  %v8909_v48 = vpop.f32.mrf.mxu1  ;;  %v18420_v44 = vadd.f32 %v8828_v56, %v18240_v3 }
 0x427   : > { %v18423_v1 = vadd.f32 %v8909_v48, %v18243_v60  ;;  %v8832_v45 = vpop.f32.mrf.mxu0  ;;  %13787 = vmatmul.mubr.msk.f32.vlgmr.msra.gmra.mxu0 %vm632_vm6, %v18321_v41  ;;  %v12093_v60 = vsel %vm12087_vm1, %v12084_v62, %v12086_v30 }
 0x428   : > { %v13735_v22 = vpop.f32.mrf.mxu1  ;;  %13411 = vmatmul.mubr.msk.f32.gmra.mxu1 %vm632_vm6, %v18321_v41  ;;  %v18433_v18 = vadd.f32 %v8832_v45, %v18257_v23  ;;  %13424 = vmatpush1.msk.msra.mxu0 %vm587_vm2, %v12088_v2 }
 0x429   : > { %v18436_v3 = vadd.f32 %v13735_v22, %v18260_v6  ;;  %11931 = vmatprep.mubr.f32.mxu1 %v18931_v27  ;;  %13435 = vmatprep.subr.msk.mxu0 %vm587_vm2, %v12093_v60  ;;  %v8834_v34 = vpop.f32.mrf.mxu0 }
 0x42a   : > { %v8919_v12 = vpop.f32.mrf.mxu1  ;;  %13789 = vmatprep.mubr.msk.f32.mxu0 %vm632_vm6, %v18350_v36  ;;  %v18445_v5 = vadd.f32 %v8834_v34, %v18268_v21  ;;  %v18465_v21 = vld [vmem:[%s18905_s2 + $0x340] sm:$0xff] }
 0x42b   : > { %v18448_v23 = vadd.f32 %v8919_v12, %v18271_v0  ;;  %v8838_v6 = vpop.f32.mrf.mxu0  ;;  %13790 = vmatmul.mubr.msk.f32.gmra.mxu0 %vm632_vm6, %v18375_v11 }
 0x42c   : > { %v9085_v41 = vpop.f32.mrf.mxu1  ;;  %13412 = vmatmul.mubr.msk.f32.gmra.mxu1 %vm632_vm6, %v18350_v36  ;;  %v18455_v13 = vadd.f32 %v8838_v6, %v18280_v26  ;;  %12184 = vmatprep.mubr.f32.mxu0 %v18931_v27 }
 0x42d   : > { %v18458_v54 = vadd.f32 %v9085_v41, %v18283_v58  ;;  %11937 = vmatprep.mubr.f32.mxu1 %v18931_v27  ;;  %v8840_v0 = vpop.f32.mrf.mxu0  ;;  %v12092_v58 = vsel %vm12087_vm1, %v18277_v52, %v12084_v62  ;;  %v13420_v52 = vld [vmem:[%s18905_s2 + $0x348] sm:$0xff] }
 0x42e   : > { %v9087_v31 = vpop.f32.mrf.mxu1  ;;  %v18468_v51 = vadd.f32 %v8840_v0, %v18295_v42 }
 0x42f   : > { %v18471_v26 = vadd.f32 %v9087_v31, %v18298_v43  ;;  %v9174_v36 = vpop.f32.mrf.mxu0  ;;  %13425 = vmatmul.mubr.msk.f32.vlgmr.msra.gmra.mxu0 %vm632_vm6, %v18465_v21 }
 0x430   : > { %v9091_v7 = vpop.f32.mrf.mxu1  ;;  %13413 = vmatmul.mubr.msk.f32.gmra.mxu1 %vm632_vm6, %v18375_v11  ;;  %v18483_v42 = vadd.f32 %v9174_v36, %v18314_v50  ;;  %13436 = vmatpush1.msk.msra.mxu0 %vm587_vm2, %v12092_v58 }
 0x431   : > { %v18480_v28 = vadd.f32 %v9091_v7, %v18311_v4  ;;  %12190 = vmatprep.mubr.f32.mxu0 %v18931_v27  ;;  %v9176_v16 = vpop.f32.mrf.mxu0  ;;  %12273 = vmatprep.mubr.f32.mxu1 %v18931_v27 }
 0x432   : > { %v9093_v43 = vpop.f32.mrf.mxu1  ;;  %v18495_v4 = vadd.f32 %v9176_v16, %v18329_v32 }
 0x433   : > { %v18492_v55 = vadd.f32 %v9093_v43, %v18326_v37  ;;  %v9180_v33 = vpop.f32.mrf.mxu0  ;;  %13426 = vmatmul.mubr.msk.f32.gmra.mxu0 %vm632_vm6, %v13420_v52  ;;  %v13421_v37 = vld [vmem:[%s18905_s2 + $0x350] sm:$0xff] }
 0x434   : > { %v9097_v50 = vpop.f32.mrf.mxu1  ;;  %13431 = vmatmul.mubr.msk.f32.vlgmr.msra.gmra.mxu1 %vm632_vm6, %v18465_v21  ;;  %v18504_v9 = vadd.f32 %v9180_v33, %v18342_v19  ;;  %12196 = vmatprep.mubr.f32.mxu0 %v18931_v27 }
 0x435   : > { %v18501_v11 = vadd.f32 %v9097_v50, %v18339_v25  ;;  %13793 = vmatpush3.msk.msra.mxu1 %vm587_vm2, %v12086_v30  ;;  %v9182_v57 = vpop.f32.mrf.mxu0  ;;  %12279 = vmatprep.mubr.f32.mxu1 %v18931_v27  ;;  %vm12586_vm2 = vcmask 261120  }
 0x436   : > { %v9099_v32 = vpop.f32.mrf.mxu1  ;;  %v18516_v25 = vadd.f32 %v9182_v57, %v18358_v10 }
 0x437   : > { %v18513_v40 = vadd.f32 %v9099_v32, %v18355_v63  ;;  %v9186_v35 = vpop.f32.mrf.mxu0  ;;  %13427 = vmatmul.mubr.msk.f32.gmra.mxu0 %vm632_vm6, %v13421_v37  ;;  %v13422_v63 = vld [vmem:[%s18905_s2 + $0x358] sm:$0xff] }
 0x438   : > { %v9103_v19 = vpop.f32.mrf.mxu1  ;;  %13432 = vmatmul.mubr.msk.f32.gmra.mxu1 %vm632_vm6, %v13420_v52  ;;  %v18524_v24 = vadd.f32 %v9186_v35, %v18368_v14  ;;  %12202 = vmatprep.mubr.f32.mxu0 %v18931_v27 }
 0x439   : > { %v18521_v47 = vadd.f32 %v9103_v19, %v18365_v8  ;;  %12285 = vmatprep.mubr.f32.mxu1 %v18931_v27  ;;  %v9188_v29 = vpop.f32.mrf.mxu0 }
 0x43a   : > { %v9105_v10 = vpop.f32.mrf.mxu1  ;;  %v18535_v59 = vadd.f32 %v9188_v29, %v18381_v53 }
 0x43b   : > { %v18532_v39 = vadd.f32 %v9105_v10, %v18378_v61  ;;  %v9192_v8 = vpop.f32.mrf.mxu0  ;;  %13428 = vmatmul.mubr.msk.f32.gmra.mxu0 %vm632_vm6, %v13422_v63 }
 0x43c   : > { %v9263_v30 = vpop.f32.mrf.mxu1  ;;  %13433 = vmatmul.mubr.msk.f32.gmra.mxu1 %vm632_vm6, %v13421_v37  ;;  %v18540_v14 = vadd.f32 %v9192_v8, %v18388_v17  ;;  %12362 = vmatprep.mubr.f32.mxu0 %v18931_v27 }
 0x43d   : > { %v18543_v56 = vadd.f32 %v9263_v30, %v18391_v46  ;;  %12291 = vmatprep.mubr.f32.mxu1 %v18931_v27  ;;  %v9194_v61 = vpop.f32.mrf.mxu0 }
 0x43e   : > { %v9265_v48 = vpop.f32.mrf.mxu1  ;;  %v18548_v53 = vadd.f32 %v9194_v61, %v18396_v15 }
 0x43f   : > { %v18551_v62 = vadd.f32 %v9265_v48, %v18399_v38  ;;  %v13740_v45 = vpop.f32.mrf.mxu0  ;;  %13437 = vmatmul.mubr.msk.f32.vlgmr.msra.gmra.mxu0 %vm632_vm6, %v18465_v21 }
 0x440   : > { %v9269_v2 = vpop.f32.mrf.mxu1  ;;  %13434 = vmatmul.mubr.msk.f32.gmra.mxu1 %vm632_vm6, %v13422_v63  ;;  %v18560_v46 = vadd.f32 %v13740_v45, %v18412_v20  ;;  %12368 = vmatprep.mubr.f32.mxu0 %v18931_v27 }
 0x441   : > { %v18557_v17 = vadd.f32 %v9269_v2, %v18409_v49  ;;  %13794 = vmatprep.mubr.msk.f32.mxu1 %vm632_vm6, %v18465_v21  ;;  %v9352_v38 = vpop.f32.mrf.mxu0 }
 0x442   : > { %v9271_v15 = vpop.f32.mrf.mxu1  ;;  %v18569_v60 = vadd.f32 %v9352_v38, %v18423_v1 }
 0x443   : > { %v18566_v22 = vadd.f32 %v9271_v15, %v18420_v44  ;;  %v13743_v12 = vpop.f32.mrf.mxu0  ;;  %13438 = vmatmul.mubr.msk.f32.gmra.mxu0 %vm632_vm6, %v13420_v52 }
 0x444   : > { %v9275_v34 = vpop.f32.mrf.mxu1  ;;  %13795 = vmatmul.mubr.msk.f32.vlgmr.msra.gmra.mxu1 %vm632_vm6, %v13420_v52  ;;  %v9398_v20 = vadd.f32 %v13743_v12, %v18436_v3  ;;  %12374 = vmatprep.mubr.f32.mxu0 %v18931_v27 }
 0x445   : > { %v9389_v49 = vadd.f32 %v9275_v34, %v18433_v18  ;;  %13797 = vmatprep.mubr.msk.f32.mxu1 %vm632_vm6, %v13421_v37  ;;  %v9362_v44 = vpop.f32.mrf.mxu0 }
 0x446   : > { %v9277_v6 = vpop.f32.mrf.mxu1  ;;  %v9391_v1 = vadd.f32 %v9362_v44, %v18448_v23 }
 0x447   : > { %v9390_v41 = vadd.f32 %v9277_v6, %v18445_v5  ;;  %v9528_v0 = vpop.f32.mrf.mxu0  ;;  %13439 = vmatmul.mubr.msk.f32.gmra.mxu0 %vm632_vm6, %v13421_v37 }
 0x448   : > { %v9281_v21 = vpop.f32.mrf.mxu1  ;;  %13798 = vmatmul.mubr.msk.f32.gmra.mxu1 %vm632_vm6, %v13422_v63  ;;  %v9814_v3 = vadd.f32 %v9528_v0, %v18458_v54  ;;  %12380 = vmatprep.mubr.f32.mxu0 %v18931_v27 }
 0x449   : > { %v9396_v18 = vadd.f32 %v9281_v21, %v18455_v13  ;;  %v9530_v58 = vpop.f32.mrf.mxu0 }
 0x44a   : > { %v9283_v31 = vpop.f32.mrf.mxu1  ;;  %v9815_v5 = vadd.f32 %v9530_v58, %v18471_v26 }
 0x44b   : > { %v9397_v7 = vadd.f32 %v9283_v31, %v18468_v51  ;;  %v9534_v36 = vpop.f32.mrf.mxu0  ;;  %13440 = vmatmul.mubr.msk.f32.gmra.mxu0 %vm632_vm6, %v13422_v63 }
 0x44c   : > { %v9617_v23 = vpop.f32.mrf.mxu1  ;;  %v9821_v52 = vadd.f32 %v9534_v36, %v18480_v28 }
 0x44d   : > { %v9816_v43 = vadd.f32 %v9617_v23, %v18483_v42  ;;  %v9536_v16 = vpop.f32.mrf.mxu0 }
 0x44e   : > { %v9619_v13 = vpop.f32.mrf.mxu1  ;;  %v9822_v54 = vadd.f32 %v9536_v16, %v18492_v55 }
 0x44f   : > { %v9817_v27 = vadd.f32 %v9619_v13, %v18495_v4  ;;  %v9540_v50 = vpop.f32.mrf.mxu0 }
 0x450   : > { %v9623_v33 = vpop.f32.mrf.mxu1  ;;  %v9828_v51 = vadd.f32 %v9540_v50, %v18501_v11 }
 0x451   : > { %v9823_v26 = vadd.f32 %v9623_v33, %v18504_v9  ;;  %v9542_v37 = vpop.f32.mrf.mxu0 }
 0x452   : > { %v9625_v32 = vpop.f32.mrf.mxu1  ;;  %v9829_v57 = vadd.f32 %v9542_v37, %v18513_v40 }
 0x453   : > { %v9824_v28 = vadd.f32 %v9625_v32, %v18516_v25  ;;  %v9546_v19 = vpop.f32.mrf.mxu0 }
 0x454   : > { %v9629_v42 = vpop.f32.mrf.mxu1  ;;  %v9835_v35 = vadd.f32 %v9546_v19, %v18521_v47 }
 0x455   : > { %v9830_v55 = vadd.f32 %v9629_v42, %v18524_v24  ;;  %v9548_v63 = vpop.f32.mrf.mxu0 }
 0x456   : > { %v9631_v4 = vpop.f32.mrf.mxu1  ;;  %v9836_v10 = vadd.f32 %v9548_v63, %v18532_v39 }
 0x457   : > { %v9831_v11 = vadd.f32 %v9631_v4, %v18535_v59  ;;  %v9706_v9 = vpop.f32.mrf.mxu0 }
 0x458   : > { %v9635_v29 = vpop.f32.mrf.mxu1  ;;  %v9818_v40 = vadd.f32 %v9706_v9, %v18543_v56 }
 0x459   : > { %v9837_v8 = vadd.f32 %v9635_v29, %v18540_v14  ;;  %v9708_v25 = vpop.f32.mrf.mxu0 }
 0x45a   : > { %v9637_v30 = vpop.f32.mrf.mxu1  ;;  %v9819_v47 = vadd.f32 %v9708_v25, %v18551_v62 }
 0x45b   : > { %v9838_v61 = vadd.f32 %v9637_v30, %v18548_v53  ;;  %v9712_v48 = vpop.f32.mrf.mxu0 }
 0x45c   : > { %v13748_v24 = vpop.f32.mrf.mxu1  ;;  %v9825_v2 = vadd.f32 %v9712_v48, %v18557_v17 }
 0x45d   : > { %v9827_v39 = vadd.f32 %v13748_v24, %v18560_v46  ;;  %v9714_v45 = vpop.f32.mrf.mxu0 }
 0x45e   : > { %v9795_v59 = vpop.f32.mrf.mxu1  ;;  %v9826_v15 = vadd.f32 %v9714_v45, %v18566_v22 }
 0x45f   : > { %v9820_v14 = vadd.f32 %v9795_v59, %v18569_v60  ;;  %v9718_v38 = vpop.f32.mrf.mxu0 }
 0x460   : > { %v13751_v56 = vpop.f32.mrf.mxu1  ;;  %v9832_v34 = vadd.f32 %v9718_v38, %v9389_v49 }
 0x461   : > { %v9841_v12 = vadd.f32 %v13751_v56, %v9398_v20  ;;  %v9720_v6 = vpop.f32.mrf.mxu0 }
 0x462   : > { %v9805_v53 = vpop.f32.mrf.mxu1  ;;  %v9833_v44 = vadd.f32 %v9720_v6, %v9390_v41 }
 0x463   : > { %v9834_v62 = vadd.f32 %v9805_v53, %v9391_v1  ;;  %v9724_v21 = vpop.f32.mrf.mxu0 }
 0x464   : > { %v9971_v0 = vpop.f32.mrf.mxu1  ;;  %v9839_v31 = vadd.f32 %v9724_v21, %v9396_v18 }
 0x465   : > { %v10257_v17 = vadd.f32 %v9971_v0, %v9814_v3  ;;  %v9726_v58 = vpop.f32.mrf.mxu0 }
 0x466   : > { %v9973_v46 = vpop.f32.mrf.mxu1  ;;  %v9840_v36 = vadd.f32 %v9726_v58, %v9397_v7 }
 0x467   : > { %v10258_v23 = vadd.f32 %v9973_v46, %v9815_v5  ;;  %v10060_v22 = vpop.f32.mrf.mxu0 }
 0x468   : > { %v9977_v16 = vpop.f32.mrf.mxu1  ;;  %v10259_v60 = vadd.f32 %v10060_v22, %v9816_v43 }
 0x469   : > { %v10264_v13 = vadd.f32 %v9977_v16, %v9821_v52  ;;  %v10062_v33 = vpop.f32.mrf.mxu0 }
 0x46a   : > { %v9979_v50 = vpop.f32.mrf.mxu1  ;;  %v10260_v20 = vadd.f32 %v10062_v33, %v9817_v27 }
 0x46b   : > { %v10265_v49 = vadd.f32 %v9979_v50, %v9822_v54  ;;  %v10066_v32 = vpop.f32.mrf.mxu0 }
 0x46c   : > { %v9983_v37 = vpop.f32.mrf.mxu1  ;;  %v10266_v1 = vadd.f32 %v10066_v32, %v9823_v26 }
 0x46d   : > { %v10271_v41 = vadd.f32 %v9983_v37, %v9828_v51  ;;  %v10068_v42 = vpop.f32.mrf.mxu0 }
 0x46e   : > { %v9985_v19 = vpop.f32.mrf.mxu1  ;;  %v10267_v3 = vadd.f32 %v10068_v42, %v9824_v28 }
 0x46f   : > { %v10272_v18 = vadd.f32 %v9985_v19, %v9829_v57  ;;  %v10072_v4 = vpop.f32.mrf.mxu0 }
 0x470   : > { %v9989_v63 = vpop.f32.mrf.mxu1  ;;  %v10273_v5 = vadd.f32 %v10072_v4, %v9830_v55 }
 0x471   : > { %v10278_v7 = vadd.f32 %v9989_v63, %v9835_v35  ;;  %v10074_v9 = vpop.f32.mrf.mxu0 }
 0x472   : > { %v9991_v29 = vpop.f32.mrf.mxu1  ;;  %v10274_v43 = vadd.f32 %v10074_v9, %v9831_v11 }
 0x473   : > { %v10279_v52 = vadd.f32 %v9991_v29, %v9836_v10  ;;  %v10078_v30 = vpop.f32.mrf.mxu0 }
 0x474   : > { %v10149_v25 = vpop.f32.mrf.mxu1  ;;  %v10280_v54 = vadd.f32 %v10078_v30, %v9837_v8 }
 0x475   : > { %v10261_v27 = vadd.f32 %v10149_v25, %v9818_v40  ;;  %v10080_v48 = vpop.f32.mrf.mxu0 }
 0x476   : > { %v10151_v24 = vpop.f32.mrf.mxu1  ;;  %v10281_v51 = vadd.f32 %v10080_v48, %v9838_v61 }
 0x477   : > { %v10262_v26 = vadd.f32 %v10151_v24, %v9819_v47  ;;  %v13756_v59 = vpop.f32.mrf.mxu0 }
 0x478   : > { %v10155_v45 = vpop.f32.mrf.mxu1  ;;  %v10270_v28 = vadd.f32 %v13756_v59, %v9827_v39 }
 0x479   : > { %v10268_v57 = vadd.f32 %v10155_v45, %v9825_v2  ;;  %v10238_v56 = vpop.f32.mrf.mxu0 }
 0x47a   : > { %v10157_v38 = vpop.f32.mrf.mxu1  ;;  %v10263_v55 = vadd.f32 %v10238_v56, %v9820_v14 }
 0x47b   : > { %v10269_v35 = vadd.f32 %v10157_v38, %v9826_v15  ;;  %v13759_v53 = vpop.f32.mrf.mxu0 }
 0x47c   : > { %v10161_v6 = vpop.f32.mrf.mxu1  ;;  %v10284_v11 = vadd.f32 %v13759_v53, %v9841_v12 }
 0x47d   : > { %v10275_v10 = vadd.f32 %v10161_v6, %v9832_v34  ;;  %v10248_v0 = vpop.f32.mrf.mxu0 }
 0x47e   : > { %v10163_v21 = vpop.f32.mrf.mxu1  ;;  %v10277_v40 = vadd.f32 %v10248_v0, %v9834_v62 }
 0x47f   : > { %v10276_v8 = vadd.f32 %v10163_v21, %v9833_v44  ;;  %v10414_v46 = vpop.f32.mrf.mxu0 }
 0x480   : > { %v10167_v58 = vpop.f32.mrf.mxu1  ;;  %v10700_v47 = vadd.f32 %v10414_v46, %v10257_v17 }
 0x481   : > { %v10282_v61 = vadd.f32 %v10167_v58, %v9839_v31  ;;  %v10416_v22 = vpop.f32.mrf.mxu0 }
 0x482   : > { %v10169_v16 = vpop.f32.mrf.mxu1  ;;  %v10701_v39 = vadd.f32 %v10416_v22, %v10258_v23 }
 0x483   : > { %v10283_v2 = vadd.f32 %v10169_v16, %v9840_v36  ;;  %v10420_v50 = vpop.f32.mrf.mxu0 }
 0x484   : > { %v10503_v33 = vpop.f32.mrf.mxu1  ;;  %v10707_v15 = vadd.f32 %v10420_v50, %v10264_v13 }
 0x485   : > { %v10702_v14 = vadd.f32 %v10503_v33, %v10259_v60  ;;  %v10422_v37 = vpop.f32.mrf.mxu0 }
 0x486   : > { %v10505_v32 = vpop.f32.mrf.mxu1  ;;  %v10708_v34 = vadd.f32 %v10422_v37, %v10265_v49 }
 0x487   : > { %v10703_v12 = vadd.f32 %v10505_v32, %v10260_v20  ;;  %v10426_v19 = vpop.f32.mrf.mxu0 }
 0x488   : > { %v10509_v42 = vpop.f32.mrf.mxu1  ;;  %v10714_v44 = vadd.f32 %v10426_v19, %v10271_v41 }
 0x489   : > { %v10709_v62 = vadd.f32 %v10509_v42, %v10266_v1  ;;  %v10428_v63 = vpop.f32.mrf.mxu0 }
 0x48a   : > { %v10511_v4 = vpop.f32.mrf.mxu1  ;;  %v10715_v31 = vadd.f32 %v10428_v63, %v10272_v18 }
 0x48b   : > { %v10710_v17 = vadd.f32 %v10511_v4, %v10267_v3  ;;  %v10432_v29 = vpop.f32.mrf.mxu0 }
 0x48c   : > { %v10515_v9 = vpop.f32.mrf.mxu1  ;;  %v10721_v36 = vadd.f32 %v10432_v29, %v10278_v7 }
 0x48d   : > { %v10716_v23 = vadd.f32 %v10515_v9, %v10273_v5  ;;  %v10434_v30 = vpop.f32.mrf.mxu0 }
 0x48e   : > { %v10517_v25 = vpop.f32.mrf.mxu1  ;;  %v10722_v13 = vadd.f32 %v10434_v30, %v10279_v52 }
 0x48f   : > { %v10717_v60 = vadd.f32 %v10517_v25, %v10274_v43  ;;  %v10592_v24 = vpop.f32.mrf.mxu0 }
 0x490   : > { %v10521_v48 = vpop.f32.mrf.mxu1  ;;  %v10704_v20 = vadd.f32 %v10592_v24, %v10261_v27 }
 0x491   : > { %v10723_v49 = vadd.f32 %v10521_v48, %v10280_v54  ;;  %v10594_v59 = vpop.f32.mrf.mxu0 }
 0x492   : > { %v10523_v45 = vpop.f32.mrf.mxu1  ;;  %v10705_v1 = vadd.f32 %v10594_v59, %v10262_v26 }
 0x493   : > { %v10724_v41 = vadd.f32 %v10523_v45, %v10281_v51  ;;  %v10598_v38 = vpop.f32.mrf.mxu0 }
 0x494   : > { %v13764_v56 = vpop.f32.mrf.mxu1  ;;  %v10711_v18 = vadd.f32 %v10598_v38, %v10268_v57 }
 0x495   : > { %v10713_v3 = vadd.f32 %v13764_v56, %v10270_v28  ;;  %v10600_v6 = vpop.f32.mrf.mxu0 }
 0x496   : > { %v10681_v53 = vpop.f32.mrf.mxu1  ;;  %v10712_v7 = vadd.f32 %v10600_v6, %v10269_v35 }
 0x497   : > { %v10706_v5 = vadd.f32 %v10681_v53, %v10263_v55  ;;  %v10604_v21 = vpop.f32.mrf.mxu0 }
 0x498   : > { %v13767_v0 = vpop.f32.mrf.mxu1  ;;  %v10718_v52 = vadd.f32 %v10604_v21, %v10275_v10 }
 0x499   : > { %v10727_v43 = vadd.f32 %v13767_v0, %v10284_v11  ;;  %v10606_v58 = vpop.f32.mrf.mxu0 }
 0x49a   : > { %v10691_v46 = vpop.f32.mrf.mxu1  ;;  %v10719_v54 = vadd.f32 %v10606_v58, %v10276_v8 }
 0x49b   : > { %v10720_v27 = vadd.f32 %v10691_v46, %v10277_v40  ;;  %v10610_v16 = vpop.f32.mrf.mxu0 }
 0x49c   : > { %v10857_v22 = vpop.f32.mrf.mxu1  ;;  %v10725_v51 = vadd.f32 %v10610_v16, %v10282_v61 }
 0x49d   : > { %v18607_v26 = vadd.f32 %v10857_v22, %v10700_v47  ;;  %v10612_v50 = vpop.f32.mrf.mxu0 }
 0x49e   : > { %v10859_v57 = vpop.f32.mrf.mxu1  ;;  %v10726_v28 = vadd.f32 %v10612_v50, %v10283_v2 }
 0x49f   : > { %v18609_v33 = vadd.f32 %v10859_v57, %v10701_v39  ;;  %v10946_v55 = vpop.f32.mrf.mxu0 }
 0x4a0   : > { %v10863_v35 = vpop.f32.mrf.mxu1  ;;  %v18613_v10 = vadd.f32 %v10946_v55, %v10702_v14 }
 0x4a1   : > { %v18611_v37 = vadd.f32 %v10863_v35, %v10707_v15  ;;  %v10948_v32 = vpop.f32.mrf.mxu0 }
 0x4a2   : > { %v10865_v11 = vpop.f32.mrf.mxu1  ;;  %v18617_v40 = vadd.f32 %v10948_v32, %v10703_v12 }
 0x4a3   : > { %v18615_v8 = vadd.f32 %v10865_v11, %v10708_v34  ;;  %v10952_v47 = vpop.f32.mrf.mxu0 }
 0x4a4   : > { %v10869_v61 = vpop.f32.mrf.mxu1  ;;  %v18621_v42 = vadd.f32 %v10952_v47, %v10709_v62 }
 0x4a5   : > { %v18619_v19 = vadd.f32 %v10869_v61, %v10714_v44  ;;  %v10954_v39 = vpop.f32.mrf.mxu0 }
 0x4a6   : > { %v10871_v2 = vpop.f32.mrf.mxu1  ;;  %v18625_v15 = vadd.f32 %v10954_v39, %v10710_v17 }
 0x4a7   : > { %v18623_v63 = vadd.f32 %v10871_v2, %v10715_v31  ;;  %v10958_v4 = vpop.f32.mrf.mxu0 }
 0x4a8   : > { %v10875_v14 = vpop.f32.mrf.mxu1  ;;  %v18629_v34 = vadd.f32 %v10958_v4, %v10716_v23 }
 0x4a9   : > { %v18627_v29 = vadd.f32 %v10875_v14, %v10721_v36  ;;  %v10960_v9 = vpop.f32.mrf.mxu0 }
 0x4aa   : > { %v10877_v12 = vpop.f32.mrf.mxu1  ;;  %v18633_v44 = vadd.f32 %v10960_v9, %v10717_v60 }
 0x4ab   : > { %v18631_v30 = vadd.f32 %v10877_v12, %v10722_v13  ;;  %v10964_v62 = vpop.f32.mrf.mxu0 }
 0x4ac   : > { %v11035_v25 = vpop.f32.mrf.mxu1  ;;  %v18635_v48 = vadd.f32 %v10964_v62, %v10723_v49 }
 0x4ad   : > { %v18637_v31 = vadd.f32 %v11035_v25, %v10704_v20  ;;  %v10966_v17 = vpop.f32.mrf.mxu0 }
 0x4ae   : > { %v11037_v24 = vpop.f32.mrf.mxu1  ;;  %v18639_v45 = vadd.f32 %v10966_v17, %v10724_v41 }
 0x4af   : > { %v18641_v36 = vadd.f32 %v11037_v24, %v10705_v1  ;;  %v13772_v59 = vpop.f32.mrf.mxu0 }
 0x4b0   : > { %v11041_v23 = vpop.f32.mrf.mxu1  ;;  %v18645_v13 = vadd.f32 %v13772_v59, %v10713_v3 }
 0x4b1   : > { %v18643_v38 = vadd.f32 %v11041_v23, %v10711_v18  ;;  %v11124_v56 = vpop.f32.mrf.mxu0 }
 0x4b2   : > { %v11043_v60 = vpop.f32.mrf.mxu1  ;;  %v18649_v49 = vadd.f32 %v11124_v56, %v10706_v5 }
 0x4b3   : > { %v18647_v6 = vadd.f32 %v11043_v60, %v10712_v7  ;;  %v13775_v53 = vpop.f32.mrf.mxu0 }
 0x4b4   : > { %v11047_v20 = vpop.f32.mrf.mxu1  ;;  %v18653_v41 = vadd.f32 %v13775_v53, %v10727_v43 }
 0x4b5   : > { %v18651_v21 = vadd.f32 %v11047_v20, %v10718_v52  ;;  %v11134_v0 = vpop.f32.mrf.mxu0 }
 0x4b6   : > { %v11049_v1 = vpop.f32.mrf.mxu1  ;;  %v18657_v18 = vadd.f32 %v11134_v0, %v10720_v27 }
 0x4b7   : > { %v18655_v58 = vadd.f32 %v11049_v1, %v10719_v54  ;;  %v11300_v46 = vpop.f32.mrf.mxu0 }
 0x4b8   : > { %18954 = vst [vmem:[#allocation5_spill] sm:$0xff] %v18657_v18  ;;  %v11053_v3 = vpop.f32.mrf.mxu1 }
 0x4b9   : > { %18953 = vst [vmem:[#allocation6_spill] sm:$0xff] %v18655_v58  ;;  %v18659_v16 = vadd.f32 %v11053_v3, %v10725_v51  ;;  %v11302_v22 = vpop.f32.mrf.mxu0 }
 0x4ba   : > { %v11055_v7 = vpop.f32.mrf.mxu1 }
 0x4bb   : > { %18955 = vst [vmem:[#allocation4_spill] sm:$0xff] %v18659_v16  ;;  %v18661_v5 = vadd.f32 %v11055_v7, %v10726_v28  ;;  %v11306_v50 = vpop.f32.mrf.mxu0 }
 0x4bc   : > { %v11389_v57 = vpop.f32.mrf.mxu1 }
 0x4bd   : > { %18956 = vst [vmem:[#allocation3_spill] sm:$0xff] %v18661_v5  ;;  %v11308_v52 = vpop.f32.mrf.mxu0 }
 0x4be   : > { %v11391_v35 = vpop.f32.mrf.mxu1 }
 0x4bf   : > { %v11312_v43 = vpop.f32.mrf.mxu0 }
 0x4c0   : > { %v11395_v55 = vpop.f32.mrf.mxu1 }
 0x4c1   : > { %v11314_v11 = vpop.f32.mrf.mxu0 }
 0x4c2   : > { %v11397_v32 = vpop.f32.mrf.mxu1 }
 0x4c3   : > { %v11318_v54 = vpop.f32.mrf.mxu0 }
 0x4c4   : > { %v11401_v61 = vpop.f32.mrf.mxu1 }
 0x4c5   : > { %v11320_v27 = vpop.f32.mrf.mxu0 }
 0x4c6   : > { %v11403_v47 = vpop.f32.mrf.mxu1 }
 0x4c7   : > { %v11478_v39 = vpop.f32.mrf.mxu0 }
 0x4c8   : > { %v11407_v2 = vpop.f32.mrf.mxu1 }
 0x4c9   : > { %v11480_v14 = vpop.f32.mrf.mxu0 }
 0x4ca   : > { %v11409_v51 = vpop.f32.mrf.mxu1 }
 0x4cb   : > { %v11484_v4 = vpop.f32.mrf.mxu0 }
 0x4cc   : > { %v13780_v12 = vpop.f32.mrf.mxu1 }
 0x4cd   : > { %v11486_v28 = vpop.f32.mrf.mxu0 }
 0x4ce   : > { %v11567_v9 = vpop.f32.mrf.mxu1 }
 0x4cf   : > { %v18663_v62 = vpop.f32.mrf.mxu0 }
 0x4d0   : > { %v18665_v25 = vpop.f32.mrf.mxu1 }
 0x4d1   : > { %18957 = vst [vmem:[#allocation10_spill] sm:$0xff] %v18665_v25  ;;  %v18667_v17 = vpop.f32.mrf.mxu0 }
 0x4d2   : > { %18958 = vst [vmem:[#allocation9_spill] sm:$0xff] %v18667_v17  ;;  %v18669_v24 = vpop.f32.mrf.mxu1 }
 0x4d3   : > { %18959 = vst [vmem:[#allocation7_spill] sm:$0xff] %v18669_v24  ;;  %v18671_v23 = vpop.f32.mrf.mxu0 }
 0x4d4   : > { %18960 = vst [vmem:[#allocation8_spill] sm:$0xff] %v18671_v23  ;;  %v11743_v59 = vpop.f32.mrf.mxu1 }
 0x4d5   : > { %v18673_v60 = vpop.f32.mrf.mxu0 }
 0x4d6   : > { %18961 = vst [vmem:[#allocation15_spill] sm:$0xff] %v18673_v60  ;;  %v11745_v56 = vpop.f32.mrf.mxu1 }
 0x4d7   : > { %v11832_v53 = vpop.f32.mrf.mxu0 }
 0x4d8   : > { %v11749_v20 = vpop.f32.mrf.mxu1 }
 0x4d9   : > { %v11834_v0 = vpop.f32.mrf.mxu0 }
 0x4da   : > { %v11751_v1 = vpop.f32.mrf.mxu1 }
 0x4db   : > { %v18677_v7 = vpop.f32.mrf.mxu0 }
 0x4dc   : > { %v18675_v3 = vpop.f32.mrf.mxu1  ;;  %18963 = vst [vmem:[#allocation12_spill] sm:$0xff] %v18677_v7 }
 0x4dd   : > { %18962 = vst [vmem:[#allocation14_spill] sm:$0xff] %v18675_v3  ;;  %v18681_v16 = vpop.f32.mrf.mxu0 }
 0x4de   : > { %v18679_v5 = vpop.f32.mrf.mxu1  ;;  %18965 = vst [vmem:[#allocation17_spill] sm:$0xff] %v18681_v16 }
 0x4df   : > { %18964 = vst [vmem:[#allocation11_spill] sm:$0xff] %v18679_v5  ;;  %v18685_v24 = vpop.f32.mrf.mxu0 }
 0x4e0   : > { %v18683_v18 = vpop.f32.mrf.mxu1  ;;  %18967 = vst [vmem:[#allocation16_spill] sm:$0xff] %v18685_v24 }
 0x4e1   : > { %18966 = vst [vmem:[#allocation13_spill] sm:$0xff] %v18683_v18  ;;  %v18689_v60 = vpop.f32.mrf.mxu0 }
 0x4e2   : > { %v18687_v23 = vpop.f32.mrf.mxu1  ;;  %18969 = vst [vmem:[#allocation19_spill] sm:$0xff] %v18689_v60 }
 0x4e3   : > { %18968 = vst [vmem:[#allocation18_spill] sm:$0xff] %v18687_v23  ;;  %v18691_v17 = vpop.f32.mrf.mxu0  ;;  %v11586_v23 = vadd.f32 %v11300_v46, %v18607_v26  ;;  %v11601_v26 = vadd.f32 %v11314_v11, %v18623_v63  ;;  %v18740_v63 = vadd.f32 %v11478_v39, %v18637_v31  ;;  %v18757_v31 = vadd.f32 %v11486_v28, %v18647_v6  ;;  %v18779_v39 = vpop.permute.xlu0 %12511 }
 0x4e4   : > { %v18693_v58 = vpop.f32.mrf.mxu1 }
 0x4e5   : > { %18970 = vst [vmem:[#allocation20_spill] sm:$0xff] %v18693_v58  ;;  %v18695_v25 = vpop.f32.mrf.mxu0  ;;  %v11587_v58 = vadd.f32 %v11302_v22, %v18609_v33  ;;  %v11596_v33 = vadd.f32 %v11397_v32, %v18625_v15  ;;  %v12029_v22 = vadd.f32 %v11743_v59, %v11586_v23 }
 0x4e6   : > { %18971 = vst [vmem:[#allocation21_spill] sm:$0xff] %v18695_v25  ;;  %v18697_v3 = vpop.f32.mrf.mxu1  ;;  %v11593_v25 = vadd.f32 %v11306_v50, %v18611_v37  ;;  %v11607_v37 = vadd.f32 %v11318_v54, %v18627_v29  ;;  %v18748_v50 = vadd.f32 %v11480_v14, %v18641_v36  ;;  %v18980_v14 = vld [vmem:[#allocation9_spill] sm:$0xff] }
 0x4e7   : > { %18972 = vst [vmem:[#allocation22_spill] sm:$0xff] %v18697_v3  ;;  %v18701_v5 = vpop.f32.mrf.mxu0  ;;  %v11588_v3 = vadd.f32 %v11389_v57, %v18613_v10  ;;  %v11602_v10 = vadd.f32 %v11401_v61, %v18629_v34  ;;  %v18745_v34 = vadd.f32 %v11409_v51, %v18639_v45 }
 0x4e8   : > { %v18699_v7 = vpop.f32.mrf.mxu1  ;;  %18974 = vst [vmem:[#allocation24_spill] sm:$0xff] %v18701_v5  ;;  %v11589_v5 = vadd.f32 %v11391_v35, %v18617_v40  ;;  %v18731_v40 = vadd.f32 %v11320_v27, %v18631_v30  ;;  %v12030_v30 = vadd.f32 %v11745_v56, %v11587_v58 }
 0x4e9   : > { %18973 = vst [vmem:[#allocation23_spill] sm:$0xff] %v18699_v7  ;;  %v18705_v18 = vpop.f32.mrf.mxu0  ;;  %v11594_v7 = vadd.f32 %v11308_v52, %v18615_v8  ;;  %v18727_v8 = vpop.permute.xlu1 %12506  ;;  %v18760_v52 = vadd.f32 %v11567_v9, %v18649_v49  ;;  %v12031_v36 = vadd.f32 %v11832_v53, %v11588_v3  ;;  %v18984_v9 = vld [vmem:[#allocation8_spill] sm:$0xff] }
 0x4ea   : > { %v18703_v16 = vpop.f32.mrf.mxu1  ;;  %18976 = vst [vmem:[#allocation26_spill] sm:$0xff] %v18705_v18  ;;  %v11595_v18 = vadd.f32 %v11395_v55, %v18621_v42  ;;  %v18737_v42 = vadd.f32 %v11407_v2, %v18635_v48  ;;  %v18754_v48 = vadd.f32 %v13780_v12, %v18645_v13  ;;  %v18978_v13 = vld [vmem:[#allocation10_spill] sm:$0xff]  ;;  %v12032_v11 = vadd.f32 %v11834_v0, %v11589_v5  ;;  %v18982_v12 = vld [vmem:[#allocation7_spill] sm:$0xff]  ;;  %v18983_v5 = vld [vmem:[#allocation4_spill] sm:$0xff] }
 0x4eb   : > { %18975 = vst [vmem:[#allocation25_spill] sm:$0xff] %v18703_v16  ;;  %v18710_v60 = vpop.f32.mrf.mxu0  ;;  %v11600_v16 = vadd.f32 %v11312_v43, %v18619_v19  ;;  %v18734_v19 = vadd.f32 %v11403_v47, %v18633_v44  ;;  %v18751_v44 = vadd.f32 %v11484_v4, %v18643_v38  ;;  %v12036_v43 = vadd.f32 %v11749_v20, %v11593_v25  ;;  %v18985_v25 = vld [vmem:[#allocation14_spill] sm:$0xff]  ;;  %v18986_v3 = vld [vmem:[#allocation12_spill] sm:$0xff] }
 0x4ec   : > { %v18708_v24 = vpop.f32.mrf.mxu1  ;;  %18977 = vst [vmem:[#allocation27_spill] sm:$0xff] %v18710_v60  ;;  %v18772_v38 = vadd.f32 %v18663_v62, %v18651_v21  ;;  %v18776_v6 = vadd.f32 %v18978_v13, %v18653_v41  ;;  %v12037_v49 = vadd.f32 %v11751_v1, %v11594_v7  ;;  %v18979_v21 = vld [vmem:[#allocation6_spill] sm:$0xff]  ;;  %v18981_v41 = vld [vmem:[#allocation5_spill] sm:$0xff]  ;;  %v18793_v62 = vadd.f32 %v18984_v9, %v18983_v5 }
 0x4ed   : > { %v18722_v60 = vpop.f32.mrf.mxu0  ;;  %v18781_v51 = vpop.permute.xlu1 %12516  ;;  %v18785_v4 = vadd.f32 %v18980_v14, %v18979_v21  ;;  %v18789_v28 = vadd.f32 %v18982_v12, %v18981_v41  ;;  %v12043_v23 = vadd.f32 %v18985_v25, %v11600_v16  ;;  %v12038_v7 = vadd.f32 %v18986_v3, %v11595_v18  ;;  %v18990_v18 = vld [vmem:[#allocation16_spill] sm:$0xff]  ;;  %v18991_v41 = vld [vmem:[#allocation18_spill] sm:$0xff] }
 0x4ee   : > { %v18720_v46 = vpop.f32.mrf.mxu1  ;;  %v12051_v12 = vadd.f32 %v18991_v41, %v18731_v40  ;;  %v12052_v40 = vadd.f32 %v18691_v17, %v18737_v42  ;;  %v18995_v42 = vld [vmem:[#allocation22_spill] sm:$0xff] }
 0x4ef   : > { %v12186_v29 = vpop.f32.mrf.mxu0 }
 0x4f0   : > { %v18742_v15 = vpop.f32.mrf.mxu1  ;;  %v12472_v57 = vadd.f32 %v12186_v29, %v12029_v22  ;;  %v18987_v22 = vld [vmem:[#allocation11_spill] sm:$0xff] }
 0x4f1   : > { %v12188_v45 = vpop.f32.mrf.mxu0  ;;  %v12044_v29 = vadd.f32 %v18987_v22, %v11601_v26  ;;  %v18809_v14 = vpop.permute.xlu1 %12521 }
 0x4f2   : > { %v18762_v35 = vpop.f32.mrf.mxu1  ;;  %v12524_v58 = vadd.f32 %v18727_v8, %v12472_v57  ;;  %v12473_v55 = vadd.f32 %v12188_v45, %v12030_v30  ;;  %v18988_v30 = vld [vmem:[#allocation17_spill] sm:$0xff] }
 0x4f3   : > { %v12192_v32 = vpop.f32.mrf.mxu0  ;;  %v12039_v57 = vadd.f32 %v18988_v30, %v11596_v33 }
 0x4f4   : > { %v12275_v54 = vpop.f32.mrf.mxu1  ;;  %v12552_v61 = vmax.f32 %v12524_v58, 0.0  ;;  %v12525_v27 = vadd.f32 %v18727_v8, %v12473_v55  ;;  %v12479_v47 = vadd.f32 %v12192_v32, %v12036_v43  ;;  %v12045_v32 = vadd.f32 %v18990_v18, %v11602_v10 }
 0x4f5   : > { %v12474_v2 = vadd.f32 %v12275_v54, %v12031_v36  ;;  %v12194_v59 = vpop.f32.mrf.mxu0 }
 0x4f6   : > { %v12277_v56 = vpop.f32.mrf.mxu1  ;;  %12580 = vst [vmem:[%s18768_s9] sm:$0xff] %v12552_v61  ;;  %v12553_v20 = vmax.f32 %v12525_v27, 0.0  ;;  %v12480_v1 = vadd.f32 %v12194_v59, %v12037_v49  ;;  %v12531_v45 = vadd.f32 %v18779_v39, %v12479_v47  ;;  %v18989_v49 = vld [vmem:[#allocation13_spill] sm:$0xff] }
 0x4f7   : > { %v12526_v53 = vadd.f32 %v18727_v8, %v12474_v2  ;;  %v12475_v0 = vadd.f32 %v12277_v56, %v12032_v11  ;;  %v12198_v43 = vpop.f32.mrf.mxu0  ;;  %v12050_v11 = vadd.f32 %v18989_v49, %v11607_v37  ;;  %v18992_v37 = vld [vmem:[#allocation19_spill] sm:$0xff] }
 0x4f8   : > { %v12281_v36 = vpop.f32.mrf.mxu1  ;;  %12581 = vst [vmem:[%s18768_s9 + $0x8] sm:$0xff] %v12553_v20  ;;  %v12532_v55 = vadd.f32 %v18779_v39, %v12480_v1  ;;  %v12486_v13 = vadd.f32 %v12198_v43, %v12043_v23  ;;  %v12559_v26 = vmax.f32 %v12531_v45, 0.0  ;;  %v12046_v10 = vadd.f32 %v18992_v37, %v18734_v19  ;;  %v18993_v19 = vld [vmem:[#allocation20_spill] sm:$0xff]  ;;  %v18994_v43 = vld [vmem:[#allocation21_spill] sm:$0xff] }
 0x4f9   : > { %v12554_v16 = vmax.f32 %v12526_v53, 0.0  ;;  %v12527_v58 = vadd.f32 %v18727_v8, %v12475_v0  ;;  %v12481_v54 = vadd.f32 %v12281_v36, %v12038_v7  ;;  %v12200_v33 = vpop.f32.mrf.mxu0  ;;  %v12033_v1 = vadd.f32 %v18993_v19, %v18740_v63 }
 0x4fa   : > { %v12283_v61 = vpop.f32.mrf.mxu1  ;;  %v12560_v47 = vmax.f32 %v12532_v55, 0.0  ;;  %v12538_v2 = vadd.f32 %v18781_v51, %v12486_v13  ;;  %v12487_v21 = vadd.f32 %v12200_v33, %v12044_v29  ;;  %12588 = vst [vmem:[%s18768_s9 + $0x38] sm:$0xff] %v12559_v26  ;;  %v12053_v17 = vadd.f32 %v18994_v43, %v18745_v34  ;;  %v18997_v26 = vld [vmem:[#allocation24_spill] sm:$0xff] }
 0x4fb   : > { %12582 = vst [vmem:[%s18768_s9 + $0x10] sm:$0xff] %v12554_v16  ;;  %v12555_v27 = vmax.f32 %v12527_v58, 0.0  ;;  %v12533_v5 = vadd.f32 %v18779_v39, %v12481_v54  ;;  %v12482_v9 = vadd.f32 %v12283_v61, %v12039_v57  ;;  %v12204_v25 = vpop.f32.mrf.mxu0  ;;  %v12034_v63 = vadd.f32 %v18995_v42, %v18748_v50 }
 0x4fc   : > { %v12287_v23 = vpop.f32.mrf.mxu1  ;;  %12589 = vst [vmem:[%s18768_s9 + $0x40] sm:$0xff] %v12560_v47  ;;  %v12566_v59 = vmax.f32 %v12538_v2, 0.0  ;;  %v12539_v56 = vadd.f32 %v18781_v51, %v12487_v21  ;;  %v12493_v20 = vadd.f32 %v12204_v25, %v12050_v11  ;;  %v12042_v50 = vadd.f32 %v18997_v26, %v18754_v48  ;;  %v18999_v48 = vld [vmem:[#allocation26_spill] sm:$0xff] }
 0x4fd   : > { %12583 = vst [vmem:[%s18768_s9 + $0x18] sm:$0xff] %v12555_v27  ;;  %v12488_v53 = vadd.f32 %v12287_v23, %v12045_v32  ;;  %v12561_v0 = vmax.f32 %v12533_v5, 0.0  ;;  %v12534_v3 = vadd.f32 %v18779_v39, %v12482_v9  ;;  %v12206_v7 = vpop.f32.mrf.mxu0  ;;  %v18996_v32 = vld [vmem:[#allocation23_spill] sm:$0xff]  ;;  %v12035_v37 = vadd.f32 %v18999_v48, %v18760_v52 }
 0x4fe   : > { %v12289_v22 = vpop.f32.mrf.mxu1  ;;  %12595 = vst [vmem:[%s18768_s9 + $0x70] sm:$0xff] %v12566_v59  ;;  %v12567_v29 = vmax.f32 %v12539_v56, 0.0  ;;  %v12545_v57 = vadd.f32 %v18809_v14, %v12493_v20  ;;  %v12494_v45 = vadd.f32 %v12206_v7, %v12051_v12  ;;  %v12040_v34 = vadd.f32 %v18996_v32, %v18751_v44  ;;  %v18998_v44 = vld [vmem:[#allocation25_spill] sm:$0xff] }
 0x4ff   : > { %v12540_v30 = vadd.f32 %v18781_v51, %v12488_v53  ;;  %12590 = vst [vmem:[%s18768_s9 + $0x48] sm:$0xff] %v12561_v0  ;;  %v12562_v36 = vmax.f32 %v12534_v3, 0.0  ;;  %v12489_v16 = vadd.f32 %v12289_v22, %v12046_v10  ;;  %v12364_v55 = vpop.f32.mrf.mxu0  ;;  %v12041_v12 = vadd.f32 %v18998_v44, %v18757_v31  ;;  %v19000_v53 = vld [vmem:[#allocation27_spill] sm:$0xff] }
 0x500   : > { %v12293_v58 = vpop.f32.mrf.mxu1  ;;  %12596 = vst [vmem:[%s18768_s9 + $0x78] sm:$0xff] %v12567_v29  ;;  %v12573_v49 = vmax.f32 %v12545_v57, 0.0  ;;  %v12546_v11 = vadd.f32 %v18809_v14, %v12494_v45  ;;  %v12476_v33 = vadd.f32 %v12364_v55, %v12033_v1  ;;  %v12047_v31 = vadd.f32 %v18708_v24, %v18772_v38  ;;  %v19002_v57 = vld [vmem:[#allocation15_spill] sm:$0xff] }
 0x501   : > { %v12568_v13 = vmax.f32 %v12540_v30, 0.0  ;;  %v12495_v18 = vadd.f32 %v12293_v58, %v12052_v40  ;;  %12591 = vst [vmem:[%s18768_s9 + $0x50] sm:$0xff] %v12562_v36  ;;  %v12541_v54 = vadd.f32 %v18781_v51, %v12489_v16  ;;  %v12366_v27 = vpop.f32.mrf.mxu0  ;;  %v12056_v52 = vadd.f32 %v19000_v53, %v18776_v6  ;;  %v19001_v30 = vld [vmem:[#allocation3_spill] sm:$0xff] }
 0x502   : > { %v12295_v61 = vpop.f32.mrf.mxu1  ;;  %12602 = vst [vmem:[%s18768_s9 + $0xa8] sm:$0xff] %v12573_v49  ;;  %v12574_v47 = vmax.f32 %v12546_v11, 0.0  ;;  %v12477_v41 = vadd.f32 %v12366_v27, %v12034_v63  ;;  %v12528_v5 = vadd.f32 %v18727_v8, %v12476_v33  ;;  %v11612_v45 = vadd.f32 %v19002_v57, %v19001_v30 }
 0x503   : > { %12597 = vst [vmem:[%s18768_s9 + $0x80] sm:$0xff] %v12568_v13  ;;  %v12547_v2 = vadd.f32 %v18809_v14, %v12495_v18  ;;  %v12496_v21 = vadd.f32 %v12295_v61, %v12053_v17  ;;  %v12569_v10 = vmax.f32 %v12541_v54, 0.0  ;;  %v12370_v9 = vpop.f32.mrf.mxu0  ;;  %v12048_v24 = vadd.f32 %v18720_v46, %v18785_v4 }
 0x504   : > { %v13796_v25 = vpop.f32.mrf.mxu1  ;;  %12603 = vst [vmem:[%s18768_s9 + $0xb0] sm:$0xff] %v12574_v47  ;;  %v12529_v56 = vadd.f32 %v18727_v8, %v12477_v41  ;;  %v12483_v20 = vadd.f32 %v12370_v9, %v12040_v34  ;;  %v12556_v40 = vmax.f32 %v12528_v5, 0.0  ;;  %v12049_v58 = vadd.f32 %v18722_v60, %v18789_v28 }
 0x505   : > { %v12575_v23 = vmax.f32 %v12547_v2, 0.0  ;;  %v12548_v59 = vadd.f32 %v18809_v14, %v12496_v21  ;;  %12598 = vst [vmem:[%s18768_s9 + $0x88] sm:$0xff] %v12569_v10  ;;  %v12485_v19 = vadd.f32 %v13796_v25, %v12042_v50  ;;  %v12372_v1 = vpop.f32.mrf.mxu0  ;;  %v12054_v46 = vadd.f32 %v18742_v15, %v18793_v62 }
 0x506   : > { %v12453_v0 = vpop.f32.mrf.mxu1  ;;  %v12557_v7 = vmax.f32 %v12529_v56, 0.0  ;;  %v12535_v22 = vadd.f32 %v18779_v39, %v12483_v20  ;;  %v12484_v29 = vadd.f32 %v12372_v1, %v12041_v12  ;;  %12584 = vst [vmem:[%s18768_s9 + $0x20] sm:$0xff] %v12556_v40  ;;  %v12055_v60 = vadd.f32 %v18762_v35, %v11612_v45 }
 0x507   : > { %12604 = vst [vmem:[%s18768_s9 + $0xb8] sm:$0xff] %v12575_v23  ;;  %v12576_v3 = vmax.f32 %v12548_v59, 0.0  ;;  %v12537_v38 = vadd.f32 %v18779_v39, %v12485_v19  ;;  %v12478_v6 = vadd.f32 %v12453_v0, %v12035_v37  ;;  %v12376_v43 = vpop.f32.mrf.mxu0 }
 0x508   : > { %v13799_v17 = vpop.f32.mrf.mxu1  ;;  %12585 = vst [vmem:[%s18768_s9 + $0x28] sm:$0xff] %v12557_v7  ;;  %v12563_v42 = vmax.f32 %v12535_v22, 0.0  ;;  %v12536_v63 = vadd.f32 %v18779_v39, %v12484_v29  ;;  %v12490_v36 = vadd.f32 %v12376_v43, %v12047_v31 }
 0x509   : > { %12605 = vst [vmem:[%s18768_s9 + $0xc0] sm:$0xff] %v12576_v3  ;;  %v12499_v16 = vadd.f32 %v13799_v17, %v12056_v52  ;;  %v12565_v4 = vmax.f32 %v12537_v38, 0.0  ;;  %v12530_v55 = vadd.f32 %v18727_v8, %v12478_v6  ;;  %v12378_v13 = vpop.f32.mrf.mxu0 }
 0x50a   : > { %v12463_v49 = vpop.f32.mrf.mxu1  ;;  %12592 = vst [vmem:[%s18768_s9 + $0x58] sm:$0xff] %v12563_v42  ;;  %v12564_v11 = vmax.f32 %v12536_v63, 0.0  ;;  %v12542_v18 = vadd.f32 %v18781_v51, %v12490_v36  ;;  %v12491_v32 = vadd.f32 %v12378_v13, %v12048_v24 }
 0x50b   : > { %v12551_v39 = vadd.f32 %v18809_v14, %v12499_v16  ;;  %12594 = vst.msk [vmem:[%s18768_s9 + $0x68] sm:$0xff] %vm12586_vm2, %v12565_v4  ;;  %v12558_v15 = vmax.f32 %v12530_v55, 0.0  ;;  %v12492_v28 = vadd.f32 %v12463_v49, %v12049_v58  ;;  %v12382_v8 = vpop.f32.mrf.mxu0 }
 0x50c   : > { %12593 = vst [vmem:[%s18768_s9 + $0x60] sm:$0xff] %v12564_v11  ;;  %v12570_v62 = vmax.f32 %v12542_v18, 0.0  ;;  %v12543_v26 = vadd.f32 %v18781_v51, %v12491_v32  ;;  %v12497_v50 = vadd.f32 %v12382_v8, %v12054_v46 }
 0x50d   : > { %v12579_v34 = vmax.f32 %v12551_v39, 0.0  ;;  %12587 = vst.msk [vmem:[%s18768_s9 + $0x30] sm:$0xff] %vm12586_vm2, %v12558_v15  ;;  %v12544_v54 = vadd.f32 %v18781_v51, %v12492_v28  ;;  %v12384_v35 = vpop.f32.mrf.mxu0 }
 0x50e   : > { %12599 = vst [vmem:[%s18768_s9 + $0x90] sm:$0xff] %v12570_v62  ;;  %v12571_v33 = vmax.f32 %v12543_v26, 0.0  ;;  %v12549_v61 = vadd.f32 %v18809_v14, %v12497_v50  ;;  %v12498_v27 = vadd.f32 %v12384_v35, %v12055_v60 }
 0x50f   : > { %12608 = vst.msk [vmem:[%s18768_s9 + $0xd8] sm:$0xff] %vm12586_vm2, %v12579_v34  ;;  %v12572_v47 = vmax.f32 %v12544_v54, 0.0 }
 0x510   : > { %12600 = vst [vmem:[%s18768_s9 + $0x98] sm:$0xff] %v12571_v33  ;;  %v12577_v2 = vmax.f32 %v12549_v61, 0.0  ;;  %v12550_v21 = vadd.f32 %v18809_v14, %v12498_v27 }
 0x511   : > { %12601 = vst.msk [vmem:[%s18768_s9 + $0xa0] sm:$0xff] %vm12586_vm2, %v12572_v47 }
 0x512   : > { %12606 = vst [vmem:[%s18768_s9 + $0xc8] sm:$0xff] %v12577_v2  ;;  %v12578_v41 = vmax.f32 %v12550_v21, 0.0 }
 0x514   : > { %12607 = vst [vmem:[%s18768_s9 + $0xd0] sm:$0xff] %v12578_v41 }
 0x515 PF: > { %s14_s17 = sadd.s32 1, %s13887_s17   ;;  %s19003_s15 = smov %s13883_s16 }
 0x516   : > { %p11_p5 = scmp.ge.s32.totalorder %s14_s17, 4   ;;  %s19004_s16 = smov %s19006_s18 }
 0x518   :  { %13 = sbr.rel (!%p11_p5) target bundleno = 2 (0x2), region = 92 }

</bundles_post_ra>
